<compile_context>
chip_gen: v7x
topology: tpu7x:2x2x1
jax: 0.10.0
libtpu: 0.0.40
codegen_flags: <defaults>
</compile_context>

<pallas_src>
import functools
import math

import jax
import jax.numpy as jnp
from jax import lax
from jax.experimental import pallas as pl
from jax.experimental.pallas import tpu as pltpu


# ----------------------------- Pallas kernel -----------------------------

def _encoder_layer_kernel(x_full_ref, x_q_ref, m_ref, ln0a_ref, ln0b_ref,
                          wq_ref, bq_ref, wkv_ref, bkv_ref, wo_ref, bo_ref,
                          ln1a_ref, ln1b_ref, w1_ref, b1_ref, w2_ref, b2_ref,
                          *rest, h, d_k, eps, final_norm):
    if final_norm:
        fna_ref, fnb_ref, o_ref, attn_ref = rest
    else:
        o_ref, attn_ref = rest
        fna_ref = fnb_ref = None

    f32 = jnp.float32
    bf16 = jnp.bfloat16
    D = h * d_k

    def layer_norm(v, a_ref, b_ref):
        # torch: a * (v - mean) / (std + eps) + b, std unbiased (divisor D-1).
        # Divide replaced by a [rows,1] reciprocal followed by multiplies.
        mean = jnp.mean(v, axis=-1, keepdims=True)
        vc = v - mean
        var = jnp.sum(vc * vc, axis=-1, keepdims=True) * (1.0 / (D - 1))
        inv = 1.0 / (jnp.sqrt(var) + eps)            # [rows, 1]
        return vc * inv * a_ref[...] + b_ref[...]

    x_full = x_full_ref[0].astype(f32)               # [T, D]  (key/value rows)
    x_q = x_q_ref[0].astype(f32)                     # [tq, D] (query-tile rows)

    # Additive mask bias, computed ONCE (hoisted out of the head loop).
    bias = jnp.where(m_ref[0] != 0.0, jnp.float32(0.0), jnp.float32(-1e9))  # [1, T]

    # ---- sublayer 0: pre-norm masked self-attention + residual ----
    xn_full = layer_norm(x_full, ln0a_ref, ln0b_ref).astype(bf16)   # [T, D]
    xn_q = layer_norm(x_q, ln0a_ref, ln0b_ref).astype(bf16)         # [tq, D]

    # Packed K|V projection over all rows; Q only for the query tile.
    # (1/sqrt(d_k) is pre-folded into wq / bq at parameter-prep time.)
    kv = (jnp.dot(xn_full, wkv_ref[...], preferred_element_type=f32)
          + bkv_ref[...]).astype(bf16)                               # [T, 2D]
    q = (jnp.dot(xn_q, wq_ref[...], preferred_element_type=f32)
         + bq_ref[...]).astype(bf16)                                 # [tq, D]

    # Static head loop; per-head outputs go into the VMEM concat scratch so a
    # single full-depth W_o matmul can follow.
    for hh in range(h):
        lo = hh * d_k
        qh = q[:, lo:lo + d_k]                                       # [tq, d_k]
        kh = kv[:, lo:lo + d_k]                                      # [T, d_k]
        vh = kv[:, D + lo:D + lo + d_k]                              # [T, d_k]
        s = lax.dot_general(qh, kh, (((1,), (1,)), ((), ())),
                            preferred_element_type=f32)              # [tq, T]
        s = s + bias
        m = jnp.max(s, axis=-1, keepdims=True)
        e = jnp.exp(s - m)
        # NOTE: fully-masked rows would produce NaN (cannot happen with the
        # all-ones / causal masks used here).
        p = e * pl.reciprocal(jnp.sum(e, axis=-1, keepdims=True), approx=True)
        attn_ref[:, lo:lo + d_k] = jnp.dot(p.astype(bf16), vh,
                                           preferred_element_type=f32)

    # ONE output projection at full contraction depth D (not h shallow ones).
    x1 = (x_q
          + jnp.dot(attn_ref[...].astype(bf16), wo_ref[...],
                    preferred_element_type=f32)
          + bo_ref[...])                                             # [tq, D]

    # ---- sublayer 1: pre-norm position-wise FFN + residual ----
    xn1 = layer_norm(x1, ln1a_ref, ln1b_ref).astype(bf16)
    hid = jnp.dot(xn1, w1_ref[...], preferred_element_type=f32) + b1_ref[...]
    hid = jnp.maximum(hid, 0.0).astype(bf16)
    y = x1 + jnp.dot(hid, w2_ref[...], preferred_element_type=f32) + b2_ref[...]

    # Fused encoder-level LayerNorm epilogue on the last layer.
    if final_norm:
        y = layer_norm(y, fna_ref, fnb_ref)
    o_ref[0] = y.astype(o_ref.dtype)


def encoder_layer(lp, x, mask, *, h, d_k, tq=None, eps=1e-6,
                  final_norm_params=None):
    B, T, D = x.shape
    F = lp["w1"].shape[1]
    if tq is None or T % tq != 0:
        tq = T
    nq = T // tq
    final_norm = final_norm_params is not None

    kernel = functools.partial(_encoder_layer_kernel, h=h, d_k=d_k, eps=eps,
                               final_norm=final_norm)
    const = lambda b, qi: (0, 0)
    in_specs = [
        pl.BlockSpec((1, T, D), lambda b, qi: (b, 0, 0)),    # x (full rows: K/V)
        pl.BlockSpec((1, tq, D), lambda b, qi: (b, qi, 0)),  # x (query tile)
        pl.BlockSpec((1, 1, T), lambda b, qi: (b, 0, 0)),    # mask
        pl.BlockSpec((1, D), const), pl.BlockSpec((1, D), const),      # ln0 a,b
        pl.BlockSpec((D, D), const), pl.BlockSpec((1, D), const),      # Wq, bq (pre-scaled, bf16)
        pl.BlockSpec((D, 2 * D), const), pl.BlockSpec((1, 2 * D), const),  # Wkv, bkv
        pl.BlockSpec((D, D), const), pl.BlockSpec((1, D), const),      # Wo, bo
        pl.BlockSpec((1, D), const), pl.BlockSpec((1, D), const),      # ln1 a,b
        pl.BlockSpec((D, F), const), pl.BlockSpec((1, F), const),      # FFN W1, b1
        pl.BlockSpec((F, D), const), pl.BlockSpec((1, D), const),      # FFN W2, b2
    ]
    args = [x, x, mask,
            lp["ln0_a"], lp["ln0_b"],
            lp["wq"], lp["bq"], lp["wkv"], lp["bkv"], lp["wo"], lp["bo"],
            lp["ln1_a"], lp["ln1_b"],
            lp["w1"], lp["b1"], lp["w2"], lp["b2"]]
    if final_norm:
        in_specs += [pl.BlockSpec((1, D), const), pl.BlockSpec((1, D), const)]
        args += [final_norm_params[0], final_norm_params[1]]

    return pl.pallas_call(
        kernel,
        out_shape=jax.ShapeDtypeStruct((B, T, D), x.dtype),
        grid=(B, nq),
        in_specs=in_specs,
        out_specs=pl.BlockSpec((1, tq, D), lambda b, qi: (b, qi, 0)),
        scratch_shapes=[pltpu.VMEM((tq, D), jnp.float32)],   # per-head concat buffer
        compiler_params=pltpu.CompilerParams(
            dimension_semantics=("parallel", "parallel")),
    )(*args)


# ------------------------------ model glue ------------------------------

def encoder_forward(prep, x, mask, *, h, d_k, tq=None):
    """Encoder.forward: each layer in turn; final LayerNorm fused into the last."""
    n = len(prep["layers"])
    for i, lp in enumerate(prep["layers"]):
        fin = (prep["norm_a"], prep["norm_b"]) if i == n - 1 else None
        x = encoder_layer(lp, x, mask, h=h, d_k=d_k, tq=tq, final_norm_params=fin)
    return x


# --------------------------- parameter handling ---------------------------

def _lin_init(key, d_in, d_out, scale=0.1):
    kw, kb = jax.random.split(key)
    w = scale * jax.random.normal(kw, (d_in, d_out), jnp.float32)  # stored [in, out]
    b = scale * jax.random.normal(kb, (d_out,), jnp.float32)
    return w, b


def init_layer_params(key, d_model, d_ff):
    ks = jax.random.split(key, 6)
    wq, bq = _lin_init(ks[0], d_model, d_model)
    wk, bk = _lin_init(ks[1], d_model, d_model)
    wv, bv = _lin_init(ks[2], d_model, d_model)
    wo, bo = _lin_init(ks[3], d_model, d_model)
    ff_w1, ff_b1 = _lin_init(ks[4], d_model, d_ff)
    ff_w2, ff_b2 = _lin_init(ks[5], d_ff, d_model)
    ones = jnp.ones((d_model,), jnp.float32)
    zeros = jnp.zeros((d_model,), jnp.float32)
    return dict(wq=wq, bq=bq, wk=wk, bk=bk, wv=wv, bv=bv, wo=wo, bo=bo,
                ff_w1=ff_w1, ff_b1=ff_b1, ff_w2=ff_w2, ff_b2=ff_b2,
                ln0_a=ones, ln0_b=zeros, ln1_a=ones, ln1_b=zeros)


def init_encoder_params(key, n_layers, d_model, d_ff):
    ks = jax.random.split(key, n_layers)
    return dict(
        layers=[init_layer_params(ks[i], d_model, d_ff) for i in range(n_layers)],
        norm_a=jnp.ones((d_model,), jnp.float32),
        norm_b=jnp.zeros((d_model,), jnp.float32),
    )


def prepare_layer_params(p, d_k):
    """One-time packing / scaling / bf16 cast of all per-layer weights."""
    bf16 = jnp.bfloat16
    scale = 1.0 / math.sqrt(d_k)
    return dict(
        wq=(p["wq"] * scale).astype(bf16),
        bq=(p["bq"] * scale).reshape(1, -1),
        wkv=jnp.concatenate([p["wk"], p["wv"]], axis=1).astype(bf16),
        bkv=jnp.concatenate([p["bk"], p["bv"]]).reshape(1, -1),
        wo=p["wo"].astype(bf16),
        bo=p["bo"].reshape(1, -1),
        w1=p["ff_w1"].astype(bf16), b1=p["ff_b1"].reshape(1, -1),
        w2=p["ff_w2"].astype(bf16), b2=p["ff_b2"].reshape(1, -1),
        ln0_a=p["ln0_a"].reshape(1, -1), ln0_b=p["ln0_b"].reshape(1, -1),
        ln1_a=p["ln1_a"].reshape(1, -1), ln1_b=p["ln1_b"].reshape(1, -1),
    )


def prepare_encoder_params(params, d_k):
    return dict(
        layers=[prepare_layer_params(lp, d_k) for lp in params["layers"]],
        norm_a=params["norm_a"].reshape(1, -1),
        norm_b=params["norm_b"].reshape(1, -1),
    )


# --------------------------------- main ---------------------------------

if __name__ == "__main__":
    B, T = 2, 8                       # batch, sequence length
    D_MODEL, H, D_FF, N = 32, 4, 64, 2
    D_K = D_MODEL // H

    key = jax.random.PRNGKey(0)
    kp, kx = jax.random.split(key)

    raw_params = init_encoder_params(kp, N, D_MODEL, D_FF)
    prep = prepare_encoder_params(raw_params, D_K)        # packed + bf16, done once

    x = jax.random.normal(kx, (B, T, D_MODEL), jnp.float32)
    # Encoder src-style mask: [B, 1, T], all positions visible.
    mask = jnp.ones((B, 1, T), jnp.float32)

    fwd = jax.jit(functools.partial(encoder_forward, h=H, d_k=D_K))
    out = fwd(prep, x, mask)
    jax.block_until_ready(out)

    assert out.shape == (B, T, D_MODEL) and out.dtype == jnp.float32
    assert bool(jnp.all(jnp.isfinite(out)))
    print("KERNEL_OK")
</pallas_src>

<mosaic_0001>
module attributes {stable_mosaic.version = 11 : i64} {
  func.func @_encoder_layer_kernel(%arg0: i32, %arg1: i32, %arg2: memref<1x8x32xf32, #tpu.memory_space<vmem>>, %arg3: memref<1x8x32xf32, #tpu.memory_space<vmem>>, %arg4: memref<1x1x8xf32, #tpu.memory_space<vmem>>, %arg5: memref<1x32xf32, #tpu.memory_space<vmem>>, %arg6: memref<1x32xf32, #tpu.memory_space<vmem>>, %arg7: memref<32x32xbf16, #tpu.memory_space<vmem>>, %arg8: memref<1x32xf32, #tpu.memory_space<vmem>>, %arg9: memref<32x64xbf16, #tpu.memory_space<vmem>>, %arg10: memref<1x64xf32, #tpu.memory_space<vmem>>, %arg11: memref<32x32xbf16, #tpu.memory_space<vmem>>, %arg12: memref<1x32xf32, #tpu.memory_space<vmem>>, %arg13: memref<1x32xf32, #tpu.memory_space<vmem>>, %arg14: memref<1x32xf32, #tpu.memory_space<vmem>>, %arg15: memref<32x64xbf16, #tpu.memory_space<vmem>>, %arg16: memref<1x64xf32, #tpu.memory_space<vmem>>, %arg17: memref<64x32xbf16, #tpu.memory_space<vmem>>, %arg18: memref<1x32xf32, #tpu.memory_space<vmem>>, %arg19: memref<1x8x32xf32, #tpu.memory_space<vmem>>, %arg20: memref<8x32xf32, #tpu.memory_space<vmem>>) attributes {dimension_semantics = [#tpu.dimension_semantics<parallel>, #tpu.dimension_semantics<parallel>], iteration_bounds = array<i64: 2, 1>, scalar_prefetch = 0 : i64, scratch_operands = 1 : i64, tpu.core_type = #tpu.core_type<tc>, window_params = [{transform_indices = @transform_0, window_bounds = array<i64: 1, 8, 32>}, {transform_indices = @transform_1, window_bounds = array<i64: 1, 8, 32>}, {transform_indices = @transform_2, window_bounds = array<i64: 1, 1, 8>}, {pipeline_mode = #tpu.pipeline_mode<synchronous>, transform_indices = @transform_3, window_bounds = array<i64: 1, 32>}, {pipeline_mode = #tpu.pipeline_mode<synchronous>, transform_indices = @transform_4, window_bounds = array<i64: 1, 32>}, {pipeline_mode = #tpu.pipeline_mode<synchronous>, transform_indices = @transform_5, window_bounds = array<i64: 32, 32>}, {pipeline_mode = #tpu.pipeline_mode<synchronous>, transform_indices = @transform_6, window_bounds = array<i64: 1, 32>}, {pipeline_mode = #tpu.pipeline_mode<synchronous>, transform_indices = @transform_7, window_bounds = array<i64: 32, 64>}, {pipeline_mode = #tpu.pipeline_mode<synchronous>, transform_indices = @transform_8, window_bounds = array<i64: 1, 64>}, {pipeline_mode = #tpu.pipeline_mode<synchronous>, transform_indices = @transform_9, window_bounds = array<i64: 32, 32>}, {pipeline_mode = #tpu.pipeline_mode<synchronous>, transform_indices = @transform_10, window_bounds = array<i64: 1, 32>}, {pipeline_mode = #tpu.pipeline_mode<synchronous>, transform_indices = @transform_11, window_bounds = array<i64: 1, 32>}, {pipeline_mode = #tpu.pipeline_mode<synchronous>, transform_indices = @transform_12, window_bounds = array<i64: 1, 32>}, {pipeline_mode = #tpu.pipeline_mode<synchronous>, transform_indices = @transform_13, window_bounds = array<i64: 32, 64>}, {pipeline_mode = #tpu.pipeline_mode<synchronous>, transform_indices = @transform_14, window_bounds = array<i64: 1, 64>}, {pipeline_mode = #tpu.pipeline_mode<synchronous>, transform_indices = @transform_15, window_bounds = array<i64: 64, 32>}, {pipeline_mode = #tpu.pipeline_mode<synchronous>, transform_indices = @transform_16, window_bounds = array<i64: 1, 32>}, {transform_indices = @transform_17, window_bounds = array<i64: 1, 8, 32>}]} {
    %c0 = arith.constant 0 : index
    %c0_0 = arith.constant 0 : index
    %c0_1 = arith.constant 0 : index
    %0 = vector.load %arg2[%c0, %c0_0, %c0_1] : memref<1x8x32xf32, #tpu.memory_space<vmem>>, vector<1x8x32xf32>
    %1 = vector.shape_cast %0 : vector<1x8x32xf32> to vector<8x32xf32>
    %c0_2 = arith.constant 0 : index
    %c0_3 = arith.constant 0 : index
    %c0_4 = arith.constant 0 : index
    %2 = vector.load %arg3[%c0_2, %c0_3, %c0_4] : memref<1x8x32xf32, #tpu.memory_space<vmem>>, vector<1x8x32xf32>
    %3 = vector.shape_cast %2 : vector<1x8x32xf32> to vector<8x32xf32>
    %c0_5 = arith.constant 0 : index
    %c0_6 = arith.constant 0 : index
    %c0_7 = arith.constant 0 : index
    %4 = vector.load %arg4[%c0_5, %c0_6, %c0_7] : memref<1x1x8xf32, #tpu.memory_space<vmem>>, vector<1x1x8xf32>
    %5 = vector.shape_cast %4 : vector<1x1x8xf32> to vector<1x8xf32>
    %cst = arith.constant 0.000000e+00 : f32
    %6 = vector.broadcast %cst : f32 to vector<1x8xf32>
    %7 = arith.cmpf one, %5, %6 : vector<1x8xf32>
    %cst_8 = arith.constant 0.000000e+00 : f32
    %cst_9 = arith.constant -1.000000e+09 : f32
    %8 = vector.broadcast %cst_8 : f32 to vector<1x8xf32>
    %9 = vector.broadcast %cst_9 : f32 to vector<1x8xf32>
    %10 = arith.select %7, %8, %9 : vector<1x8xi1>, vector<1x8xf32>
    %cst_10 = arith.constant dense<0.000000e+00> : vector<8xf32>
    %11 = vector.multi_reduction <add>, %1, %cst_10 [1] : vector<8x32xf32> to vector<8xf32>
    %12 = vector.shape_cast %11 : vector<8xf32> to vector<8x1xf32>
    %cst_11 = arith.constant 3.200000e+01 : f32
    %13 = vector.broadcast %cst_11 : f32 to vector<8x1xf32>
    %14 = arith.divf %12, %13 : vector<8x1xf32>
    %15 = vector.broadcast %14 : vector<8x1xf32> to vector<8x32xf32>
    %16 = arith.subf %1, %15 : vector<8x32xf32>
    %17 = arith.mulf %16, %16 : vector<8x32xf32>
    %cst_12 = arith.constant dense<0.000000e+00> : vector<8xf32>
    %18 = vector.multi_reduction <add>, %17, %cst_12 [1] : vector<8x32xf32> to vector<8xf32>
    %19 = vector.shape_cast %18 : vector<8xf32> to vector<8x1xf32>
    %cst_13 = arith.constant 0.0322580636 : f32
    %20 = vector.broadcast %cst_13 : f32 to vector<8x1xf32>
    %21 = arith.mulf %19, %20 : vector<8x1xf32>
    %22 = math.sqrt %21 : vector<8x1xf32>
    %cst_14 = arith.constant 9.99999997E-7 : f32
    %23 = vector.broadcast %cst_14 : f32 to vector<8x1xf32>
    %24 = arith.addf %22, %23 : vector<8x1xf32>
    %cst_15 = arith.constant 1.000000e+00 : f32
    %25 = vector.broadcast %cst_15 : f32 to vector<8x1xf32>
    %26 = arith.divf %25, %24 : vector<8x1xf32>
    %27 = vector.broadcast %26 : vector<8x1xf32> to vector<8x32xf32>
    %28 = arith.mulf %16, %27 : vector<8x32xf32>
    %c0_16 = arith.constant 0 : index
    %c0_17 = arith.constant 0 : index
    %29 = vector.load %arg5[%c0_16, %c0_17] : memref<1x32xf32, #tpu.memory_space<vmem>>, vector<1x32xf32>
    %30 = vector.broadcast %29 : vector<1x32xf32> to vector<8x32xf32>
    %31 = arith.mulf %28, %30 : vector<8x32xf32>
    %c0_18 = arith.constant 0 : index
    %c0_19 = arith.constant 0 : index
    %32 = vector.load %arg6[%c0_18, %c0_19] : memref<1x32xf32, #tpu.memory_space<vmem>>, vector<1x32xf32>
    %33 = vector.broadcast %32 : vector<1x32xf32> to vector<8x32xf32>
    %34 = arith.addf %31, %33 : vector<8x32xf32>
    %35 = arith.truncf %34 : vector<8x32xf32> to vector<8x32xbf16>
    %cst_20 = arith.constant dense<0.000000e+00> : vector<8xf32>
    %36 = vector.multi_reduction <add>, %3, %cst_20 [1] : vector<8x32xf32> to vector<8xf32>
    %37 = vector.shape_cast %36 : vector<8xf32> to vector<8x1xf32>
    %cst_21 = arith.constant 3.200000e+01 : f32
    %38 = vector.broadcast %cst_21 : f32 to vector<8x1xf32>
    %39 = arith.divf %37, %38 : vector<8x1xf32>
    %40 = vector.broadcast %39 : vector<8x1xf32> to vector<8x32xf32>
    %41 = arith.subf %3, %40 : vector<8x32xf32>
    %42 = arith.mulf %41, %41 : vector<8x32xf32>
    %cst_22 = arith.constant dense<0.000000e+00> : vector<8xf32>
    %43 = vector.multi_reduction <add>, %42, %cst_22 [1] : vector<8x32xf32> to vector<8xf32>
    %44 = vector.shape_cast %43 : vector<8xf32> to vector<8x1xf32>
    %cst_23 = arith.constant 0.0322580636 : f32
    %45 = vector.broadcast %cst_23 : f32 to vector<8x1xf32>
    %46 = arith.mulf %44, %45 : vector<8x1xf32>
    %47 = math.sqrt %46 : vector<8x1xf32>
    %cst_24 = arith.constant 9.99999997E-7 : f32
    %48 = vector.broadcast %cst_24 : f32 to vector<8x1xf32>
    %49 = arith.addf %47, %48 : vector<8x1xf32>
    %cst_25 = arith.constant 1.000000e+00 : f32
    %50 = vector.broadcast %cst_25 : f32 to vector<8x1xf32>
    %51 = arith.divf %50, %49 : vector<8x1xf32>
    %52 = vector.broadcast %51 : vector<8x1xf32> to vector<8x32xf32>
    %53 = arith.mulf %41, %52 : vector<8x32xf32>
    %c0_26 = arith.constant 0 : index
    %c0_27 = arith.constant 0 : index
    %54 = vector.load %arg5[%c0_26, %c0_27] : memref<1x32xf32, #tpu.memory_space<vmem>>, vector<1x32xf32>
    %55 = vector.broadcast %54 : vector<1x32xf32> to vector<8x32xf32>
    %56 = arith.mulf %53, %55 : vector<8x32xf32>
    %c0_28 = arith.constant 0 : index
    %c0_29 = arith.constant 0 : index
    %57 = vector.load %arg6[%c0_28, %c0_29] : memref<1x32xf32, #tpu.memory_space<vmem>>, vector<1x32xf32>
    %58 = vector.broadcast %57 : vector<1x32xf32> to vector<8x32xf32>
    %59 = arith.addf %56, %58 : vector<8x32xf32>
    %60 = arith.truncf %59 : vector<8x32xf32> to vector<8x32xbf16>
    %c0_30 = arith.constant 0 : index
    %c0_31 = arith.constant 0 : index
    %61 = vector.load %arg9[%c0_30, %c0_31] : memref<32x64xbf16, #tpu.memory_space<vmem>>, vector<32x64xbf16>
    %cst_32 = arith.constant dense<0.000000e+00> : vector<8x64xf32>
    %62 = tpu.matmul %35, %61, %cst_32 {dimension_numbers = #tpu.dot_dimension_numbers<[1], [0], [0], [1], [0, 0, 1, 1], [], []>} : vector<8x32xbf16>, vector<32x64xbf16>, vector<8x64xf32> -> vector<8x64xf32>
    %c0_33 = arith.constant 0 : index
    %c0_34 = arith.constant 0 : index
    %63 = vector.load %arg10[%c0_33, %c0_34] : memref<1x64xf32, #tpu.memory_space<vmem>>, vector<1x64xf32>
    %64 = vector.broadcast %63 : vector<1x64xf32> to vector<8x64xf32>
    %65 = arith.addf %62, %64 : vector<8x64xf32>
    %66 = arith.truncf %65 : vector<8x64xf32> to vector<8x64xbf16>
    %c0_35 = arith.constant 0 : index
    %c0_36 = arith.constant 0 : index
    %67 = vector.load %arg7[%c0_35, %c0_36] : memref<32x32xbf16, #tpu.memory_space<vmem>>, vector<32x32xbf16>
    %cst_37 = arith.constant dense<0.000000e+00> : vector<8x32xf32>
    %68 = tpu.matmul %60, %67, %cst_37 {dimension_numbers = #tpu.dot_dimension_numbers<[1], [0], [0], [1], [0, 0, 1, 1], [], []>} : vector<8x32xbf16>, vector<32x32xbf16>, vector<8x32xf32> -> vector<8x32xf32>
    %c0_38 = arith.constant 0 : index
    %c0_39 = arith.constant 0 : index
    %69 = vector.load %arg8[%c0_38, %c0_39] : memref<1x32xf32, #tpu.memory_space<vmem>>, vector<1x32xf32>
    %70 = vector.broadcast %69 : vector<1x32xf32> to vector<8x32xf32>
    %71 = arith.addf %68, %70 : vector<8x32xf32>
    %72 = arith.truncf %71 : vector<8x32xf32> to vector<8x32xbf16>
    %73 = vector.extract_strided_slice %72 {offsets = [0, 0], sizes = [8, 8], strides = [1, 1]} : vector<8x32xbf16> to vector<8x8xbf16>
    %74 = vector.extract_strided_slice %66 {offsets = [0, 0], sizes = [8, 8], strides = [1, 1]} : vector<8x64xbf16> to vector<8x8xbf16>
    %75 = vector.extract_strided_slice %66 {offsets = [0, 32], sizes = [8, 8], strides = [1, 1]} : vector<8x64xbf16> to vector<8x8xbf16>
    %cst_40 = arith.constant dense<0.000000e+00> : vector<8x8xf32>
    %76 = tpu.matmul %73, %74, %cst_40 {dimension_numbers = #tpu.dot_dimension_numbers<[1], [1], [0], [0], [0, 0, 1, 0], [], []>} : vector<8x8xbf16>, vector<8x8xbf16>, vector<8x8xf32> -> vector<8x8xf32>
    %77 = vector.broadcast %10 : vector<1x8xf32> to vector<8x8xf32>
    %78 = arith.addf %76, %77 : vector<8x8xf32>
    %cst_41 = arith.constant dense<0xFF800000> : vector<8xf32>
    %79 = vector.multi_reduction <maximumf>, %78, %cst_41 [1] : vector<8x8xf32> to vector<8xf32>
    %80 = vector.shape_cast %79 : vector<8xf32> to vector<8x1xf32>
    %81 = vector.broadcast %80 : vector<8x1xf32> to vector<8x8xf32>
    %82 = arith.subf %78, %81 : vector<8x8xf32>
    %83 = math.exp %82 : vector<8x8xf32>
    %cst_42 = arith.constant dense<0.000000e+00> : vector<8xf32>
    %84 = vector.multi_reduction <add>, %83, %cst_42 [1] : vector<8x8xf32> to vector<8xf32>
    %85 = vector.shape_cast %84 : vector<8xf32> to vector<8x1xf32>
    %86 = tpu.reciprocal %85 {approx = true} : vector<8x1xf32> -> vector<8x1xf32>
    %87 = vector.broadcast %86 : vector<8x1xf32> to vector<8x8xf32>
    %88 = arith.mulf %83, %87 : vector<8x8xf32>
    %89 = arith.truncf %88 : vector<8x8xf32> to vector<8x8xbf16>
    %cst_43 = arith.constant dense<0.000000e+00> : vector<8x8xf32>
    %90 = tpu.matmul %89, %75, %cst_43 {dimension_numbers = #tpu.dot_dimension_numbers<[1], [0], [0], [1], [0, 0, 1, 1], [], []>} : vector<8x8xbf16>, vector<8x8xbf16>, vector<8x8xf32> -> vector<8x8xf32>
    %c0_44 = arith.constant 0 : index
    %c0_45 = arith.constant 0 : index
    %91 = vector.load %arg20[%c0_44, %c0_45] : memref<8x32xf32, #tpu.memory_space<vmem>>, vector<8x8xf32>
    tpu.vector_store %arg20[%c0_44, %c0_45], %90 {strides = array<i32>} : memref<8x32xf32, #tpu.memory_space<vmem>>, vector<8x8xf32>,
    %92 = vector.extract_strided_slice %72 {offsets = [0, 8], sizes = [8, 8], strides = [1, 1]} : vector<8x32xbf16> to vector<8x8xbf16>
    %93 = vector.extract_strided_slice %66 {offsets = [0, 8], sizes = [8, 8], strides = [1, 1]} : vector<8x64xbf16> to vector<8x8xbf16>
    %94 = vector.extract_strided_slice %66 {offsets = [0, 40], sizes = [8, 8], strides = [1, 1]} : vector<8x64xbf16> to vector<8x8xbf16>
    %cst_46 = arith.constant dense<0.000000e+00> : vector<8x8xf32>
    %95 = tpu.matmul %92, %93, %cst_46 {dimension_numbers = #tpu.dot_dimension_numbers<[1], [1], [0], [0], [0, 0, 1, 0], [], []>} : vector<8x8xbf16>, vector<8x8xbf16>, vector<8x8xf32> -> vector<8x8xf32>
    %96 = vector.broadcast %10 : vector<1x8xf32> to vector<8x8xf32>
    %97 = arith.addf %95, %96 : vector<8x8xf32>
    %cst_47 = arith.constant dense<0xFF800000> : vector<8xf32>
    %98 = vector.multi_reduction <maximumf>, %97, %cst_47 [1] : vector<8x8xf32> to vector<8xf32>
    %99 = vector.shape_cast %98 : vector<8xf32> to vector<8x1xf32>
    %100 = vector.broadcast %99 : vector<8x1xf32> to vector<8x8xf32>
    %101 = arith.subf %97, %100 : vector<8x8xf32>
    %102 = math.exp %101 : vector<8x8xf32>
    %cst_48 = arith.constant dense<0.000000e+00> : vector<8xf32>
    %103 = vector.multi_reduction <add>, %102, %cst_48 [1] : vector<8x8xf32> to vector<8xf32>
    %104 = vector.shape_cast %103 : vector<8xf32> to vector<8x1xf32>
    %105 = tpu.reciprocal %104 {approx = true} : vector<8x1xf32> -> vector<8x1xf32>
    %106 = vector.broadcast %105 : vector<8x1xf32> to vector<8x8xf32>
    %107 = arith.mulf %102, %106 : vector<8x8xf32>
    %108 = arith.truncf %107 : vector<8x8xf32> to vector<8x8xbf16>
    %cst_49 = arith.constant dense<0.000000e+00> : vector<8x8xf32>
    %109 = tpu.matmul %108, %94, %cst_49 {dimension_numbers = #tpu.dot_dimension_numbers<[1], [0], [0], [1], [0, 0, 1, 1], [], []>} : vector<8x8xbf16>, vector<8x8xbf16>, vector<8x8xf32> -> vector<8x8xf32>
    %c0_50 = arith.constant 0 : index
    %c8 = arith.constant 8 : index
    %110 = vector.load %arg20[%c0_50, %c8] : memref<8x32xf32, #tpu.memory_space<vmem>>, vector<8x8xf32>
    tpu.vector_store %arg20[%c0_50, %c8], %109 {strides = array<i32>} : memref<8x32xf32, #tpu.memory_space<vmem>>, vector<8x8xf32>,
    %111 = vector.extract_strided_slice %72 {offsets = [0, 16], sizes = [8, 8], strides = [1, 1]} : vector<8x32xbf16> to vector<8x8xbf16>
    %112 = vector.extract_strided_slice %66 {offsets = [0, 16], sizes = [8, 8], strides = [1, 1]} : vector<8x64xbf16> to vector<8x8xbf16>
    %113 = vector.extract_strided_slice %66 {offsets = [0, 48], sizes = [8, 8], strides = [1, 1]} : vector<8x64xbf16> to vector<8x8xbf16>
    %cst_51 = arith.constant dense<0.000000e+00> : vector<8x8xf32>
    %114 = tpu.matmul %111, %112, %cst_51 {dimension_numbers = #tpu.dot_dimension_numbers<[1], [1], [0], [0], [0, 0, 1, 0], [], []>} : vector<8x8xbf16>, vector<8x8xbf16>, vector<8x8xf32> -> vector<8x8xf32>
    %115 = vector.broadcast %10 : vector<1x8xf32> to vector<8x8xf32>
    %116 = arith.addf %114, %115 : vector<8x8xf32>
    %cst_52 = arith.constant dense<0xFF800000> : vector<8xf32>
    %117 = vector.multi_reduction <maximumf>, %116, %cst_52 [1] : vector<8x8xf32> to vector<8xf32>
    %118 = vector.shape_cast %117 : vector<8xf32> to vector<8x1xf32>
    %119 = vector.broadcast %118 : vector<8x1xf32> to vector<8x8xf32>
    %120 = arith.subf %116, %119 : vector<8x8xf32>
    %121 = math.exp %120 : vector<8x8xf32>
    %cst_53 = arith.constant dense<0.000000e+00> : vector<8xf32>
    %122 = vector.multi_reduction <add>, %121, %cst_53 [1] : vector<8x8xf32> to vector<8xf32>
    %123 = vector.shape_cast %122 : vector<8xf32> to vector<8x1xf32>
    %124 = tpu.reciprocal %123 {approx = true} : vector<8x1xf32> -> vector<8x1xf32>
    %125 = vector.broadcast %124 : vector<8x1xf32> to vector<8x8xf32>
    %126 = arith.mulf %121, %125 : vector<8x8xf32>
    %127 = arith.truncf %126 : vector<8x8xf32> to vector<8x8xbf16>
    %cst_54 = arith.constant dense<0.000000e+00> : vector<8x8xf32>
    %128 = tpu.matmul %127, %113, %cst_54 {dimension_numbers = #tpu.dot_dimension_numbers<[1], [0], [0], [1], [0, 0, 1, 1], [], []>} : vector<8x8xbf16>, vector<8x8xbf16>, vector<8x8xf32> -> vector<8x8xf32>
    %c0_55 = arith.constant 0 : index
    %c16 = arith.constant 16 : index
    %129 = vector.load %arg20[%c0_55, %c16] : memref<8x32xf32, #tpu.memory_space<vmem>>, vector<8x8xf32>
    tpu.vector_store %arg20[%c0_55, %c16], %128 {strides = array<i32>} : memref<8x32xf32, #tpu.memory_space<vmem>>, vector<8x8xf32>,
    %130 = vector.extract_strided_slice %72 {offsets = [0, 24], sizes = [8, 8], strides = [1, 1]} : vector<8x32xbf16> to vector<8x8xbf16>
    %131 = vector.extract_strided_slice %66 {offsets = [0, 24], sizes = [8, 8], strides = [1, 1]} : vector<8x64xbf16> to vector<8x8xbf16>
    %132 = vector.extract_strided_slice %66 {offsets = [0, 56], sizes = [8, 8], strides = [1, 1]} : vector<8x64xbf16> to vector<8x8xbf16>
    %cst_56 = arith.constant dense<0.000000e+00> : vector<8x8xf32>
    %133 = tpu.matmul %130, %131, %cst_56 {dimension_numbers = #tpu.dot_dimension_numbers<[1], [1], [0], [0], [0, 0, 1, 0], [], []>} : vector<8x8xbf16>, vector<8x8xbf16>, vector<8x8xf32> -> vector<8x8xf32>
    %134 = vector.broadcast %10 : vector<1x8xf32> to vector<8x8xf32>
    %135 = arith.addf %133, %134 : vector<8x8xf32>
    %cst_57 = arith.constant dense<0xFF800000> : vector<8xf32>
    %136 = vector.multi_reduction <maximumf>, %135, %cst_57 [1] : vector<8x8xf32> to vector<8xf32>
    %137 = vector.shape_cast %136 : vector<8xf32> to vector<8x1xf32>
    %138 = vector.broadcast %137 : vector<8x1xf32> to vector<8x8xf32>
    %139 = arith.subf %135, %138 : vector<8x8xf32>
    %140 = math.exp %139 : vector<8x8xf32>
    %cst_58 = arith.constant dense<0.000000e+00> : vector<8xf32>
    %141 = vector.multi_reduction <add>, %140, %cst_58 [1] : vector<8x8xf32> to vector<8xf32>
    %142 = vector.shape_cast %141 : vector<8xf32> to vector<8x1xf32>
    %143 = tpu.reciprocal %142 {approx = true} : vector<8x1xf32> -> vector<8x1xf32>
    %144 = vector.broadcast %143 : vector<8x1xf32> to vector<8x8xf32>
    %145 = arith.mulf %140, %144 : vector<8x8xf32>
    %146 = arith.truncf %145 : vector<8x8xf32> to vector<8x8xbf16>
    %cst_59 = arith.constant dense<0.000000e+00> : vector<8x8xf32>
    %147 = tpu.matmul %146, %132, %cst_59 {dimension_numbers = #tpu.dot_dimension_numbers<[1], [0], [0], [1], [0, 0, 1, 1], [], []>} : vector<8x8xbf16>, vector<8x8xbf16>, vector<8x8xf32> -> vector<8x8xf32>
    %c0_60 = arith.constant 0 : index
    %c24 = arith.constant 24 : index
    %148 = vector.load %arg20[%c0_60, %c24] : memref<8x32xf32, #tpu.memory_space<vmem>>, vector<8x8xf32>
    tpu.vector_store %arg20[%c0_60, %c24], %147 {strides = array<i32>} : memref<8x32xf32, #tpu.memory_space<vmem>>, vector<8x8xf32>,
    %c0_61 = arith.constant 0 : index
    %c0_62 = arith.constant 0 : index
    %149 = vector.load %arg20[%c0_61, %c0_62] : memref<8x32xf32, #tpu.memory_space<vmem>>, vector<8x32xf32>
    %150 = arith.truncf %149 : vector<8x32xf32> to vector<8x32xbf16>
    %c0_63 = arith.constant 0 : index
    %c0_64 = arith.constant 0 : index
    %151 = vector.load %arg11[%c0_63, %c0_64] : memref<32x32xbf16, #tpu.memory_space<vmem>>, vector<32x32xbf16>
    %cst_65 = arith.constant dense<0.000000e+00> : vector<8x32xf32>
    %152 = tpu.matmul %150, %151, %cst_65 {dimension_numbers = #tpu.dot_dimension_numbers<[1], [0], [0], [1], [0, 0, 1, 1], [], []>} : vector<8x32xbf16>, vector<32x32xbf16>, vector<8x32xf32> -> vector<8x32xf32>
    %153 = arith.addf %3, %152 : vector<8x32xf32>
    %c0_66 = arith.constant 0 : index
    %c0_67 = arith.constant 0 : index
    %154 = vector.load %arg12[%c0_66, %c0_67] : memref<1x32xf32, #tpu.memory_space<vmem>>, vector<1x32xf32>
    %155 = vector.broadcast %154 : vector<1x32xf32> to vector<8x32xf32>
    %156 = arith.addf %153, %155 : vector<8x32xf32>
    %cst_68 = arith.constant dense<0.000000e+00> : vector<8xf32>
    %157 = vector.multi_reduction <add>, %156, %cst_68 [1] : vector<8x32xf32> to vector<8xf32>
    %158 = vector.shape_cast %157 : vector<8xf32> to vector<8x1xf32>
    %cst_69 = arith.constant 3.200000e+01 : f32
    %159 = vector.broadcast %cst_69 : f32 to vector<8x1xf32>
    %160 = arith.divf %158, %159 : vector<8x1xf32>
    %161 = vector.broadcast %160 : vector<8x1xf32> to vector<8x32xf32>
    %162 = arith.subf %156, %161 : vector<8x32xf32>
    %163 = arith.mulf %162, %162 : vector<8x32xf32>
    %cst_70 = arith.constant dense<0.000000e+00> : vector<8xf32>
    %164 = vector.multi_reduction <add>, %163, %cst_70 [1] : vector<8x32xf32> to vector<8xf32>
    %165 = vector.shape_cast %164 : vector<8xf32> to vector<8x1xf32>
    %cst_71 = arith.constant 0.0322580636 : f32
    %166 = vector.broadcast %cst_71 : f32 to vector<8x1xf32>
    %167 = arith.mulf %165, %166 : vector<8x1xf32>
    %168 = math.sqrt %167 : vector<8x1xf32>
    %cst_72 = arith.constant 9.99999997E-7 : f32
    %169 = vector.broadcast %cst_72 : f32 to vector<8x1xf32>
    %170 = arith.addf %168, %169 : vector<8x1xf32>
    %cst_73 = arith.constant 1.000000e+00 : f32
    %171 = vector.broadcast %cst_73 : f32 to vector<8x1xf32>
    %172 = arith.divf %171, %170 : vector<8x1xf32>
    %173 = vector.broadcast %172 : vector<8x1xf32> to vector<8x32xf32>
    %174 = arith.mulf %162, %173 : vector<8x32xf32>
    %c0_74 = arith.constant 0 : index
    %c0_75 = arith.constant 0 : index
    %175 = vector.load %arg13[%c0_74, %c0_75] : memref<1x32xf32, #tpu.memory_space<vmem>>, vector<1x32xf32>
    %176 = vector.broadcast %175 : vector<1x32xf32> to vector<8x32xf32>
    %177 = arith.mulf %174, %176 : vector<8x32xf32>
    %c0_76 = arith.constant 0 : index
    %c0_77 = arith.constant 0 : index
    %178 = vector.load %arg14[%c0_76, %c0_77] : memref<1x32xf32, #tpu.memory_space<vmem>>, vector<1x32xf32>
    %179 = vector.broadcast %178 : vector<1x32xf32> to vector<8x32xf32>
    %180 = arith.addf %177, %179 : vector<8x32xf32>
    %181 = arith.truncf %180 : vector<8x32xf32> to vector<8x32xbf16>
    %c0_78 = arith.constant 0 : index
    %c0_79 = arith.constant 0 : index
    %182 = vector.load %arg15[%c0_78, %c0_79] : memref<32x64xbf16, #tpu.memory_space<vmem>>, vector<32x64xbf16>
    %cst_80 = arith.constant dense<0.000000e+00> : vector<8x64xf32>
    %183 = tpu.matmul %181, %182, %cst_80 {dimension_numbers = #tpu.dot_dimension_numbers<[1], [0], [0], [1], [0, 0, 1, 1], [], []>} : vector<8x32xbf16>, vector<32x64xbf16>, vector<8x64xf32> -> vector<8x64xf32>
    %c0_81 = arith.constant 0 : index
    %c0_82 = arith.constant 0 : index
    %184 = vector.load %arg16[%c0_81, %c0_82] : memref<1x64xf32, #tpu.memory_space<vmem>>, vector<1x64xf32>
    %185 = vector.broadcast %184 : vector<1x64xf32> to vector<8x64xf32>
    %186 = arith.addf %183, %185 : vector<8x64xf32>
    %cst_83 = arith.constant 0.000000e+00 : f32
    %187 = vector.broadcast %cst_83 : f32 to vector<8x64xf32>
    %188 = arith.maximumf %186, %187 : vector<8x64xf32>
    %189 = arith.truncf %188 : vector<8x64xf32> to vector<8x64xbf16>
    %c0_84 = arith.constant 0 : index
    %c0_85 = arith.constant 0 : index
    %190 = vector.load %arg17[%c0_84, %c0_85] : memref<64x32xbf16, #tpu.memory_space<vmem>>, vector<64x32xbf16>
    %cst_86 = arith.constant dense<0.000000e+00> : vector<8x32xf32>
    %191 = tpu.matmul %189, %190, %cst_86 {dimension_numbers = #tpu.dot_dimension_numbers<[1], [0], [0], [1], [0, 0, 1, 1], [], []>} : vector<8x64xbf16>, vector<64x32xbf16>, vector<8x32xf32> -> vector<8x32xf32>
    %192 = arith.addf %156, %191 : vector<8x32xf32>
    %c0_87 = arith.constant 0 : index
    %c0_88 = arith.constant 0 : index
    %193 = vector.load %arg18[%c0_87, %c0_88] : memref<1x32xf32, #tpu.memory_space<vmem>>, vector<1x32xf32>
    %194 = vector.broadcast %193 : vector<1x32xf32> to vector<8x32xf32>
    %195 = arith.addf %192, %194 : vector<8x32xf32>
    %c0_89 = arith.constant 0 : index
    %c0_90 = arith.constant 0 : index
    %c0_91 = arith.constant 0 : index
    %196 = vector.load %arg19[%c0_89, %c0_90, %c0_91] : memref<1x8x32xf32, #tpu.memory_space<vmem>>, vector<1x8x32xf32>
    %197 = vector.shape_cast %196 : vector<1x8x32xf32> to vector<8x32xf32>
    %198 = vector.shape_cast %195 : vector<8x32xf32> to vector<1x8x32xf32>
    tpu.vector_store %arg19[%c0_89, %c0_90, %c0_91], %198 {strides = array<i32>} : memref<1x8x32xf32, #tpu.memory_space<vmem>>, vector<1x8x32xf32>,
    return
  }
  func.func @transform_0(%arg0: i32, %arg1: i32) -> (i32, i32, i32) {
    %c0_i32 = arith.constant 0 : i32
    %c0_i32_0 = arith.constant 0 : i32
    %c0_i32_1 = arith.constant 0 : i32
    return %arg0, %c0_i32, %c0_i32_0 : i32, i32, i32
  }
  func.func @transform_1(%arg0: i32, %arg1: i32) -> (i32, i32, i32) {
    %c0_i32 = arith.constant 0 : i32
    %c0_i32_0 = arith.constant 0 : i32
    return %arg0, %arg1, %c0_i32 : i32, i32, i32
  }
  func.func @transform_2(%arg0: i32, %arg1: i32) -> (i32, i32, i32) {
    %c0_i32 = arith.constant 0 : i32
    %c0_i32_0 = arith.constant 0 : i32
    %c0_i32_1 = arith.constant 0 : i32
    return %arg0, %c0_i32, %c0_i32_0 : i32, i32, i32
  }
  func.func @transform_3(%arg0: i32, %arg1: i32) -> (i32, i32) {
    %c0_i32 = arith.constant 0 : i32
    %c0_i32_0 = arith.constant 0 : i32
    %c0_i32_1 = arith.constant 0 : i32
    return %c0_i32, %c0_i32_0 : i32, i32
  }
  func.func @transform_4(%arg0: i32, %arg1: i32) -> (i32, i32) {
    %c0_i32 = arith.constant 0 : i32
    %c0_i32_0 = arith.constant 0 : i32
    %c0_i32_1 = arith.constant 0 : i32
    return %c0_i32, %c0_i32_0 : i32, i32
  }
  func.func @transform_5(%arg0: i32, %arg1: i32) -> (i32, i32) {
    %c0_i32 = arith.constant 0 : i32
    %c0_i32_0 = arith.constant 0 : i32
    %c0_i32_1 = arith.constant 0 : i32
    return %c0_i32, %c0_i32_0 : i32, i32
  }
  func.func @transform_6(%arg0: i32, %arg1: i32) -> (i32, i32) {
    %c0_i32 = arith.constant 0 : i32
    %c0_i32_0 = arith.constant 0 : i32
    %c0_i32_1 = arith.constant 0 : i32
    return %c0_i32, %c0_i32_0 : i32, i32
  }
  func.func @transform_7(%arg0: i32, %arg1: i32) -> (i32, i32) {
    %c0_i32 = arith.constant 0 : i32
    %c0_i32_0 = arith.constant 0 : i32
    %c0_i32_1 = arith.constant 0 : i32
    return %c0_i32, %c0_i32_0 : i32, i32
  }
  func.func @transform_8(%arg0: i32, %arg1: i32) -> (i32, i32) {
    %c0_i32 = arith.constant 0 : i32
    %c0_i32_0 = arith.constant 0 : i32
    %c0_i32_1 = arith.constant 0 : i32
    return %c0_i32, %c0_i32_0 : i32, i32
  }
  func.func @transform_9(%arg0: i32, %arg1: i32) -> (i32, i32) {
    %c0_i32 = arith.constant 0 : i32
    %c0_i32_0 = arith.constant 0 : i32
    %c0_i32_1 = arith.constant 0 : i32
    return %c0_i32, %c0_i32_0 : i32, i32
  }
  func.func @transform_10(%arg0: i32, %arg1: i32) -> (i32, i32) {
    %c0_i32 = arith.constant 0 : i32
    %c0_i32_0 = arith.constant 0 : i32
    %c0_i32_1 = arith.constant 0 : i32
    return %c0_i32, %c0_i32_0 : i32, i32
  }
  func.func @transform_11(%arg0: i32, %arg1: i32) -> (i32, i32) {
    %c0_i32 = arith.constant 0 : i32
    %c0_i32_0 = arith.constant 0 : i32
    %c0_i32_1 = arith.constant 0 : i32
    return %c0_i32, %c0_i32_0 : i32, i32
  }
  func.func @transform_12(%arg0: i32, %arg1: i32) -> (i32, i32) {
    %c0_i32 = arith.constant 0 : i32
    %c0_i32_0 = arith.constant 0 : i32
    %c0_i32_1 = arith.constant 0 : i32
    return %c0_i32, %c0_i32_0 : i32, i32
  }
  func.func @transform_13(%arg0: i32, %arg1: i32) -> (i32, i32) {
    %c0_i32 = arith.constant 0 : i32
    %c0_i32_0 = arith.constant 0 : i32
    %c0_i32_1 = arith.constant 0 : i32
    return %c0_i32, %c0_i32_0 : i32, i32
  }
  func.func @transform_14(%arg0: i32, %arg1: i32) -> (i32, i32) {
    %c0_i32 = arith.constant 0 : i32
    %c0_i32_0 = arith.constant 0 : i32
    %c0_i32_1 = arith.constant 0 : i32
    return %c0_i32, %c0_i32_0 : i32, i32
  }
  func.func @transform_15(%arg0: i32, %arg1: i32) -> (i32, i32) {
    %c0_i32 = arith.constant 0 : i32
    %c0_i32_0 = arith.constant 0 : i32
    %c0_i32_1 = arith.constant 0 : i32
    return %c0_i32, %c0_i32_0 : i32, i32
  }
  func.func @transform_16(%arg0: i32, %arg1: i32) -> (i32, i32) {
    %c0_i32 = arith.constant 0 : i32
    %c0_i32_0 = arith.constant 0 : i32
    %c0_i32_1 = arith.constant 0 : i32
    return %c0_i32, %c0_i32_0 : i32, i32
  }
  func.func @transform_17(%arg0: i32, %arg1: i32) -> (i32, i32, i32) {
    %c0_i32 = arith.constant 0 : i32
    %c0_i32_0 = arith.constant 0 : i32
    return %arg0, %arg1, %c0_i32 : i32, i32, i32
  }
}

module attributes {stable_mosaic.version = 11 : i64} {
  func.func @_encoder_layer_kernel(%arg0: i32, %arg1: i32, %arg2: memref<1x8x32xf32, #tpu.memory_space<vmem>>, %arg3: memref<1x8x32xf32, #tpu.memory_space<vmem>>, %arg4: memref<1x1x8xf32, #tpu.memory_space<vmem>>, %arg5: memref<1x32xf32, #tpu.memory_space<vmem>>, %arg6: memref<1x32xf32, #tpu.memory_space<vmem>>, %arg7: memref<32x32xbf16, #tpu.memory_space<vmem>>, %arg8: memref<1x32xf32, #tpu.memory_space<vmem>>, %arg9: memref<32x64xbf16, #tpu.memory_space<vmem>>, %arg10: memref<1x64xf32, #tpu.memory_space<vmem>>, %arg11: memref<32x32xbf16, #tpu.memory_space<vmem>>, %arg12: memref<1x32xf32, #tpu.memory_space<vmem>>, %arg13: memref<1x32xf32, #tpu.memory_space<vmem>>, %arg14: memref<1x32xf32, #tpu.memory_space<vmem>>, %arg15: memref<32x64xbf16, #tpu.memory_space<vmem>>, %arg16: memref<1x64xf32, #tpu.memory_space<vmem>>, %arg17: memref<64x32xbf16, #tpu.memory_space<vmem>>, %arg18: memref<1x32xf32, #tpu.memory_space<vmem>>, %arg19: memref<1x32xf32, #tpu.memory_space<vmem>>, %arg20: memref<1x32xf32, #tpu.memory_space<vmem>>, %arg21: memref<1x8x32xf32, #tpu.memory_space<vmem>>, %arg22: memref<8x32xf32, #tpu.memory_space<vmem>>) attributes {dimension_semantics = [#tpu.dimension_semantics<parallel>, #tpu.dimension_semantics<parallel>], iteration_bounds = array<i64: 2, 1>, scalar_prefetch = 0 : i64, scratch_operands = 1 : i64, tpu.core_type = #tpu.core_type<tc>, window_params = [{transform_indices = @transform_0, window_bounds = array<i64: 1, 8, 32>}, {transform_indices = @transform_1, window_bounds = array<i64: 1, 8, 32>}, {transform_indices = @transform_2, window_bounds = array<i64: 1, 1, 8>}, {pipeline_mode = #tpu.pipeline_mode<synchronous>, transform_indices = @transform_3, window_bounds = array<i64: 1, 32>}, {pipeline_mode = #tpu.pipeline_mode<synchronous>, transform_indices = @transform_4, window_bounds = array<i64: 1, 32>}, {pipeline_mode = #tpu.pipeline_mode<synchronous>, transform_indices = @transform_5, window_bounds = array<i64: 32, 32>}, {pipeline_mode = #tpu.pipeline_mode<synchronous>, transform_indices = @transform_6, window_bounds = array<i64: 1, 32>}, {pipeline_mode = #tpu.pipeline_mode<synchronous>, transform_indices = @transform_7, window_bounds = array<i64: 32, 64>}, {pipeline_mode = #tpu.pipeline_mode<synchronous>, transform_indices = @transform_8, window_bounds = array<i64: 1, 64>}, {pipeline_mode = #tpu.pipeline_mode<synchronous>, transform_indices = @transform_9, window_bounds = array<i64: 32, 32>}, {pipeline_mode = #tpu.pipeline_mode<synchronous>, transform_indices = @transform_10, window_bounds = array<i64: 1, 32>}, {pipeline_mode = #tpu.pipeline_mode<synchronous>, transform_indices = @transform_11, window_bounds = array<i64: 1, 32>}, {pipeline_mode = #tpu.pipeline_mode<synchronous>, transform_indices = @transform_12, window_bounds = array<i64: 1, 32>}, {pipeline_mode = #tpu.pipeline_mode<synchronous>, transform_indices = @transform_13, window_bounds = array<i64: 32, 64>}, {pipeline_mode = #tpu.pipeline_mode<synchronous>, transform_indices = @transform_14, window_bounds = array<i64: 1, 64>}, {pipeline_mode = #tpu.pipeline_mode<synchronous>, transform_indices = @transform_15, window_bounds = array<i64: 64, 32>}, {pipeline_mode = #tpu.pipeline_mode<synchronous>, transform_indices = @transform_16, window_bounds = array<i64: 1, 32>}, {pipeline_mode = #tpu.pipeline_mode<synchronous>, transform_indices = @transform_17, window_bounds = array<i64: 1, 32>}, {pipeline_mode = #tpu.pipeline_mode<synchronous>, transform_indices = @transform_18, window_bounds = array<i64: 1, 32>}, {transform_indices = @transform_19, window_bounds = array<i64: 1, 8, 32>}]} {
    %c0 = arith.constant 0 : index
    %c0_0 = arith.constant 0 : index
    %c0_1 = arith.constant 0 : index
    %0 = vector.load %arg2[%c0, %c0_0, %c0_1] : memref<1x8x32xf32, #tpu.memory_space<vmem>>, vector<1x8x32xf32>
    %1 = vector.shape_cast %0 : vector<1x8x32xf32> to vector<8x32xf32>
    %c0_2 = arith.constant 0 : index
    %c0_3 = arith.constant 0 : index
    %c0_4 = arith.constant 0 : index
    %2 = vector.load %arg3[%c0_2, %c0_3, %c0_4] : memref<1x8x32xf32, #tpu.memory_space<vmem>>, vector<1x8x32xf32>
    %3 = vector.shape_cast %2 : vector<1x8x32xf32> to vector<8x32xf32>
    %c0_5 = arith.constant 0 : index
    %c0_6 = arith.constant 0 : index
    %c0_7 = arith.constant 0 : index
    %4 = vector.load %arg4[%c0_5, %c0_6, %c0_7] : memref<1x1x8xf32, #tpu.memory_space<vmem>>, vector<1x1x8xf32>
    %5 = vector.shape_cast %4 : vector<1x1x8xf32> to vector<1x8xf32>
    %cst = arith.constant 0.000000e+00 : f32
    %6 = vector.broadcast %cst : f32 to vector<1x8xf32>
    %7 = arith.cmpf one, %5, %6 : vector<1x8xf32>
    %cst_8 = arith.constant 0.000000e+00 : f32
    %cst_9 = arith.constant -1.000000e+09 : f32
    %8 = vector.broadcast %cst_8 : f32 to vector<1x8xf32>
    %9 = vector.broadcast %cst_9 : f32 to vector<1x8xf32>
    %10 = arith.select %7, %8, %9 : vector<1x8xi1>, vector<1x8xf32>
    %cst_10 = arith.constant dense<0.000000e+00> : vector<8xf32>
    %11 = vector.multi_reduction <add>, %1, %cst_10 [1] : vector<8x32xf32> to vector<8xf32>
    %12 = vector.shape_cast %11 : vector<8xf32> to vector<8x1xf32>
    %cst_11 = arith.constant 3.200000e+01 : f32
    %13 = vector.broadcast %cst_11 : f32 to vector<8x1xf32>
    %14 = arith.divf %12, %13 : vector<8x1xf32>
    %15 = vector.broadcast %14 : vector<8x1xf32> to vector<8x32xf32>
    %16 = arith.subf %1, %15 : vector<8x32xf32>
    %17 = arith.mulf %16, %16 : vector<8x32xf32>
    %cst_12 = arith.constant dense<0.000000e+00> : vector<8xf32>
    %18 = vector.multi_reduction <add>, %17, %cst_12 [1] : vector<8x32xf32> to vector<8xf32>
    %19 = vector.shape_cast %18 : vector<8xf32> to vector<8x1xf32>
    %cst_13 = arith.constant 0.0322580636 : f32
    %20 = vector.broadcast %cst_13 : f32 to vector<8x1xf32>
    %21 = arith.mulf %19, %20 : vector<8x1xf32>
    %22 = math.sqrt %21 : vector<8x1xf32>
    %cst_14 = arith.constant 9.99999997E-7 : f32
    %23 = vector.broadcast %cst_14 : f32 to vector<8x1xf32>
    %24 = arith.addf %22, %23 : vector<8x1xf32>
    %cst_15 = arith.constant 1.000000e+00 : f32
    %25 = vector.broadcast %cst_15 : f32 to vector<8x1xf32>
    %26 = arith.divf %25, %24 : vector<8x1xf32>
    %27 = vector.broadcast %26 : vector<8x1xf32> to vector<8x32xf32>
    %28 = arith.mulf %16, %27 : vector<8x32xf32>
    %c0_16 = arith.constant 0 : index
    %c0_17 = arith.constant 0 : index
    %29 = vector.load %arg5[%c0_16, %c0_17] : memref<1x32xf32, #tpu.memory_space<vmem>>, vector<1x32xf32>
    %30 = vector.broadcast %29 : vector<1x32xf32> to vector<8x32xf32>
    %31 = arith.mulf %28, %30 : vector<8x32xf32>
    %c0_18 = arith.constant 0 : index
    %c0_19 = arith.constant 0 : index
    %32 = vector.load %arg6[%c0_18, %c0_19] : memref<1x32xf32, #tpu.memory_space<vmem>>, vector<1x32xf32>
    %33 = vector.broadcast %32 : vector<1x32xf32> to vector<8x32xf32>
    %34 = arith.addf %31, %33 : vector<8x32xf32>
    %35 = arith.truncf %34 : vector<8x32xf32> to vector<8x32xbf16>
    %cst_20 = arith.constant dense<0.000000e+00> : vector<8xf32>
    %36 = vector.multi_reduction <add>, %3, %cst_20 [1] : vector<8x32xf32> to vector<8xf32>
    %37 = vector.shape_cast %36 : vector<8xf32> to vector<8x1xf32>
    %cst_21 = arith.constant 3.200000e+01 : f32
    %38 = vector.broadcast %cst_21 : f32 to vector<8x1xf32>
    %39 = arith.divf %37, %38 : vector<8x1xf32>
    %40 = vector.broadcast %39 : vector<8x1xf32> to vector<8x32xf32>
    %41 = arith.subf %3, %40 : vector<8x32xf32>
    %42 = arith.mulf %41, %41 : vector<8x32xf32>
    %cst_22 = arith.constant dense<0.000000e+00> : vector<8xf32>
    %43 = vector.multi_reduction <add>, %42, %cst_22 [1] : vector<8x32xf32> to vector<8xf32>
    %44 = vector.shape_cast %43 : vector<8xf32> to vector<8x1xf32>
    %cst_23 = arith.constant 0.0322580636 : f32
    %45 = vector.broadcast %cst_23 : f32 to vector<8x1xf32>
    %46 = arith.mulf %44, %45 : vector<8x1xf32>
    %47 = math.sqrt %46 : vector<8x1xf32>
    %cst_24 = arith.constant 9.99999997E-7 : f32
    %48 = vector.broadcast %cst_24 : f32 to vector<8x1xf32>
    %49 = arith.addf %47, %48 : vector<8x1xf32>
    %cst_25 = arith.constant 1.000000e+00 : f32
    %50 = vector.broadcast %cst_25 : f32 to vector<8x1xf32>
    %51 = arith.divf %50, %49 : vector<8x1xf32>
    %52 = vector.broadcast %51 : vector<8x1xf32> to vector<8x32xf32>
    %53 = arith.mulf %41, %52 : vector<8x32xf32>
    %c0_26 = arith.constant 0 : index
    %c0_27 = arith.constant 0 : index
    %54 = vector.load %arg5[%c0_26, %c0_27] : memref<1x32xf32, #tpu.memory_space<vmem>>, vector<1x32xf32>
    %55 = vector.broadcast %54 : vector<1x32xf32> to vector<8x32xf32>
    %56 = arith.mulf %53, %55 : vector<8x32xf32>
    %c0_28 = arith.constant 0 : index
    %c0_29 = arith.constant 0 : index
    %57 = vector.load %arg6[%c0_28, %c0_29] : memref<1x32xf32, #tpu.memory_space<vmem>>, vector<1x32xf32>
    %58 = vector.broadcast %57 : vector<1x32xf32> to vector<8x32xf32>
    %59 = arith.addf %56, %58 : vector<8x32xf32>
    %60 = arith.truncf %59 : vector<8x32xf32> to vector<8x32xbf16>
    %c0_30 = arith.constant 0 : index
    %c0_31 = arith.constant 0 : index
    %61 = vector.load %arg9[%c0_30, %c0_31] : memref<32x64xbf16, #tpu.memory_space<vmem>>, vector<32x64xbf16>
    %cst_32 = arith.constant dense<0.000000e+00> : vector<8x64xf32>
    %62 = tpu.matmul %35, %61, %cst_32 {dimension_numbers = #tpu.dot_dimension_numbers<[1], [0], [0], [1], [0, 0, 1, 1], [], []>} : vector<8x32xbf16>, vector<32x64xbf16>, vector<8x64xf32> -> vector<8x64xf32>
    %c0_33 = arith.constant 0 : index
    %c0_34 = arith.constant 0 : index
    %63 = vector.load %arg10[%c0_33, %c0_34] : memref<1x64xf32, #tpu.memory_space<vmem>>, vector<1x64xf32>
    %64 = vector.broadcast %63 : vector<1x64xf32> to vector<8x64xf32>
    %65 = arith.addf %62, %64 : vector<8x64xf32>
    %66 = arith.truncf %65 : vector<8x64xf32> to vector<8x64xbf16>
    %c0_35 = arith.constant 0 : index
    %c0_36 = arith.constant 0 : index
    %67 = vector.load %arg7[%c0_35, %c0_36] : memref<32x32xbf16, #tpu.memory_space<vmem>>, vector<32x32xbf16>
    %cst_37 = arith.constant dense<0.000000e+00> : vector<8x32xf32>
    %68 = tpu.matmul %60, %67, %cst_37 {dimension_numbers = #tpu.dot_dimension_numbers<[1], [0], [0], [1], [0, 0, 1, 1], [], []>} : vector<8x32xbf16>, vector<32x32xbf16>, vector<8x32xf32> -> vector<8x32xf32>
    %c0_38 = arith.constant 0 : index
    %c0_39 = arith.constant 0 : index
    %69 = vector.load %arg8[%c0_38, %c0_39] : memref<1x32xf32, #tpu.memory_space<vmem>>, vector<1x32xf32>
    %70 = vector.broadcast %69 : vector<1x32xf32> to vector<8x32xf32>
    %71 = arith.addf %68, %70 : vector<8x32xf32>
    %72 = arith.truncf %71 : vector<8x32xf32> to vector<8x32xbf16>
    %73 = vector.extract_strided_slice %72 {offsets = [0, 0], sizes = [8, 8], strides = [1, 1]} : vector<8x32xbf16> to vector<8x8xbf16>
    %74 = vector.extract_strided_slice %66 {offsets = [0, 0], sizes = [8, 8], strides = [1, 1]} : vector<8x64xbf16> to vector<8x8xbf16>
    %75 = vector.extract_strided_slice %66 {offsets = [0, 32], sizes = [8, 8], strides = [1, 1]} : vector<8x64xbf16> to vector<8x8xbf16>
    %cst_40 = arith.constant dense<0.000000e+00> : vector<8x8xf32>
    %76 = tpu.matmul %73, %74, %cst_40 {dimension_numbers = #tpu.dot_dimension_numbers<[1], [1], [0], [0], [0, 0, 1, 0], [], []>} : vector<8x8xbf16>, vector<8x8xbf16>, vector<8x8xf32> -> vector<8x8xf32>
    %77 = vector.broadcast %10 : vector<1x8xf32> to vector<8x8xf32>
    %78 = arith.addf %76, %77 : vector<8x8xf32>
    %cst_41 = arith.constant dense<0xFF800000> : vector<8xf32>
    %79 = vector.multi_reduction <maximumf>, %78, %cst_41 [1] : vector<8x8xf32> to vector<8xf32>
    %80 = vector.shape_cast %79 : vector<8xf32> to vector<8x1xf32>
    %81 = vector.broadcast %80 : vector<8x1xf32> to vector<8x8xf32>
    %82 = arith.subf %78, %81 : vector<8x8xf32>
    %83 = math.exp %82 : vector<8x8xf32>
    %cst_42 = arith.constant dense<0.000000e+00> : vector<8xf32>
    %84 = vector.multi_reduction <add>, %83, %cst_42 [1] : vector<8x8xf32> to vector<8xf32>
    %85 = vector.shape_cast %84 : vector<8xf32> to vector<8x1xf32>
    %86 = tpu.reciprocal %85 {approx = true} : vector<8x1xf32> -> vector<8x1xf32>
    %87 = vector.broadcast %86 : vector<8x1xf32> to vector<8x8xf32>
    %88 = arith.mulf %83, %87 : vector<8x8xf32>
    %89 = arith.truncf %88 : vector<8x8xf32> to vector<8x8xbf16>
    %cst_43 = arith.constant dense<0.000000e+00> : vector<8x8xf32>
    %90 = tpu.matmul %89, %75, %cst_43 {dimension_numbers = #tpu.dot_dimension_numbers<[1], [0], [0], [1], [0, 0, 1, 1], [], []>} : vector<8x8xbf16>, vector<8x8xbf16>, vector<8x8xf32> -> vector<8x8xf32>
    %c0_44 = arith.constant 0 : index
    %c0_45 = arith.constant 0 : index
    %91 = vector.load %arg22[%c0_44, %c0_45] : memref<8x32xf32, #tpu.memory_space<vmem>>, vector<8x8xf32>
    tpu.vector_store %arg22[%c0_44, %c0_45], %90 {strides = array<i32>} : memref<8x32xf32, #tpu.memory_space<vmem>>, vector<8x8xf32>,
    %92 = vector.extract_strided_slice %72 {offsets = [0, 8], sizes = [8, 8], strides = [1, 1]} : vector<8x32xbf16> to vector<8x8xbf16>
    %93 = vector.extract_strided_slice %66 {offsets = [0, 8], sizes = [8, 8], strides = [1, 1]} : vector<8x64xbf16> to vector<8x8xbf16>
    %94 = vector.extract_strided_slice %66 {offsets = [0, 40], sizes = [8, 8], strides = [1, 1]} : vector<8x64xbf16> to vector<8x8xbf16>
    %cst_46 = arith.constant dense<0.000000e+00> : vector<8x8xf32>
    %95 = tpu.matmul %92, %93, %cst_46 {dimension_numbers = #tpu.dot_dimension_numbers<[1], [1], [0], [0], [0, 0, 1, 0], [], []>} : vector<8x8xbf16>, vector<8x8xbf16>, vector<8x8xf32> -> vector<8x8xf32>
    %96 = vector.broadcast %10 : vector<1x8xf32> to vector<8x8xf32>
    %97 = arith.addf %95, %96 : vector<8x8xf32>
    %cst_47 = arith.constant dense<0xFF800000> : vector<8xf32>
    %98 = vector.multi_reduction <maximumf>, %97, %cst_47 [1] : vector<8x8xf32> to vector<8xf32>
    %99 = vector.shape_cast %98 : vector<8xf32> to vector<8x1xf32>
    %100 = vector.broadcast %99 : vector<8x1xf32> to vector<8x8xf32>
    %101 = arith.subf %97, %100 : vector<8x8xf32>
    %102 = math.exp %101 : vector<8x8xf32>
    %cst_48 = arith.constant dense<0.000000e+00> : vector<8xf32>
    %103 = vector.multi_reduction <add>, %102, %cst_48 [1] : vector<8x8xf32> to vector<8xf32>
    %104 = vector.shape_cast %103 : vector<8xf32> to vector<8x1xf32>
    %105 = tpu.reciprocal %104 {approx = true} : vector<8x1xf32> -> vector<8x1xf32>
    %106 = vector.broadcast %105 : vector<8x1xf32> to vector<8x8xf32>
    %107 = arith.mulf %102, %106 : vector<8x8xf32>
    %108 = arith.truncf %107 : vector<8x8xf32> to vector<8x8xbf16>
    %cst_49 = arith.constant dense<0.000000e+00> : vector<8x8xf32>
    %109 = tpu.matmul %108, %94, %cst_49 {dimension_numbers = #tpu.dot_dimension_numbers<[1], [0], [0], [1], [0, 0, 1, 1], [], []>} : vector<8x8xbf16>, vector<8x8xbf16>, vector<8x8xf32> -> vector<8x8xf32>
    %c0_50 = arith.constant 0 : index
    %c8 = arith.constant 8 : index
    %110 = vector.load %arg22[%c0_50, %c8] : memref<8x32xf32, #tpu.memory_space<vmem>>, vector<8x8xf32>
    tpu.vector_store %arg22[%c0_50, %c8], %109 {strides = array<i32>} : memref<8x32xf32, #tpu.memory_space<vmem>>, vector<8x8xf32>,
    %111 = vector.extract_strided_slice %72 {offsets = [0, 16], sizes = [8, 8], strides = [1, 1]} : vector<8x32xbf16> to vector<8x8xbf16>
    %112 = vector.extract_strided_slice %66 {offsets = [0, 16], sizes = [8, 8], strides = [1, 1]} : vector<8x64xbf16> to vector<8x8xbf16>
    %113 = vector.extract_strided_slice %66 {offsets = [0, 48], sizes = [8, 8], strides = [1, 1]} : vector<8x64xbf16> to vector<8x8xbf16>
    %cst_51 = arith.constant dense<0.000000e+00> : vector<8x8xf32>
    %114 = tpu.matmul %111, %112, %cst_51 {dimension_numbers = #tpu.dot_dimension_numbers<[1], [1], [0], [0], [0, 0, 1, 0], [], []>} : vector<8x8xbf16>, vector<8x8xbf16>, vector<8x8xf32> -> vector<8x8xf32>
    %115 = vector.broadcast %10 : vector<1x8xf32> to vector<8x8xf32>
    %116 = arith.addf %114, %115 : vector<8x8xf32>
    %cst_52 = arith.constant dense<0xFF800000> : vector<8xf32>
    %117 = vector.multi_reduction <maximumf>, %116, %cst_52 [1] : vector<8x8xf32> to vector<8xf32>
    %118 = vector.shape_cast %117 : vector<8xf32> to vector<8x1xf32>
    %119 = vector.broadcast %118 : vector<8x1xf32> to vector<8x8xf32>
    %120 = arith.subf %116, %119 : vector<8x8xf32>
    %121 = math.exp %120 : vector<8x8xf32>
    %cst_53 = arith.constant dense<0.000000e+00> : vector<8xf32>
    %122 = vector.multi_reduction <add>, %121, %cst_53 [1] : vector<8x8xf32> to vector<8xf32>
    %123 = vector.shape_cast %122 : vector<8xf32> to vector<8x1xf32>
    %124 = tpu.reciprocal %123 {approx = true} : vector<8x1xf32> -> vector<8x1xf32>
    %125 = vector.broadcast %124 : vector<8x1xf32> to vector<8x8xf32>
    %126 = arith.mulf %121, %125 : vector<8x8xf32>
    %127 = arith.truncf %126 : vector<8x8xf32> to vector<8x8xbf16>
    %cst_54 = arith.constant dense<0.000000e+00> : vector<8x8xf32>
    %128 = tpu.matmul %127, %113, %cst_54 {dimension_numbers = #tpu.dot_dimension_numbers<[1], [0], [0], [1], [0, 0, 1, 1], [], []>} : vector<8x8xbf16>, vector<8x8xbf16>, vector<8x8xf32> -> vector<8x8xf32>
    %c0_55 = arith.constant 0 : index
    %c16 = arith.constant 16 : index
    %129 = vector.load %arg22[%c0_55, %c16] : memref<8x32xf32, #tpu.memory_space<vmem>>, vector<8x8xf32>
    tpu.vector_store %arg22[%c0_55, %c16], %128 {strides = array<i32>} : memref<8x32xf32, #tpu.memory_space<vmem>>, vector<8x8xf32>,
    %130 = vector.extract_strided_slice %72 {offsets = [0, 24], sizes = [8, 8], strides = [1, 1]} : vector<8x32xbf16> to vector<8x8xbf16>
    %131 = vector.extract_strided_slice %66 {offsets = [0, 24], sizes = [8, 8], strides = [1, 1]} : vector<8x64xbf16> to vector<8x8xbf16>
    %132 = vector.extract_strided_slice %66 {offsets = [0, 56], sizes = [8, 8], strides = [1, 1]} : vector<8x64xbf16> to vector<8x8xbf16>
    %cst_56 = arith.constant dense<0.000000e+00> : vector<8x8xf32>
    %133 = tpu.matmul %130, %131, %cst_56 {dimension_numbers = #tpu.dot_dimension_numbers<[1], [1], [0], [0], [0, 0, 1, 0], [], []>} : vector<8x8xbf16>, vector<8x8xbf16>, vector<8x8xf32> -> vector<8x8xf32>
    %134 = vector.broadcast %10 : vector<1x8xf32> to vector<8x8xf32>
    %135 = arith.addf %133, %134 : vector<8x8xf32>
    %cst_57 = arith.constant dense<0xFF800000> : vector<8xf32>
    %136 = vector.multi_reduction <maximumf>, %135, %cst_57 [1] : vector<8x8xf32> to vector<8xf32>
    %137 = vector.shape_cast %136 : vector<8xf32> to vector<8x1xf32>
    %138 = vector.broadcast %137 : vector<8x1xf32> to vector<8x8xf32>
    %139 = arith.subf %135, %138 : vector<8x8xf32>
    %140 = math.exp %139 : vector<8x8xf32>
    %cst_58 = arith.constant dense<0.000000e+00> : vector<8xf32>
    %141 = vector.multi_reduction <add>, %140, %cst_58 [1] : vector<8x8xf32> to vector<8xf32>
    %142 = vector.shape_cast %141 : vector<8xf32> to vector<8x1xf32>
    %143 = tpu.reciprocal %142 {approx = true} : vector<8x1xf32> -> vector<8x1xf32>
    %144 = vector.broadcast %143 : vector<8x1xf32> to vector<8x8xf32>
    %145 = arith.mulf %140, %144 : vector<8x8xf32>
    %146 = arith.truncf %145 : vector<8x8xf32> to vector<8x8xbf16>
    %cst_59 = arith.constant dense<0.000000e+00> : vector<8x8xf32>
    %147 = tpu.matmul %146, %132, %cst_59 {dimension_numbers = #tpu.dot_dimension_numbers<[1], [0], [0], [1], [0, 0, 1, 1], [], []>} : vector<8x8xbf16>, vector<8x8xbf16>, vector<8x8xf32> -> vector<8x8xf32>
    %c0_60 = arith.constant 0 : index
    %c24 = arith.constant 24 : index
    %148 = vector.load %arg22[%c0_60, %c24] : memref<8x32xf32, #tpu.memory_space<vmem>>, vector<8x8xf32>
    tpu.vector_store %arg22[%c0_60, %c24], %147 {strides = array<i32>} : memref<8x32xf32, #tpu.memory_space<vmem>>, vector<8x8xf32>,
    %c0_61 = arith.constant 0 : index
    %c0_62 = arith.constant 0 : index
    %149 = vector.load %arg22[%c0_61, %c0_62] : memref<8x32xf32, #tpu.memory_space<vmem>>, vector<8x32xf32>
    %150 = arith.truncf %149 : vector<8x32xf32> to vector<8x32xbf16>
    %c0_63 = arith.constant 0 : index
    %c0_64 = arith.constant 0 : index
    %151 = vector.load %arg11[%c0_63, %c0_64] : memref<32x32xbf16, #tpu.memory_space<vmem>>, vector<32x32xbf16>
    %cst_65 = arith.constant dense<0.000000e+00> : vector<8x32xf32>
    %152 = tpu.matmul %150, %151, %cst_65 {dimension_numbers = #tpu.dot_dimension_numbers<[1], [0], [0], [1], [0, 0, 1, 1], [], []>} : vector<8x32xbf16>, vector<32x32xbf16>, vector<8x32xf32> -> vector<8x32xf32>
    %153 = arith.addf %3, %152 : vector<8x32xf32>
    %c0_66 = arith.constant 0 : index
    %c0_67 = arith.constant 0 : index
    %154 = vector.load %arg12[%c0_66, %c0_67] : memref<1x32xf32, #tpu.memory_space<vmem>>, vector<1x32xf32>
    %155 = vector.broadcast %154 : vector<1x32xf32> to vector<8x32xf32>
    %156 = arith.addf %153, %155 : vector<8x32xf32>
    %cst_68 = arith.constant dense<0.000000e+00> : vector<8xf32>
    %157 = vector.multi_reduction <add>, %156, %cst_68 [1] : vector<8x32xf32> to vector<8xf32>
    %158 = vector.shape_cast %157 : vector<8xf32> to vector<8x1xf32>
    %cst_69 = arith.constant 3.200000e+01 : f32
    %159 = vector.broadcast %cst_69 : f32 to vector<8x1xf32>
    %160 = arith.divf %158, %159 : vector<8x1xf32>
    %161 = vector.broadcast %160 : vector<8x1xf32> to vector<8x32xf32>
    %162 = arith.subf %156, %161 : vector<8x32xf32>
    %163 = arith.mulf %162, %162 : vector<8x32xf32>
    %cst_70 = arith.constant dense<0.000000e+00> : vector<8xf32>
    %164 = vector.multi_reduction <add>, %163, %cst_70 [1] : vector<8x32xf32> to vector<8xf32>
    %165 = vector.shape_cast %164 : vector<8xf32> to vector<8x1xf32>
    %cst_71 = arith.constant 0.0322580636 : f32
    %166 = vector.broadcast %cst_71 : f32 to vector<8x1xf32>
    %167 = arith.mulf %165, %166 : vector<8x1xf32>
    %168 = math.sqrt %167 : vector<8x1xf32>
    %cst_72 = arith.constant 9.99999997E-7 : f32
    %169 = vector.broadcast %cst_72 : f32 to vector<8x1xf32>
    %170 = arith.addf %168, %169 : vector<8x1xf32>
    %cst_73 = arith.constant 1.000000e+00 : f32
    %171 = vector.broadcast %cst_73 : f32 to vector<8x1xf32>
    %172 = arith.divf %171, %170 : vector<8x1xf32>
    %173 = vector.broadcast %172 : vector<8x1xf32> to vector<8x32xf32>
    %174 = arith.mulf %162, %173 : vector<8x32xf32>
    %c0_74 = arith.constant 0 : index
    %c0_75 = arith.constant 0 : index
    %175 = vector.load %arg13[%c0_74, %c0_75] : memref<1x32xf32, #tpu.memory_space<vmem>>, vector<1x32xf32>
    %176 = vector.broadcast %175 : vector<1x32xf32> to vector<8x32xf32>
    %177 = arith.mulf %174, %176 : vector<8x32xf32>
    %c0_76 = arith.constant 0 : index
    %c0_77 = arith.constant 0 : index
    %178 = vector.load %arg14[%c0_76, %c0_77] : memref<1x32xf32, #tpu.memory_space<vmem>>, vector<1x32xf32>
    %179 = vector.broadcast %178 : vector<1x32xf32> to vector<8x32xf32>
    %180 = arith.addf %177, %179 : vector<8x32xf32>
    %181 = arith.truncf %180 : vector<8x32xf32> to vector<8x32xbf16>
    %c0_78 = arith.constant 0 : index
    %c0_79 = arith.constant 0 : index
    %182 = vector.load %arg15[%c0_78, %c0_79] : memref<32x64xbf16, #tpu.memory_space<vmem>>, vector<32x64xbf16>
    %cst_80 = arith.constant dense<0.000000e+00> : vector<8x64xf32>
    %183 = tpu.matmul %181, %182, %cst_80 {dimension_numbers = #tpu.dot_dimension_numbers<[1], [0], [0], [1], [0, 0, 1, 1], [], []>} : vector<8x32xbf16>, vector<32x64xbf16>, vector<8x64xf32> -> vector<8x64xf32>
    %c0_81 = arith.constant 0 : index
    %c0_82 = arith.constant 0 : index
    %184 = vector.load %arg16[%c0_81, %c0_82] : memref<1x64xf32, #tpu.memory_space<vmem>>, vector<1x64xf32>
    %185 = vector.broadcast %184 : vector<1x64xf32> to vector<8x64xf32>
    %186 = arith.addf %183, %185 : vector<8x64xf32>
    %cst_83 = arith.constant 0.000000e+00 : f32
    %187 = vector.broadcast %cst_83 : f32 to vector<8x64xf32>
    %188 = arith.maximumf %186, %187 : vector<8x64xf32>
    %189 = arith.truncf %188 : vector<8x64xf32> to vector<8x64xbf16>
    %c0_84 = arith.constant 0 : index
    %c0_85 = arith.constant 0 : index
    %190 = vector.load %arg17[%c0_84, %c0_85] : memref<64x32xbf16, #tpu.memory_space<vmem>>, vector<64x32xbf16>
    %cst_86 = arith.constant dense<0.000000e+00> : vector<8x32xf32>
    %191 = tpu.matmul %189, %190, %cst_86 {dimension_numbers = #tpu.dot_dimension_numbers<[1], [0], [0], [1], [0, 0, 1, 1], [], []>} : vector<8x64xbf16>, vector<64x32xbf16>, vector<8x32xf32> -> vector<8x32xf32>
    %192 = arith.addf %156, %191 : vector<8x32xf32>
    %c0_87 = arith.constant 0 : index
    %c0_88 = arith.constant 0 : index
    %193 = vector.load %arg18[%c0_87, %c0_88] : memref<1x32xf32, #tpu.memory_space<vmem>>, vector<1x32xf32>
    %194 = vector.broadcast %193 : vector<1x32xf32> to vector<8x32xf32>
    %195 = arith.addf %192, %194 : vector<8x32xf32>
    %cst_89 = arith.constant dense<0.000000e+00> : vector<8xf32>
    %196 = vector.multi_reduction <add>, %195, %cst_89 [1] : vector<8x32xf32> to vector<8xf32>
    %197 = vector.shape_cast %196 : vector<8xf32> to vector<8x1xf32>
    %cst_90 = arith.constant 3.200000e+01 : f32
    %198 = vector.broadcast %cst_90 : f32 to vector<8x1xf32>
    %199 = arith.divf %197, %198 : vector<8x1xf32>
    %200 = vector.broadcast %199 : vector<8x1xf32> to vector<8x32xf32>
    %201 = arith.subf %195, %200 : vector<8x32xf32>
    %202 = arith.mulf %201, %201 : vector<8x32xf32>
    %cst_91 = arith.constant dense<0.000000e+00> : vector<8xf32>
    %203 = vector.multi_reduction <add>, %202, %cst_91 [1] : vector<8x32xf32> to vector<8xf32>
    %204 = vector.shape_cast %203 : vector<8xf32> to vector<8x1xf32>
    %cst_92 = arith.constant 0.0322580636 : f32
    %205 = vector.broadcast %cst_92 : f32 to vector<8x1xf32>
    %206 = arith.mulf %204, %205 : vector<8x1xf32>
    %207 = math.sqrt %206 : vector<8x1xf32>
    %cst_93 = arith.constant 9.99999997E-7 : f32
    %208 = vector.broadcast %cst_93 : f32 to vector<8x1xf32>
    %209 = arith.addf %207, %208 : vector<8x1xf32>
    %cst_94 = arith.constant 1.000000e+00 : f32
    %210 = vector.broadcast %cst_94 : f32 to vector<8x1xf32>
    %211 = arith.divf %210, %209 : vector<8x1xf32>
    %212 = vector.broadcast %211 : vector<8x1xf32> to vector<8x32xf32>
    %213 = arith.mulf %201, %212 : vector<8x32xf32>
    %c0_95 = arith.constant 0 : index
    %c0_96 = arith.constant 0 : index
    %214 = vector.load %arg19[%c0_95, %c0_96] : memref<1x32xf32, #tpu.memory_space<vmem>>, vector<1x32xf32>
    %215 = vector.broadcast %214 : vector<1x32xf32> to vector<8x32xf32>
    %216 = arith.mulf %213, %215 : vector<8x32xf32>
    %c0_97 = arith.constant 0 : index
    %c0_98 = arith.constant 0 : index
    %217 = vector.load %arg20[%c0_97, %c0_98] : memref<1x32xf32, #tpu.memory_space<vmem>>, vector<1x32xf32>
    %218 = vector.broadcast %217 : vector<1x32xf32> to vector<8x32xf32>
    %219 = arith.addf %216, %218 : vector<8x32xf32>
    %c0_99 = arith.constant 0 : index
    %c0_100 = arith.constant 0 : index
    %c0_101 = arith.constant 0 : index
    %220 = vector.load %arg21[%c0_99, %c0_100, %c0_101] : memref<1x8x32xf32, #tpu.memory_space<vmem>>, vector<1x8x32xf32>
    %221 = vector.shape_cast %220 : vector<1x8x32xf32> to vector<8x32xf32>
    %222 = vector.shape_cast %219 : vector<8x32xf32> to vector<1x8x32xf32>
    tpu.vector_store %arg21[%c0_99, %c0_100, %c0_101], %222 {strides = array<i32>} : memref<1x8x32xf32, #tpu.memory_space<vmem>>, vector<1x8x32xf32>,
    return
  }
  func.func @transform_0(%arg0: i32, %arg1: i32) -> (i32, i32, i32) {
    %c0_i32 = arith.constant 0 : i32
    %c0_i32_0 = arith.constant 0 : i32
    %c0_i32_1 = arith.constant 0 : i32
    return %arg0, %c0_i32, %c0_i32_0 : i32, i32, i32
  }
  func.func @transform_1(%arg0: i32, %arg1: i32) -> (i32, i32, i32) {
    %c0_i32 = arith.constant 0 : i32
    %c0_i32_0 = arith.constant 0 : i32
    return %arg0, %arg1, %c0_i32 : i32, i32, i32
  }
  func.func @transform_2(%arg0: i32, %arg1: i32) -> (i32, i32, i32) {
    %c0_i32 = arith.constant 0 : i32
    %c0_i32_0 = arith.constant 0 : i32
    %c0_i32_1 = arith.constant 0 : i32
    return %arg0, %c0_i32, %c0_i32_0 : i32, i32, i32
  }
  func.func @transform_3(%arg0: i32, %arg1: i32) -> (i32, i32) {
    %c0_i32 = arith.constant 0 : i32
    %c0_i32_0 = arith.constant 0 : i32
    %c0_i32_1 = arith.constant 0 : i32
    return %c0_i32, %c0_i32_0 : i32, i32
  }
  func.func @transform_4(%arg0: i32, %arg1: i32) -> (i32, i32) {
    %c0_i32 = arith.constant 0 : i32
    %c0_i32_0 = arith.constant 0 : i32
    %c0_i32_1 = arith.constant 0 : i32
    return %c0_i32, %c0_i32_0 : i32, i32
  }
  func.func @transform_5(%arg0: i32, %arg1: i32) -> (i32, i32) {
    %c0_i32 = arith.constant 0 : i32
    %c0_i32_0 = arith.constant 0 : i32
    %c0_i32_1 = arith.constant 0 : i32
    return %c0_i32, %c0_i32_0 : i32, i32
  }
  func.func @transform_6(%arg0: i32, %arg1: i32) -> (i32, i32) {
    %c0_i32 = arith.constant 0 : i32
    %c0_i32_0 = arith.constant 0 : i32
    %c0_i32_1 = arith.constant 0 : i32
    return %c0_i32, %c0_i32_0 : i32, i32
  }
  func.func @transform_7(%arg0: i32, %arg1: i32) -> (i32, i32) {
    %c0_i32 = arith.constant 0 : i32
    %c0_i32_0 = arith.constant 0 : i32
    %c0_i32_1 = arith.constant 0 : i32
    return %c0_i32, %c0_i32_0 : i32, i32
  }
  func.func @transform_8(%arg0: i32, %arg1: i32) -> (i32, i32) {
    %c0_i32 = arith.constant 0 : i32
    %c0_i32_0 = arith.constant 0 : i32
    %c0_i32_1 = arith.constant 0 : i32
    return %c0_i32, %c0_i32_0 : i32, i32
  }
  func.func @transform_9(%arg0: i32, %arg1: i32) -> (i32, i32) {
    %c0_i32 = arith.constant 0 : i32
    %c0_i32_0 = arith.constant 0 : i32
    %c0_i32_1 = arith.constant 0 : i32
    return %c0_i32, %c0_i32_0 : i32, i32
  }
  func.func @transform_10(%arg0: i32, %arg1: i32) -> (i32, i32) {
    %c0_i32 = arith.constant 0 : i32
    %c0_i32_0 = arith.constant 0 : i32
    %c0_i32_1 = arith.constant 0 : i32
    return %c0_i32, %c0_i32_0 : i32, i32
  }
  func.func @transform_11(%arg0: i32, %arg1: i32) -> (i32, i32) {
    %c0_i32 = arith.constant 0 : i32
    %c0_i32_0 = arith.constant 0 : i32
    %c0_i32_1 = arith.constant 0 : i32
    return %c0_i32, %c0_i32_0 : i32, i32
  }
  func.func @transform_12(%arg0: i32, %arg1: i32) -> (i32, i32) {
    %c0_i32 = arith.constant 0 : i32
    %c0_i32_0 = arith.constant 0 : i32
    %c0_i32_1 = arith.constant 0 : i32
    return %c0_i32, %c0_i32_0 : i32, i32
  }
  func.func @transform_13(%arg0: i32, %arg1: i32) -> (i32, i32) {
    %c0_i32 = arith.constant 0 : i32
    %c0_i32_0 = arith.constant 0 : i32
    %c0_i32_1 = arith.constant 0 : i32
    return %c0_i32, %c0_i32_0 : i32, i32
  }
  func.func @transform_14(%arg0: i32, %arg1: i32) -> (i32, i32) {
    %c0_i32 = arith.constant 0 : i32
    %c0_i32_0 = arith.constant 0 : i32
    %c0_i32_1 = arith.constant 0 : i32
    return %c0_i32, %c0_i32_0 : i32, i32
  }
  func.func @transform_15(%arg0: i32, %arg1: i32) -> (i32, i32) {
    %c0_i32 = arith.constant 0 : i32
    %c0_i32_0 = arith.constant 0 : i32
    %c0_i32_1 = arith.constant 0 : i32
    return %c0_i32, %c0_i32_0 : i32, i32
  }
  func.func @transform_16(%arg0: i32, %arg1: i32) -> (i32, i32) {
    %c0_i32 = arith.constant 0 : i32
    %c0_i32_0 = arith.constant 0 : i32
    %c0_i32_1 = arith.constant 0 : i32
    return %c0_i32, %c0_i32_0 : i32, i32
  }
  func.func @transform_17(%arg0: i32, %arg1: i32) -> (i32, i32) {
    %c0_i32 = arith.constant 0 : i32
    %c0_i32_0 = arith.constant 0 : i32
    %c0_i32_1 = arith.constant 0 : i32
    return %c0_i32, %c0_i32_0 : i32, i32
  }
  func.func @transform_18(%arg0: i32, %arg1: i32) -> (i32, i32) {
    %c0_i32 = arith.constant 0 : i32
    %c0_i32_0 = arith.constant 0 : i32
    %c0_i32_1 = arith.constant 0 : i32
    return %c0_i32, %c0_i32_0 : i32, i32
  }
  func.func @transform_19(%arg0: i32, %arg1: i32) -> (i32, i32, i32) {
    %c0_i32 = arith.constant 0 : i32
    %c0_i32_0 = arith.constant 0 : i32
    return %arg0, %arg1, %c0_i32 : i32, i32, i32
  }
}

</mosaic_0001>

<bundles_post_ra>
// kernel: encoder_forward.3
= control target key start
LH: loop header
LB: loop body
LE: loop exit
PB: predicated region body
PF: predicated region fallthrough
CT: control target
= control target key end

     0   :  { %s2498_s0 = inlined_call_operand.vmem [shape: f32[2,8,32], index: 0, kind: input, shape index: {}, may-alias: {0,1}]   ;;  %s2499_s1 = inlined_call_operand.vmem [shape: f32[2,8,32], index: 1, kind: input, shape index: {}, may-alias: {0,1}]   ;;  %s2500_s2 = inlined_call_operand.vmem [shape: f32[2,1,8], index: 2, kind: input, shape index: {}]   ;;  %s2501_s3 = inlined_call_operand.vmem [shape: f32[1,32], index: 3, kind: input, shape index: {}]   ;;  %s2502_s4 = inlined_call_operand.vmem [shape: f32[1,32], index: 4, kind: input, shape index: {}]   ;;  %s2503_s5 = inlined_call_operand.vmem [shape: bf16[32,32], index: 5, kind: input, shape index: {}]   ;;  %s2504_s6 = inlined_call_operand.vmem [shape: f32[1,32], index: 6, kind: input, shape index: {}]   ;;  %s2505_s7 = inlined_call_operand.vmem [shape: bf16[32,64], index: 7, kind: input, shape index: {}]   ;;  %s2506_s8 = inlined_call_operand.vmem [shape: f32[1,64], index: 8, kind: input, shape index: {}]   ;;  %s2507_s9 = inlined_call_operand.vmem [shape: bf16[32,32], index: 9, kind: input, shape index: {}]   ;;  %s2508_s10 = inlined_call_operand.vmem [shape: f32[1,32], index: 10, kind: input, shape index: {}]   ;;  %s2509_s11 = inlined_call_operand.vmem [shape: f32[1,32], index: 11, kind: input, shape index: {}]   ;;  %s2510_s12 = inlined_call_operand.vmem [shape: f32[1,32], index: 12, kind: input, shape index: {}]   ;;  %s2511_s13 = inlined_call_operand.vmem [shape: bf16[32,64], index: 13, kind: input, shape index: {}]   ;;  %s2512_s14 = inlined_call_operand.vmem [shape: f32[1,64], index: 14, kind: input, shape index: {}]   ;;  %s2513_s15 = inlined_call_operand.vmem [shape: bf16[64,32], index: 15, kind: input, shape index: {}]   ;;  %s2514_s16 = inlined_call_operand.vmem [shape: f32[1,32], index: 16, kind: input, shape index: {}]   ;;  %s2515_s17 = inlined_call_operand.vmem [shape: f32[1,32], index: 17, kind: input, shape index: {}]   ;;  %s2516_s18 = inlined_call_operand.vmem [shape: f32[1,32], index: 18, kind: input, shape index: {}]   ;;  %s2517_s19 = inlined_call_operand.hbm [shape: f32[2,8,32], index: 19, kind: output, shape index: {}]  }
   0x1   :  { %2525 = sst [smem:[#allocation11_spill]] %s2498_s0 }
   0x2   :  { %2526 = sst [smem:[#allocation12_spill]] %s2499_s1 }
   0x3   :  { %2527 = sst [smem:[#allocation13_spill]] %s2500_s2 }
   0x4   :  { %2528 = sst [smem:[#allocation14_spill]] %s2501_s3 }
   0x5   :  { %2529 = sst [smem:[#allocation15_spill]] %s2502_s4 }
   0x6   :  { %2530 = sst [smem:[#allocation16_spill]] %s2503_s5 }
   0x7   :  { %2531 = sst [smem:[#allocation17_spill]] %s2517_s19 }
   0x8   :  { %24 = vsyncpa [#allocation4], 0 }
   0x9   :  { %26 = vsyncpa [#allocation4 + $0x1], 0  ;;  %s2208_s0 = smov 0   ;;  %s2210_s30 = smov 0  }
   0xa   :  { %s2212_s20 = smov 0   ;;  %s2214_s21 = smov 0  }
   0xb   :  { %s2216_s1 = smov 0   ;;  %s2218_s22 = smov 0  }
   0xc LB: > { %2532 = sst [smem:[#allocation6_spill]] %s2072_s0  ;;  %s1729_s2 = sadd.s32 4294967295, %s2092_s22   ;;  %s2092_s22 = sphi %s2218_s22, %s32_s22   ;;  %s2088_s1 = sphi %s2216_s1, %s2550_s1   ;;  %s2084_s21 = sphi %s2214_s21, %s2549_s21   ;;  %s2080_s20 = sphi %s2212_s20, %s2553_s20   ;;  %s2076_s30 = sphi %s2210_s30, %s2552_s30   ;;  %s2072_s0 = sphi %s2208_s0, %s2551_s0  }
   0xd   : > { %2533 = sst [smem:[#allocation7_spill]] %s2088_s1  ;;  %s1730_s23 = sadd.s32 4294967294, %s2092_s22  }
   0xe   : > { %2534 = sst [smem:[#allocation8_spill]] %s2092_s22  ;;  %s44_s24 = sadd.s32 1, %s2088_s1 }
   0xf   : > { %s469_s25 = sadd.s32 1, %s2080_s20  ;;  %p46_p0 = scmp.ge.s32.totalorder %s44_s24, 2 }
  0x10   : > { %p479_p1 = scmp.ne.s32.totalorder %s2080_s20, %s2076_s30  ;;  %p480_p2 = scmp.eq.s32.totalorder %s1729_s2, 1 }
  0x11   : > { %p485_p3 = scmp.ne.s32.totalorder %s2076_s30, %s2072_s0  ;;  %s2555_s24 = smov (%p46_p0, %s44_s24), 0 }
  0x12   : > { %2535 = sst [smem:[#allocation9_spill]] %s2555_s24  ;;  %p2248_p4 = por %p480_p2, %p479_p1 }
  0x13   : > { %p486_p5 = scmp.eq.s32.totalorder %s1730_s23, 1  ;;  %s464_s26 = ssub.s32 %s2088_s1, %s2555_s24 }
  0x14   : > { %p1733_p6 = scmp.ge.s32.totalorder %s2092_s22, 1  ;;  %p467_p7 = scmp.eq.s32.totalorder %s464_s26, 0 }
  0x15   : > { %p2255_p8 = por %p486_p5, %p485_p3  ;;  %p575_p9 = scmp.lt.s32.totalorder %s2092_s22, 3 }
  0x16   : > { %s2261_s28 = scalar_select %p467_p7, %s2080_s20, %s469_s25  }
  0x17   : > { %s2537_s27 = scalar_select %p2255_p8, 1, 0 }
  0x18   : > { %p576_p10 = pnand %p1733_p6, %p575_p9 }
  0x19   : > { %2538 = sst [smem:[#allocation10_spill]] %s2537_s27  ;;  %p640_p11 = scmp.lt.s32.totalorder (!%p576_p10), %s2084_s21, 1  ;;  %vm660_vm0 = vcmask (!%p576_p10), 261120   ;;  %v1970_v14 = vld [vmem:[%s2505_s7] sm:$0xff] (!%p576_p10)   ;;  %v2094_v15 = vmov (!%p576_p10), 0.0   ;;  %vm2095_vm1 = vmmov (!%p576_p10), 0  }
  0x1a   : > { %579 = sbr.rel (%p576_p10) target bundleno = 2953 (0xb89), region = 96  ;;  %s2539_s26 = sld [smem:[#allocation11_spill]] (!%p576_p10)  ;;  %1810 = vmatprep.subr.bf16.mxu1 (!%p576_p10), %v2094_v15  ;;  %1814 = vmatprep.mubr.msk.bf16.mxu1 (!%p576_p10), %vm2095_vm1, %v2094_v15  ;;  %v1971_v16 = vld [vmem:[%s2505_s7 + $0x8] sm:$0xff] (!%p576_p10)   ;;  %v1739_v47 = vld [vmem:[%s2506_s8] ss:$0 sm:$0xff] (!%p576_p10)  ;;  %vm864_vm6 = vcmask (!%p576_p10), 64512  }
  0x1b   : > { %s2540_s27 = sld [smem:[#allocation12_spill]] (!%p576_p10)  ;;  %1811 = vmatpush3.bf16.msra.mxu1 (!%p576_p10), %v1970_v14  ;;  %1826 = vmatprep.subr.bf16.mxu0 (!%p576_p10), %v2094_v15  ;;  %s2542_s4 = sld [smem:[#allocation15_spill]] (!%p576_p10)  ;;  %v1743_v55 = vld [vmem:[%s2504_s6] ss:$0 sm:$0xff] (!%p576_p10)  ;;  %vm929_vm8 = vcmask (!%p576_p10), 1043456   ;;  %vm1089_vm9 = vcmask (!%p576_p10), 130112  }
  0x1c   : > { %1812 = vmatprep.subr.bf16.mxu1 (!%p576_p10), %v2094_v15  ;;  %1828 = vmatprep.mubr.msk.bf16.mxu0 (!%p576_p10), %vm2095_vm1, %v2094_v15  ;;  %s2543_s5 = sld [smem:[#allocation16_spill]] (!%p576_p10)  ;;  %s2096_s25 = smov (!%p576_p10), 120   ;;  %vm1205_vm10 = vcmask (!%p576_p10), 195712   ;;  %vm1321_vm11 = vcmask (!%p576_p10), 261312   ;;  %vm1531_vm14 = vcmask (!%p576_p10), 523264  }
  0x1d   : > { %s2097_s23 = smov (!%p576_p10), 104   ;;  %s2101_s24 = smov (!%p576_p10), 80  }
  0x1f   : > { %1813 = vmatpush3.bf16.msra.mxu1 (!%p576_p10), %v1971_v16 }
  0x20   : > { %1818 = vmatprep.subr.bf16.mxu1 (!%p576_p10), %v2094_v15 }
  0x21   : > { %s2265_s29 = scalar_select %p640_p11, %s2084_s21, 1  ;;  %v1738_v36 = vld [vmem:[%s2542_s4] ss:$0 sm:$0xff] }
  0x22   : > { %v1972_v41 = vld [vmem:[%s2543_s5] sm:$0xff]   ;;  %v1973_v44 = vld [vmem:[%s2543_s5 + $0x8] sm:$0xff]   ;;  %s2545_s4 = sld [smem:[#allocation17_spill]] }
  0x23   : > { %s1735_s2 = sshll.u32 %s2265_s29, 3 }
  0x24   : > { %s643_s1 = scalar_lea.vmem %s2539_s26, %s1735_s2  ;;  %s650_s22 = scalar_lea.vmem %s2540_s27, %s1735_s2 }
  0x25   : > { %v655_v0 = vld [vmem:[%s643_s1] sm:$0xff]  ;;  %s2541_s27 = sld [smem:[#allocation14_spill]]  ;;  %s2098_s26 = smov 112  }
  0x26   : > { %v2274_v1 = vld [vmem:[%s650_s22] sm:$0xff]  ;;  %v661_v2 = vsel %vm660_vm0, %v655_v0, 0.0  ;;  %s2544_s1 = sld [smem:[#allocation13_spill]]  ;;  %s2104_s2 = smov 8  }
  0x27   : > { %v700_v3 = vsel %vm660_vm0, %v2274_v1, 0.0  ;;  %662 = vadd.xlane.f32.xlu0 %v661_v2 }
  0x2b   : > { %701 = vadd.xlane.f32.xlu0 %v700_v3  ;;  %v1737_v34 = vld [vmem:[%s2541_s27] ss:$0 sm:$0xff]  ;;  %s2103_s27 = smov 72  }
  0x2c   : > { %s653_s22 = scalar_lea.vmem %s2544_s1, %s2265_s29  ;;  %s2100_s29 = smov 88  }
  0xb4   : > { %v663_v4 = vpop.xlane.xlu0 %662 }
  0xb5   : > { %v665_v5 = vmul.f32 0.03125, %v663_v4 }
  0xb7   : > { %v666_v6 = vsub.f32 %v655_v0, %v665_v5 }
  0xb8   : > { %v702_v7 = vpop.xlane.xlu0 %701 }
  0xb9   : > { %v703_v8 = vmul.f32 0.03125, %v702_v7  ;;  %v667_v9 = vmul.f32 %v666_v6, %v666_v6 }
  0xbb   : > { %v704_v10 = vsub.f32 %v2274_v1, %v703_v8  ;;  %v668_v11 = vsel %vm660_vm0, %v667_v9, 0.0  ;;  %v859_v8 = vlaneseq  ;;  %v657_v9 = vld [vmem:[%s653_s22] sm:$0x1]  ;;  %s2106_s22 = smov 24  }
  0xbc   : > { %669 = vadd.xlane.f32.xlu1 %v668_v11  ;;  %vm658_vm7 = vcmp.ne.f32.partialorder %v657_v9, 0.0 }
  0xbd   : > { %v705_v12 = vmul.f32 %v704_v10, %v704_v10 }
  0xbf   : > { %v706_v13 = vsel %vm660_vm0, %v705_v12, 0.0  ;;  %v2099_v12 = vmov -1e+09  }
  0xc0   : > { %707 = vadd.xlane.f32.xlu1 %v706_v13  ;;  %v659_v13 = vsel %vm658_vm7, 0.0, %v2099_v12 }
 0x149   : > { %v670_v17 = vpop.xlane.xlu1 %669 }
 0x14a   : > { %v671_v18 = vmul.f32 0.032258064, %v670_v17 }
 0x14c   : > { %1982 = vrsqrt.f32 %v671_v18  ;;  %vm674_vm2 = vcmp.eq.f32.partialorder %v671_v18, inf  ;;  %v677_v23 = vand.u32 2147483648, %v671_v18  ;;  %vm676_vm3 = vcmp.eq.f32.partialorder %v671_v18, 0.0 }
 0x14d   : > { %v708_v19 = vpop.xlane.xlu1 %707 }
 0x14e   : > { %v709_v20 = vmul.f32 0.032258064, %v708_v19 }
 0x150   : > { %1984 = vrsqrt.f32 %v709_v20  ;;  %vm712_vm4 = vcmp.eq.f32.partialorder %v709_v20, inf  ;;  %v715_v29 = vand.u32 2147483648, %v709_v20  ;;  %vm714_vm5 = vcmp.eq.f32.partialorder %v709_v20, 0.0 }
 0x156   : > { %v1983_v21 = vpop.eup %1982 }
 0x157   : > { %v673_v22 = vmul.f32 %v1983_v21, %v671_v18 }
 0x159   : > { %v675_v24 = vsel %vm674_vm2, %v671_v18, %v673_v22 }
 0x15a   : > { %v1985_v25 = vpop.eup %1984  ;;  %v678_v26 = vsel %vm676_vm3, %v677_v23, %v675_v24 }
 0x15b   : > { %v679_v27 = vadd.f32 1e-06, %v678_v26  ;;  %v711_v28 = vmul.f32 %v1985_v25, %v709_v20 }
 0x15d   : > { %1986 = vrcp.f32 %v679_v27  ;;  %v713_v30 = vsel %vm712_vm4, %v709_v20, %v711_v28 }
 0x15e   : > { %v716_v31 = vsel %vm714_vm5, %v715_v29, %v713_v30 }
 0x15f   : > { %v717_v32 = vadd.f32 1e-06, %v716_v31 }
 0x161   : > { %1988 = vrcp.f32 %v717_v32 }
 0x167   : > { %v1987_v33 = vpop.eup %1986 }
 0x168   : > { %v682_v35 = vmul.f32 %v1987_v33, %v666_v6 }
 0x16a   : > { %v690_v37 = vmul.f32 %v1737_v34, %v682_v35 }
 0x16b   : > { %v1989_v38 = vpop.eup %1988 }
 0x16c   : > { %v698_v39 = vadd.f32 %v1738_v36, %v690_v37  ;;  %v720_v40 = vmul.f32 %v1989_v38, %v704_v10  ;;  %v860_v10 = vshrl.u32 %v859_v8, 7 }
 0x16e   : > { %v699_v42 = vpack.c.bf16 %v698_v39, %v698_v39  ;;  %v721_v43 = vmul.f32 %v1737_v34, %v720_v40  ;;  %v861_v11 = vsub.s32 0, %v860_v10 }
 0x170   : > { %1815 = vmatmul.mubr.msk.bf16.vlgmr.msra.gmra.mrb[0].mxu1 %vm660_vm0, %v699_v42  ;;  %v722_v45 = vadd.f32 %v1738_v36, %v721_v43  ;;  %v862_v14 = vrot.slane %v659_v13, %v861_v11 }
 0x171   : > { %1819 = vmatpush3.bf16.msra.mxu1 %v1972_v41  ;;  %1822 = vmatprep.mubr.msk.bf16.mxu1 %vm2095_vm1, %v2094_v15 }
 0x172   : > { %1820 = vmatprep.subr.bf16.mxu1 %v2094_v15  ;;  %v723_v46 = vpack.c.bf16 %v722_v45, %v722_v45 }
 0x175   : > { %1821 = vmatpush3.bf16.msra.mxu1 %v1973_v44 }
 0x176   : > { %1832 = vmatprep.subr.bf16.mxu1 %v2094_v15 }
 0x178   : > { %1823 = vmatmul.mubr.msk.bf16.vlgmr.msra.gmra.mrb[4].mxu1 %vm660_vm0, %v723_v46 }
 0x179   : > { %1834 = vmatprep.mubr.msk.bf16.mxu1 %vm2095_vm1, %v2094_v15 }
 0x243   : > { %v784_v48 = vpop.f32.mrb[0].mxu1 }
 0x244   : > { %v785_v49 = vadd.f32 %v1739_v47, %v784_v48  ;;  %v1816_v50 = vpop.f32.mrb[1].mxu1 }
 0x245   : > { %v787_v51 = vpop.f32.mrb[2].mxu1 }
 0x246   : > { %v2319_v52 = vpack.c.bf16 %v785_v49, %v785_v49  ;;  %v1817_v53 = vpop.f32.mrb[3].mxu1 }
 0x248   : > { %977 = vrot.lane.b32.xlu0 %v2319_v52, %s2096_s25  ;;  %v869_v54 = vsel %vm864_vm6, %v2319_v52, 0 }
 0x249   : > { %1827 = vmatpush3.bf16.xpose.msra.mxu0 %v869_v54 }
 0x24a   : > { %1838 = vmatprep.subr.bf16.mxu0 %v2094_v15 }
 0x24b   : > { %v851_v56 = vpop.f32.mrb[4].mxu1 }
 0x24c   : > { %v852_v57 = vadd.f32 %v1743_v55, %v851_v56  ;;  %1209 = vrot.lane.b32.xlu0 %v2319_v52, %s2097_s23  ;;  %v1824_v58 = vpop.f32.mrb[5].mxu1 }
 0x24d   : > { %v854_v59 = vpop.f32.mrb[6].mxu1 }
 0x24e   : > { %v857_v60 = vpack.c.bf16 %v852_v57, %v852_v57  ;;  %v1825_v61 = vpop.f32.mrb[7].mxu1 }
 0x250   : > { %975 = vrot.lane.b32.xlu1 %v857_v60, %s2096_s25  ;;  %1829 = vmatmul.mubr.msk.bf16.vlgmr.msra.gmra.mrb[0].mxu0 %vm864_vm6, %v857_v60  ;;  %s2102_s25 = smov 96  }
 0x251   : > { %1840 = vmatprep.mubr.msk.bf16.mxu0 %vm2095_vm1, %v2094_v15 }
 0x254   : > { %1093 = vrot.lane.b32.xlu1 %v2319_v52, %s2098_s26 }
 0x258   : > { %1091 = vrot.lane.b32.xlu1 %v857_v60, %s2098_s26  ;;  %s1774_s26 = sshll.u32 %s2084_s21, 7  ;;  %s2107_s21 = smov [#allocation3]  }
 0x259   : > { %s2450_s5 = scalar_lea.hbm %s2545_s4, %s1774_s26 }
 0x25c   : > { %1207 = vrot.lane.b32.xlu1 %v857_v60, %s2097_s23  ;;  %s2105_s23 = smov 16  }
 0x2ba   : > { %v978_v62 = vpop.permute.xlu0 %977 }
 0x2bb   : > { %v983_v63 = vsel %vm864_vm6, %v978_v62, 0 }
 0x2bc   : > { %1839 = vmatpush3.bf16.xpose.msra.mxu0 %v983_v63 }
 0x2bd   : > { %1850 = vmatprep.subr.bf16.mxu0 %v2094_v15 }
 0x2be   : > { %v1210_v4 = vpop.permute.xlu0 %1209 }
 0x2bf   : > { %v1215_v6 = vsel %vm864_vm6, %v1210_v4, 0 }
 0x2c2   : > { %v976_v0 = vpop.permute.xlu1 %975 }
 0x2c3   : > { %1841 = vmatmul.mubr.msk.bf16.vlgmr.msra.gmra.mrb[4].mxu0 %vm864_vm6, %v976_v0 }
 0x2c4   : > { %1852 = vmatprep.mubr.msk.bf16.mxu0 %vm2095_vm1, %v2094_v15 }
 0x2c6   : > { %v1094_v2 = vpop.permute.xlu1 %1093 }
 0x2c7   : > { %v1099_v3 = vsel %vm864_vm6, %v1094_v2, 0 }
 0x2c8   : > { %1851 = vmatpush3.bf16.xpose.msra.mxu0 %v1099_v3 }
 0x2c9   : > { %1862 = vmatprep.subr.bf16.mxu0 %v2094_v15 }
 0x2ca   : > { %v1092_v5 = vpop.permute.xlu1 %1091 }
 0x2ce   : > { %v1208_v7 = vpop.permute.xlu1 %1207 }
 0x2cf   : > { %1853 = vmatmul.mubr.msk.bf16.vlgmr.msra.gmra.mrb[8].mxu0 %vm864_vm6, %v1092_v5 }
 0x2d0   : > { %1863 = vmatpush3.bf16.xpose.msra.mxu0 %v1215_v6  ;;  %1864 = vmatprep.mubr.msk.bf16.mxu0 %vm2095_vm1, %v2094_v15 }
 0x2d1   : > { %1874 = vmatprep.subr.bf16.mxu0 %v2094_v15 }
 0x2d7   : > { %1865 = vmatmul.mubr.msk.bf16.vlgmr.msra.gmra.mrb[12].mxu0 %vm864_vm6, %v1208_v7 }
 0x2d8   : > { %1878 = vmatprep.mubr.msk.bf16.mxu0 %vm2095_vm1, %v2094_v15 }
 0x323   : > { %v905_v16 = vpop.f32.mrb[0].mxu0 }
 0x324   : > { %v906_v17 = vadd.f32 %v905_v16, %v862_v14  ;;  %v1830_v18 = vpop.f32.mrb[1].mxu0 }
 0x325   : > { %v908_v19 = vpop.f32.mrb[2].mxu0 }
 0x326   : > { %v1831_v20 = vpop.f32.mrb[3].mxu0  ;;  %v911_v21 = vsel %vm864_vm6, %v906_v17, -inf }
 0x327   : > { %912 = vmax.xlane.f32.xlu0 %v911_v21 }
 0x396   : > { %v1019_v22 = vpop.f32.mrb[4].mxu0 }
 0x397   : > { %v1020_v23 = vadd.f32 %v1019_v22, %v862_v14  ;;  %v1842_v24 = vpop.f32.mrb[5].mxu0 }
 0x398   : > { %v1022_v25 = vpop.f32.mrb[6].mxu0 }
 0x399   : > { %v1843_v26 = vpop.f32.mrb[7].mxu0  ;;  %v1025_v27 = vsel %vm864_vm6, %v1020_v23, -inf }
 0x39a   : > { %1026 = vmax.xlane.f32.xlu1 %v1025_v27 }
 0x3a2   : > { %v1135_v28 = vpop.f32.mrb[8].mxu0 }
 0x3a3   : > { %v1136_v29 = vadd.f32 %v1135_v28, %v862_v14  ;;  %v1854_v30 = vpop.f32.mrb[9].mxu0 }
 0x3a4   : > { %v1138_v31 = vpop.f32.mrb[10].mxu0 }
 0x3a5   : > { %v1855_v32 = vpop.f32.mrb[11].mxu0  ;;  %v1141_v33 = vsel %vm864_vm6, %v1136_v29, -inf }
 0x3a6   : > { %1142 = vmax.xlane.f32.xlu0 %v1141_v33 }
 0x3aa   : > { %v1251_v34 = vpop.f32.mrb[12].mxu0 }
 0x3ab   : > { %v1252_v35 = vadd.f32 %v1251_v34, %v862_v14  ;;  %v1866_v36 = vpop.f32.mrb[13].mxu0  ;;  %v1974_v34 = vld [vmem:[%s2507_s9] sm:$0xff]  }
 0x3ac   : > { %v1254_v37 = vpop.f32.mrb[14].mxu0  ;;  %1875 = vmatpush3.bf16.msra.mxu0 %v1974_v34 }
 0x3ad   : > { %v1867_v38 = vpop.f32.mrb[15].mxu0  ;;  %v1257_v39 = vsel %vm864_vm6, %v1252_v35, -inf  ;;  %1876 = vmatprep.subr.bf16.mxu0 %v2094_v15 }
 0x3ae   : > { %1258 = vmax.xlane.f32.xlu0 %v1257_v39 }
 0x3b4   : > { %v913_v40 = vpop.xlane.xlu0 %912 }
 0x3b5   : > { %v914_v41 = vsub.f32 %v906_v17, %v913_v40 }
 0x3b7   : > { %v915_v42 = vmul.f32 1.442695, %v914_v41 }
 0x3b9   : > { %1990 = vpow2.f32 %v915_v42 }
 0x3c3   : > { %v1991_v43 = vpop.eup %1990 }
 0x3c4   : > { %v917_v44 = vsel %vm864_vm6, %v1991_v43, 0.0 }
 0x3c5   : > { %918 = vadd.xlane.f32.xlu0 %v917_v44 }
 0x427   : > { %v1027_v45 = vpop.xlane.xlu1 %1026 }
 0x428   : > { %v1028_v46 = vsub.f32 %v1020_v23, %v1027_v45 }
 0x42a   : > { %v1029_v47 = vmul.f32 1.442695, %v1028_v46  ;;  %v1758_v46 = vld [vmem:[%s2508_s10] ss:$0 sm:$0xff] }
 0x42c   : > { %1992 = vpow2.f32 %v1029_v47 }
 0x433   : > { %v1143_v48 = vpop.xlane.xlu0 %1142 }
 0x434   : > { %v1144_v49 = vsub.f32 %v1136_v29, %v1143_v48 }
 0x436   : > { %v1993_v50 = vpop.eup %1992  ;;  %v1145_v51 = vmul.f32 1.442695, %v1144_v49 }
 0x437   : > { %v1031_v53 = vsel %vm864_vm6, %v1993_v50, 0.0 }
 0x438   : > { %1994 = vpow2.f32 %v1145_v51  ;;  %1032 = vadd.xlane.f32.xlu1 %v1031_v53 }
 0x43b   : > { %v1259_v56 = vpop.xlane.xlu0 %1258 }
 0x43c   : > { %v1260_v57 = vsub.f32 %v1252_v35, %v1259_v56  ;;  %v1975_v35 = vld [vmem:[%s2507_s9 + $0x8] sm:$0xff]  }
 0x43d   : > { %1877 = vmatpush3.bf16.msra.mxu0 %v1975_v35 }
 0x43e   : > { %v1261_v58 = vmul.f32 1.442695, %v1260_v57  ;;  %1890 = vmatprep.subr.bf16.mxu0 %v2094_v15 }
 0x440   : > { %1996 = vpow2.f32 %v1261_v58 }
 0x442   : > { %v1995_v54 = vpop.eup %1994 }
 0x443   : > { %v1147_v55 = vsel %vm864_vm6, %v1995_v54, 0.0 }
 0x444   : > { %1148 = vadd.xlane.f32.xlu0 %v1147_v55 }
 0x449   : > { %1037 = vrot.lane.b32.xlu1 %v2319_v52, %s2100_s29  ;;  %s637_s29 = sand.u32 1, %s2076_s30  }
 0x44a   : > { %v1997_v59 = vpop.eup %1996 }
 0x44b   : > { %v1263_v60 = vsel %vm864_vm6, %v1997_v59, 0.0 }
 0x44d   : > { %1153 = vrot.lane.b32.xlu1 %v2319_v52, %s2101_s24  ;;  %s1734_s24 = sshll.u32 %s637_s29, 3 }
 0x44e   : > { %s639_s19 = scalar_lea.vmem [#allocation3], %s1734_s24  ;;  %s2018_s24 = sshll.u32 %s2107_s21, 4  ;;  %s2019_s24 = int_to_ptr.vmem [resolvable:$false] %s2018_s24 }
 0x44f   : > { %s1637_s0 = sshll.u32 %s639_s19, 4  ;;  %s2452_s0 = int_to_ptr.vmem [resolvable:$true] %s1637_s0 }
 0x450   : > { %p2021_p1 = scmp.lt.s32.totalorder %s2452_s0, %s2019_s24 }
 0x452   : > { %v919_v61 = vpop.xlane.xlu0 %918 }
 0x453   : > { %1998 = vrcp.f32 %v919_v61  ;;  %v1979_v61 = vld [vmem:[%s2513_s15 + $0x8] sm:$0xff]  }
 0x45a   : > { %924 = vrot.lane.b32.xlu0 %v2319_v52, %s2102_s25  ;;  %s1623_s25 = scalar_lea.sflag [#allocation4], %s637_s29 }
 0x45d   : > { %v1999_v63 = vpop.eup %1998 }
 0x45e   : > { %v921_v2 = vmul.f32 %v1999_v63, %v1991_v43 }
 0x460   : > { %v922_v6 = vpack.c.bf16 %v921_v2, %v921_v2 }
 0x471   : > { %1264 = vadd.xlane.f32.xlu1 %v1263_v60  ;;  %v1978_v60 = vld [vmem:[%s2513_s15] sm:$0xff]  }
 0x482   : > { %1269 = vrot.lane.b32.xlu1 %v2319_v52, %s2103_s27  ;;  %s2014_s27 = scalar_lea.vmem %s2452_s0, 128 }
 0x483   : > { %p2015_p12 = scmp.ne.s32.totalorder %s2452_s0, %s2014_s27 }
 0x485   : > { %p2016_p13 = pnand %p2015_p12, %p2248_p4 }
 0x487   : > { %p2017_p0 = pneg %p2016_p13 }
 0x4c5   : > { %v1033_v62 = vpop.xlane.xlu1 %1032 }
 0x4c6   : > { %2000 = vrcp.f32 %v1033_v62 }
 0x4c9   : > { %v1038_v5 = vpop.permute.xlu1 %1037 }
 0x4ca   : > { %v1043_v52 = vsel %vm929_vm8, %v1038_v5, 0 }
 0x4cd   : > { %v1154_v9 = vpop.permute.xlu1 %1153 }
 0x4ce   : > { %v1159_v12 = vsel %vm929_vm8, %v1154_v9, 0  ;;  %v1760_v9 = vld [vmem:[%s2510_s12] ss:$0 sm:$0xff] }
 0x4d0   : > { %v2001_v7 = vpop.eup %2000 }
 0x4d1   : > { %v1149_v0 = vpop.xlane.xlu0 %1148  ;;  %v1035_v8 = vmul.f32 %v2001_v7, %v1993_v50 }
 0x4d2   : > { %2002 = vrcp.f32 %v1149_v0 }
 0x4d3   : > { %v1036_v10 = vpack.c.bf16 %v1035_v8, %v1035_v8 }
 0x4d5   : > { %v925_v3 = vpop.permute.xlu0 %924 }
 0x4d6   : > { %v931_v4 = vsel %vm929_vm8, %v925_v3, 0 }
 0x4d7   : > { %1833 = vmatpush3.bf16.msra.mxu1 %v931_v4 }
 0x4d8   : > { %1844 = vmatprep.subr.bf16.mxu1 %v2094_v15 }
 0x4da   : > { %1835 = vmatmul.mubr.msk.bf16.vlgmr.msra.gmra.mrb[8].mxu1 %vm864_vm6, %v922_v6 }
 0x4db   : > { %1845 = vmatpush3.bf16.msra.mxu1 %v1043_v52  ;;  %1846 = vmatprep.mubr.msk.bf16.mxu1 %vm2095_vm1, %v2094_v15  ;;  %v1759_v52 = vld [vmem:[%s2509_s11] ss:$0 sm:$0xff] }
 0x4dc   : > { %1856 = vmatprep.subr.bf16.mxu1 %v2094_v15  ;;  %v2003_v11 = vpop.eup %2002 }
 0x4dd   : > { %v1151_v13 = vmul.f32 %v2003_v11, %v1995_v54 }
 0x4df   : > { %v1152_v14 = vpack.c.bf16 %v1151_v13, %v1151_v13  ;;  %v1980_v13 = vld [vmem:[%s2513_s15 + $0x10] sm:$0xff]  }
 0x4e2   : > { %1847 = vmatmul.mubr.msk.bf16.vlgmr.msra.gmra.mrb[12].mxu1 %vm864_vm6, %v1036_v10 }
 0x4e3   : > { %1857 = vmatpush3.bf16.msra.mxu1 %v1159_v12  ;;  %1858 = vmatprep.mubr.msk.bf16.mxu1 %vm2095_vm1, %v2094_v15 }
 0x4e4   : > { %1868 = vmatprep.subr.bf16.mxu1 %v2094_v15 }
 0x4ea   : > { %1859 = vmatmul.mubr.msk.bf16.vlgmr.msra.gmra.mrb[16].mxu1 %vm864_vm6, %v1152_v14  ;;  %v1981_v14 = vld [vmem:[%s2513_s15 + $0x18] sm:$0xff]  }
 0x4eb   : > { %1870 = vmatprep.mubr.msk.bf16.mxu1 %vm2095_vm1, %v2094_v15 }
 0x4fe   : > { %v1265_v16 = vpop.xlane.xlu1 %1264 }
 0x4ff   : > { %2004 = vrcp.f32 %v1265_v16  ;;  %v1761_v16 = vld [vmem:[%s2512_s14] ss:$0 sm:$0xff] }
 0x502   : > { %v1270_v17 = vpop.permute.xlu1 %1269 }
 0x503   : > { %v1275_v18 = vsel %vm929_vm8, %v1270_v17, 0 }
 0x504   : > { %1869 = vmatpush3.bf16.msra.mxu1 %v1275_v18 }
 0x505   : > { %1882 = vmatprep.subr.bf16.mxu1 %v2094_v15 }
 0x509   : > { %v2005_v19 = vpop.eup %2004 }
 0x50a   : > { %v1267_v20 = vmul.f32 %v2005_v19, %v1997_v59  ;;  %v1976_v59 = vld [vmem:[%s2511_s13] sm:$0xff]  }
 0x50c   : > { %v1268_v21 = vpack.c.bf16 %v1267_v20, %v1267_v20 }
 0x50e   : > { %1871 = vmatmul.mubr.msk.bf16.vlgmr.msra.gmra.mrb[20].mxu1 %vm864_vm6, %v1268_v21 }
 0x50f   : > { %1886 = vmatprep.mubr.msk.bf16.mxu1 %vm2095_vm1, %v2094_v15  ;;  %1883 = vmatpush3.bf16.msra.mxu1 %v1976_v59 }
 0x510   : > { %1884 = vmatprep.subr.bf16.mxu1 %v2094_v15 }
 0x5ad   : > { %v967_v22 = vpop.f32.mrb[8].mxu1 }
 0x5ae   : > { %973 = vst.msk [vmem:[#allocation2] sm:$0xff] %vm864_vm6, %v967_v22  ;;  %v1836_v23 = vpop.f32.mrb[9].mxu1 }
 0x5af   : > { %v970_v24 = vpop.f32.mrb[10].mxu1 }
 0x5b0   : > { %v1837_v25 = vpop.f32.mrb[11].mxu1 }
 0x5b5   : > { %v1079_v26 = vpop.f32.mrb[12].mxu1 }
 0x5b6   : > { %1086 = vrot.lane.b32.xlu0 %v1079_v26, %s2104_s2  ;;  %v1848_v27 = vpop.f32.mrb[13].mxu1  ;;  %s2020_s2 = scalar_lea.vmem %s2019_s24, 256 }
 0x5b7   : > { %v1082_v28 = vpop.f32.mrb[14].mxu1  ;;  %p2022_p2 = scmp.lt.s32.totalorder %s2020_s2, %s2014_s27 }
 0x5b8   : > { %v1849_v29 = vpop.f32.mrb[15].mxu1 }
 0x5b9   : > { %p2023_p3 = por %p2022_p2, %p2021_p1 }
 0x5bb   : > { %p2024_p5 = pnand %p2023_p3, %p2017_p0 }
 0x5bd   : > { %v1195_v30 = vpop.f32.mrb[16].mxu1 }
 0x5be   : > { %1202 = vrot.lane.b32.xlu1 %v1195_v30, %s2105_s23  ;;  %v1860_v31 = vpop.f32.mrb[17].mxu1 }
 0x5bf   : > { %v1198_v32 = vpop.f32.mrb[18].mxu1 }
 0x5c0   : > { %v1861_v33 = vpop.f32.mrb[19].mxu1 }
 0x5e1   : > { %v1311_v36 = vpop.f32.mrb[20].mxu1 }
 0x5e2   : > { %1318 = vrot.lane.b32.xlu0 %v1311_v36, %s2106_s22  ;;  %v1872_v37 = vpop.f32.mrb[21].mxu1 }
 0x5e3   : > { %v1314_v38 = vpop.f32.mrb[22].mxu1 }
 0x5e4   : > { %v1873_v39 = vpop.f32.mrb[23].mxu1 }
 0x628   : > { %v1087_v40 = vpop.permute.xlu0 %1086 }
 0x629   : > { %1090 = vst.msk [vmem:[#allocation2] sm:$0xff] %vm1089_vm9, %v1087_v40 }
 0x630   : > { %v1203_v41 = vpop.permute.xlu1 %1202 }
 0x631   : > { %1206 = vst.msk [vmem:[#allocation2] sm:$0xff] %vm1205_vm10, %v1203_v41 }
 0x654   : > { %v1319_v42 = vpop.permute.xlu0 %1318 }
 0x655   : > { %1322 = vst.msk [vmem:[#allocation2] sm:$0xff] %vm1321_vm11, %v1319_v42 }
 0x65c   : > { %v1323_v43 = vld [vmem:[#allocation2] sm:$0xff] }
 0x65d   : > { %v1324_v44 = vpack.c.bf16 %v1323_v43, %v1323_v43 }
 0x65f   : > { %1879 = vmatmul.mubr.msk.bf16.vlgmr.msra.gmra.mrb[16].mxu0 %vm660_vm0, %v1324_v44 }
 0x660   : > { %1898 = vmatprep.mubr.msk.bf16.mxu0 %vm2095_vm1, %v2094_v15  ;;  %1891 = vmatpush3.bf16.msra.mxu0 %v1978_v60 }
 0x661   : > { %1892 = vmatprep.subr.bf16.mxu0 %v2094_v15 }
 0x664   : > { %1893 = vmatpush3.bf16.msra.mxu0 %v1979_v61 }
 0x665   : > { %1894 = vmatprep.subr.bf16.mxu0 %v2094_v15 }
 0x668   : > { %1895 = vmatpush3.bf16.msra.mxu0 %v1980_v13 }
 0x669   : > { %1896 = vmatprep.subr.bf16.mxu0 %v2094_v15  ;;  %v1770_v15 = vld [vmem:[%s2514_s16] ss:$0 sm:$0xff] }
 0x66c   : > { %1897 = vmatpush3.bf16.msra.mxu0 %v1981_v14 }
 0x732   : > { %v1378_v45 = vpop.f32.mrb[16].mxu0 }
 0x733   : > { %v1384_v47 = vadd.f32 %v1378_v45, %v2274_v1  ;;  %v1880_v48 = vpop.f32.mrb[17].mxu0  ;;  %v1977_v1 = vld [vmem:[%s2511_s13 + $0x8] sm:$0xff]   ;;  %v1771_v45 = vld [vmem:[%s2515_s17] ss:$0 sm:$0xff] }
 0x734   : > { %v1381_v49 = vpop.f32.mrb[18].mxu0  ;;  %1885 = vmatpush3.bf16.msra.mxu1 %v1977_v1 }
 0x735   : > { %v1392_v50 = vadd.f32 %v1758_v46, %v1384_v47  ;;  %v1881_v51 = vpop.f32.mrb[19].mxu0  ;;  %v1772_v47 = vld [vmem:[%s2516_s18] ss:$0 sm:$0xff] }
 0x737   : > { %v1393_v53 = vsel %vm660_vm0, %v1392_v50, 0.0 }
 0x738   : > { %1394 = vadd.xlane.f32.xlu1 %v1393_v53 }
 0x7c5   : > { %v1395_v54 = vpop.xlane.xlu1 %1394 }
 0x7c6   : > { %v1396_v55 = vmul.f32 0.03125, %v1395_v54 }
 0x7c8   : > { %v1397_v56 = vsub.f32 %v1392_v50, %v1396_v55 }
 0x7ca   : > { %v1398_v57 = vmul.f32 %v1397_v56, %v1397_v56 }
 0x7cc   : > { %v1399_v58 = vsel %vm660_vm0, %v1398_v57, 0.0 }
 0x7cd   : > { %1400 = vadd.xlane.f32.xlu0 %v1399_v58 }
 0x85a   : > { %v1401_v62 = vpop.xlane.xlu0 %1400 }
 0x85b   : > { %v1402_v63 = vmul.f32 0.032258064, %v1401_v62 }
 0x85d   : > { %2006 = vrsqrt.f32 %v1402_v63  ;;  %vm1405_vm12 = vcmp.eq.f32.partialorder %v1402_v63, inf  ;;  %v1408_v3 = vand.u32 2147483648, %v1402_v63  ;;  %vm1407_vm13 = vcmp.eq.f32.partialorder %v1402_v63, 0.0 }
 0x867   : > { %v2007_v0 = vpop.eup %2006 }
 0x868   : > { %v1404_v2 = vmul.f32 %v2007_v0, %v1402_v63 }
 0x86a   : > { %v1406_v4 = vsel %vm1405_vm12, %v1402_v63, %v1404_v2 }
 0x86b   : > { %v1409_v5 = vsel %vm1407_vm13, %v1408_v3, %v1406_v4 }
 0x86c   : > { %v1410_v6 = vadd.f32 1e-06, %v1409_v5 }
 0x86e   : > { %2008 = vrcp.f32 %v1410_v6 }
 0x878   : > { %v2009_v7 = vpop.eup %2008 }
 0x879   : > { %v1413_v8 = vmul.f32 %v2009_v7, %v1397_v56 }
 0x87b   : > { %v1421_v10 = vmul.f32 %v1759_v52, %v1413_v8 }
 0x87d   : > { %v1429_v11 = vadd.f32 %v1760_v9, %v1421_v10 }
 0x87f   : > { %v1430_v12 = vpack.c.bf16 %v1429_v11, %v1429_v11 }
 0x881   : > { %1887 = vmatmul.mubr.msk.bf16.vlgmr.msra.gmra.mrb[24].mxu1 %vm660_vm0, %v1430_v12 }
 0x954   : > { %v1491_v17 = vpop.f32.mrb[24].mxu1 }
 0x955   : > { %v1492_v18 = vadd.f32 %v1761_v16, %v1491_v17  ;;  %v1888_v19 = vpop.f32.mrb[25].mxu1 }
 0x956   : > { %v1494_v20 = vpop.f32.mrb[26].mxu1 }
 0x957   : > { %v1497_v21 = vmax.f32 %v1492_v18, 0.0  ;;  %v1889_v22 = vpop.f32.mrb[27].mxu1 }
 0x959   : > { %v1498_v23 = vpack.c.bf16 %v1497_v21, %v1497_v21 }
 0x95b   : > { %1899 = vmatmul.mubr.msk.bf16.vlgmr.msra.gmra.mrb[20].mxu0 %vm1531_vm14, %v1498_v23 }
 0xa2e   : > { %v1569_v24 = vpop.f32.mrb[20].mxu0 }
 0xa2f   : > { %v1575_v25 = vadd.f32 %v1569_v24, %v1392_v50  ;;  %v1900_v26 = vpop.f32.mrb[21].mxu0 }
 0xa30   : > { %v1572_v27 = vpop.f32.mrb[22].mxu0 }
 0xa31   : > { %v1901_v28 = vpop.f32.mrb[23].mxu0  ;;  %v1583_v29 = vadd.f32 %v1770_v15, %v1575_v25 }
 0xa33   : > { %v1584_v30 = vsel %vm660_vm0, %v1583_v29, 0.0 }
 0xa34   : > { %1585 = vadd.xlane.f32.xlu0 %v1584_v30 }
 0xac1   : > { %v1586_v31 = vpop.xlane.xlu0 %1585 }
 0xac2   : > { %v1587_v32 = vmul.f32 0.03125, %v1586_v31 }
 0xac4   : > { %v1588_v33 = vsub.f32 %v1583_v29, %v1587_v32 }
 0xac6   : > { %v1589_v34 = vmul.f32 %v1588_v33, %v1588_v33 }
 0xac8   : > { %v1590_v35 = vsel %vm660_vm0, %v1589_v34, 0.0 }
 0xac9   : > { %1591 = vadd.xlane.f32.xlu0 %v1590_v35 }
 0xb56   : > { %v1592_v36 = vpop.xlane.xlu0 %1591 }
 0xb57   : > { %v1593_v37 = vmul.f32 0.032258064, %v1592_v36 }
 0xb59   : > { %2010 = vrsqrt.f32 %v1593_v37  ;;  %vm1596_vm15 = vcmp.eq.f32.partialorder %v1593_v37, inf  ;;  %v1599_v40 = vand.u32 2147483648, %v1593_v37  ;;  %vm1598_vm1 = vcmp.eq.f32.partialorder %v1593_v37, 0.0 }
 0xb63   : > { %v2011_v38 = vpop.eup %2010 }
 0xb64   : > { %v1595_v39 = vmul.f32 %v2011_v38, %v1593_v37 }
 0xb66   : > { %v1597_v41 = vsel %vm1596_vm15, %v1593_v37, %v1595_v39 }
 0xb67   : > { %v1600_v42 = vsel %vm1598_vm1, %v1599_v40, %v1597_v41 }
 0xb68   : > { %v1601_v43 = vadd.f32 1e-06, %v1600_v42 }
 0xb6a   : > { %2012 = vrcp.f32 %v1601_v43 }
 0xb74   : > { %v2013_v44 = vpop.eup %2012 }
 0xb75   : > { %v1604_v46 = vmul.f32 %v2013_v44, %v1588_v33 }
 0xb77   : > { %v1612_v48 = vmul.f32 %v1771_v45, %v1604_v46 }
 0xb79   : > { %v1620_v49 = vadd.f32 %v1772_v47, %v1612_v48 }
 0xb7b   : > { %1621 = vst.msk [vmem:[%s639_s19] sm:$0xff] %vm660_vm0, %v1620_v49 }
 0xb7c   : > { %2027 = shalt.err (!%p2024_p5)
}
 0xb7d   : > { %s2028_s29 = scalar_lea.hbm %s2450_s5, 128  ;;  %s2032_s19 = scalar_lea.hbm %s2545_s4, 256 }
 0xb7e   : > { %p2029_p6 = scmp.ne.s32.totalorder %s2450_s5, %s2028_s29  ;;  %p2033_p10 = scmp.lt.u32.totalorder %s2450_s5, %s2545_s4 }
 0xb7f   : > { %p2034_p11 = scmp.lt.u32.totalorder %s2032_s19, %s2028_s29  ;;  %p2036_p13 = scmp.lt.u32.totalorder %s2028_s29, %s2450_s5 }
 0xb80   : > { %p2030_p7 = pnand %p2029_p6, %p2248_p4 }
 0xb81   : > { %p2035_p12 = por %p2034_p11, %p2033_p10 }
 0xb82   : > { %p2031_p9 = pneg %p2030_p7 }
 0xb83   : > { %p2037_p0 = por %p2036_p13, %p2035_p12 }
 0xb85   : > { %p2038_p1 = pnand %p2037_p0, %p2031_p9 }
 0xb87   : > { %2041 = shalt.err (!%p2038_p1)
}
 0xb88   : > { %1902 = dma.vmem_to_hbm [thread:$0]  (%p2248_p4), %s2452_s0, 128, %s2450_s5, %s1623_s25  }
 0xb89 PF: > { %s2546_s27 = sld [smem:[#allocation8_spill]]  ;;  %s2547_s21 = sld [smem:[#allocation6_spill]] }
 0xb8f   : > { %p1908_p2 = scmp.ge.s32.totalorder %s2546_s27, 2  ;;  %s1649_s2 = sand.u32 1, %s2547_s21  }
 0xb90   : > { %s1650_s23 = scalar_lea.sflag [#allocation4], %s1649_s2 }
 0xb91   : > { %p1905_p3 = pnand %p1908_p2, %p2255_p8 }
 0xb93   : > { %2067 = dma.done.wait (!%p1905_p3), %s1650_s23, 128  }
 0xb94   : > { %2069 = vsyncadd (!%p1905_p3), %s1650_s23, 4294967168  ;;  %s32_s22 = sadd.s32 1, %s2546_s27   ;;  %s2549_s21 = sld [smem:[#allocation7_spill]] }
 0xb95   : > { %p29_p5 = scmp.ge.s32.totalorder %s32_s22, 4   ;;  %s2550_s1 = sld [smem:[#allocation9_spill]] }
 0xb96   : > { %s2551_s0 = smov %s2076_s30  ;;  %s2552_s30 = smov %s2080_s20 }
 0xb97   : > { %s2553_s20 = smov %s2261_s28  ;;  %31 = sbr.rel (!%p29_p5) target bundleno = 12 (0xc), region = 137 }
 0xb9e   :  { %1655 = vsyncpa [#allocation4], 1 }
 0xb9f   :  { %1657 = vsyncpa [#allocation4 + $0x1], 1 }

// kernel: encoder_forward.2
= control target key start
LH: loop header
LB: loop body
LE: loop exit
PB: predicated region body
PF: predicated region fallthrough
CT: control target
= control target key end

     0   :  { %s3132_s0 = inlined_call_operand.vmem [shape: f32[2,8,32], index: 0, kind: input, shape index: {}, may-alias: {0,1}]   ;;  %s3133_s1 = inlined_call_operand.vmem [shape: f32[2,8,32], index: 1, kind: input, shape index: {}, may-alias: {0,1}]   ;;  %s3134_s2 = inlined_call_operand.vmem [shape: f32[2,1,8], index: 2, kind: input, shape index: {}]   ;;  %s3135_s3 = inlined_call_operand.hbm [shape: f32[1,32], index: 3, kind: input, shape index: {}]   ;;  %s3136_s4 = inlined_call_operand.hbm [shape: f32[1,32], index: 4, kind: input, shape index: {}]   ;;  %s3137_s5 = inlined_call_operand.vmem [shape: bf16[32,32], index: 5, kind: input, shape index: {}]   ;;  %s3138_s6 = inlined_call_operand.hbm [shape: f32[1,32], index: 6, kind: input, shape index: {}]   ;;  %s3139_s7 = inlined_call_operand.vmem [shape: bf16[32,64], index: 7, kind: input, shape index: {}]   ;;  %s3140_s8 = inlined_call_operand.hbm [shape: f32[1,64], index: 8, kind: input, shape index: {}]   ;;  %s3141_s9 = inlined_call_operand.vmem [shape: bf16[32,32], index: 9, kind: input, shape index: {}]   ;;  %s3142_s10 = inlined_call_operand.hbm [shape: f32[1,32], index: 10, kind: input, shape index: {}]   ;;  %s3143_s11 = inlined_call_operand.hbm [shape: f32[1,32], index: 11, kind: input, shape index: {}]   ;;  %s3144_s12 = inlined_call_operand.hbm [shape: f32[1,32], index: 12, kind: input, shape index: {}]   ;;  %s3145_s13 = inlined_call_operand.hbm [shape: bf16[32,64], index: 13, kind: input, shape index: {}]   ;;  %s3146_s14 = inlined_call_operand.hbm [shape: f32[1,64], index: 14, kind: input, shape index: {}]   ;;  %s3147_s15 = inlined_call_operand.vmem [shape: bf16[64,32], index: 15, kind: input, shape index: {}]   ;;  %s3148_s16 = inlined_call_operand.hbm [shape: f32[1,32], index: 16, kind: input, shape index: {}]   ;;  %s3149_s17 = inlined_call_operand.vmem [shape: f32[2,8,32], index: 17, kind: output, shape index: {}]  }
   0x1   :  { %3156 = sst [smem:[#allocation26_spill]] %s3132_s0 }
   0x2   :  { %3157 = sst [smem:[#allocation27_spill]] %s3133_s1 }
   0x3   :  { %3158 = sst [smem:[#allocation28_spill]] %s3134_s2 }
   0x4   :  { %3159 = sst [smem:[#allocation29_spill]] %s3136_s4 }
   0x5   :  { %3160 = sst [smem:[#allocation30_spill]] %s3141_s9 }
   0x6   :  { %3161 = sst [smem:[#allocation31_spill]] %s3147_s15 }
   0x7   :  { %3162 = sst [smem:[#allocation32_spill]] %s3149_s17 }
   0x8   :  { %22 = vsyncpa [#allocation4], 0 }
   0x9   :  { %23 = vsyncpa [#allocation6], 0 }
   0xa   :  { %24 = vsyncpa [#allocation9], 0 }
   0xb   :  { %25 = vsyncpa [#allocation12], 0 }
   0xc   :  { %26 = vsyncpa [#allocation15], 0 }
   0xd   :  { %27 = vsyncpa [#allocation18], 0  ;;  %s2671_s24 = smov 0   ;;  %s2673_s25 = smov 0  }
   0xe   :  { %s2675_s26 = smov 0  }
   0xf LB: > { %3163 = sst [smem:[#allocation25_spill]] %s2554_s26  ;;  %s2556_s27 = smov [#allocation5]   ;;  %s2554_s26 = sphi %s2675_s26, %s33_s26   ;;  %s2550_s25 = sphi %s2673_s25, %s3181_s25   ;;  %s2546_s24 = sphi %s2671_s24, %s3180_s24  }
  0x10   : > { %s476_s28 = sshll.u32 %s2556_s27, 4  ;;  %s1859_s29 = sadd.s32 4294967295, %s2554_s26   ;;  %s2693_s28 = int_to_ptr.vmem [resolvable:$true] %s476_s28 }
  0x11   : > { %p1861_p0 = scmp.ge.s32.totalorder %s2554_s26, 1  ;;  %p452_p1 = scmp.lt.s32.totalorder %s2554_s26, 3 }
  0x12   : > { %p2689_p2 = scmp.eq.s32.totalorder %s1859_s29, 0  ;;  %s2557_s18 = smov [#allocation8]  }
  0x13   : > { %p2695_p3 = pnand %p1861_p0, %p452_p1  ;;  %s504_s19 = sshll.u32 %s2557_s18, 4  ;;  %s2701_s19 = int_to_ptr.vmem [resolvable:$true] %s504_s19 }
  0x14   : > { %s3164_s0 = scalar_select %p2689_p2, 1, 0 }
  0x15   : > { %s3165_s30 = scalar_select %p2695_p3, 1, 0 }
  0x16   : > { %p2088_p4 = pneg %p2695_p3  ;;  %s2558_s1 = smov [#allocation11]  }
  0x17   : > { %s529_s20 = sshll.u32 %s2558_s1, 4  ;;  %s2559_s22 = smov [#allocation14]   ;;  %s2709_s20 = int_to_ptr.vmem [resolvable:$true] %s529_s20 }
  0x18   : > { %p2705_p5 = pnand %p2689_p2, %p2088_p4  ;;  %s550_s23 = sshll.u32 %s2559_s22, 4  ;;  %s2711_s23 = int_to_ptr.vmem [resolvable:$true] %s550_s23 }
  0x19   : > { %s3167_s4 = sld [smem:[#allocation29_spill]] }
  0x1a   : > { %p2721_p7 = pneg %p2705_p5 }
  0x1f   : > { %s2228_s18 = scalar_lea.hbm %s3167_s4, 16 }
  0x20   : > { %p2229_p6 = scmp.ne.s32.totalorder %s3167_s4, %s2228_s18  ;;  %p2235_p10 = scmp.lt.u32.totalorder %s2228_s18, %s3167_s4 }
  0x22   : > { %p2231_p8 = pnand %p2721_p7, %p2229_p6 }
  0x24   : > { %p2232_p9 = pneg %p2231_p8 }
  0x26   : > { %p2237_p11 = pnand %p2235_p10, %p2232_p9 }
  0x28   : > { %2240 = shalt.err (!%p2237_p11)
}
  0x29   : > { %s2241_s17 = scalar_lea.vmem %s2693_s28, 16  ;;  %s2248_s26 = scalar_lea.vmem %s2693_s28, 32 }
  0x2a   : > { %p2242_p12 = scmp.ne.s32.totalorder %s2693_s28, %s2241_s17  ;;  %p2249_p1 = scmp.lt.s32.totalorder %s2693_s28, %s2693_s28 }
  0x2b   : > { %p2250_p4 = scmp.lt.s32.totalorder %s2248_s26, %s2241_s17 }
  0x2c   : > { %p2244_p13 = pnand %p2242_p12, %p2721_p7 }
  0x2d   : > { %p2251_p6 = por %p2250_p4, %p2249_p1 }
  0x2e   : > { %p2245_p0 = pneg %p2244_p13 }
  0x30   : > { %p2252_p8 = pnand %p2251_p6, %p2245_p0 }
  0x32   : > { %2255 = shalt.err (!%p2252_p8)
}
  0x33   : > { %2094 = dma.hbm_to_vmem [thread:$0]  (!%p2705_p5), %s3167_s4, 16, %s2693_s28, [#allocation6]  }
  0x34   : > { %s2256_s22 = scalar_lea.hbm %s3140_s8, 16 }
  0x35   : > { %p2257_p9 = scmp.ne.s32.totalorder %s3140_s8, %s2256_s22  ;;  %p2263_p12 = scmp.lt.u32.totalorder %s2256_s22, %s3140_s8 }
  0x37   : > { %p2259_p10 = pnand %p2257_p9, %p2721_p7 }
  0x39   : > { %p2260_p11 = pneg %p2259_p10 }
  0x3b   : > { %p2265_p13 = pnand %p2263_p12, %p2260_p11 }
  0x3d   : > { %2268 = shalt.err (!%p2265_p13)
}
  0x3e   : > { %s2269_s28 = scalar_lea.vmem %s2701_s19, 16  ;;  %s2276_s2 = scalar_lea.vmem %s2701_s19, 32 }
  0x3f   : > { %p2270_p0 = scmp.ne.s32.totalorder %s2701_s19, %s2269_s28  ;;  %p2277_p6 = scmp.lt.s32.totalorder %s2701_s19, %s2701_s19 }
  0x40   : > { %p2278_p8 = scmp.lt.s32.totalorder %s2276_s2, %s2269_s28 }
  0x41   : > { %p2272_p1 = pnand %p2270_p0, %p2721_p7 }
  0x42   : > { %p2279_p9 = por %p2278_p8, %p2277_p6 }
  0x43   : > { %p2273_p4 = pneg %p2272_p1 }
  0x45   : > { %p2280_p10 = pnand %p2279_p9, %p2273_p4 }
  0x47   : > { %2283 = shalt.err (!%p2280_p10)
}
  0x48   : > { %2100 = dma.hbm_to_vmem [thread:$0]  (!%p2705_p5), %s3140_s8, 16, %s2701_s19, [#allocation9]  }
  0x49   : > { %s2284_s18 = scalar_lea.hbm %s3143_s11, 16 }
  0x4a   : > { %p2285_p11 = scmp.ne.s32.totalorder %s3143_s11, %s2284_s18  ;;  %p2291_p0 = scmp.lt.u32.totalorder %s2284_s18, %s3143_s11 }
  0x4c   : > { %p2287_p12 = pnand %p2285_p11, %p2721_p7 }
  0x4e   : > { %p2288_p13 = pneg %p2287_p12 }
  0x50   : > { %p2293_p1 = pnand %p2291_p0, %p2288_p13 }
  0x52   : > { %2296 = shalt.err (!%p2293_p1)
}
  0x53   : > { %s2297_s19 = scalar_lea.vmem %s2709_s20, 16  ;;  %s2304_s2 = scalar_lea.vmem %s2709_s20, 32 }
  0x54   : > { %p2298_p4 = scmp.ne.s32.totalorder %s2709_s20, %s2297_s19  ;;  %p2305_p9 = scmp.lt.s32.totalorder %s2709_s20, %s2709_s20 }
  0x55   : > { %p2306_p10 = scmp.lt.s32.totalorder %s2304_s2, %s2297_s19 }
  0x56   : > { %p2300_p6 = pnand %p2298_p4, %p2721_p7 }
  0x57   : > { %p2307_p11 = por %p2306_p10, %p2305_p9 }
  0x58   : > { %p2301_p8 = pneg %p2300_p6 }
  0x5a   : > { %p2308_p12 = pnand %p2307_p11, %p2301_p8 }
  0x5c   : > { %2311 = shalt.err (!%p2308_p12)
}
  0x5d   : > { %2106 = dma.hbm_to_vmem [thread:$0]  (!%p2705_p5), %s3143_s11, 16, %s2709_s20, [#allocation12]  }
  0x5e   : > { %s2312_s18 = scalar_lea.hbm %s3145_s13, 256 }
  0x5f   : > { %p2313_p13 = scmp.ne.s32.totalorder %s3145_s13, %s2312_s18  ;;  %p2319_p4 = scmp.lt.u32.totalorder %s2312_s18, %s3145_s13 }
  0x61   : > { %p2315_p0 = pnand %p2313_p13, %p2721_p7 }
  0x63   : > { %p2316_p1 = pneg %p2315_p0 }
  0x65   : > { %p2321_p6 = pnand %p2319_p4, %p2316_p1 }
  0x67   : > { %2324 = shalt.err (!%p2321_p6)
}
  0x68   : > { %s2325_s20 = scalar_lea.vmem %s2711_s23, 256  ;;  %p2333_p11 = scmp.lt.s32.totalorder %s2711_s23, %s2711_s23 }
  0x69   : > { %p2326_p8 = scmp.ne.s32.totalorder %s2711_s23, %s2325_s20  ;;  %p2334_p12 = scmp.lt.s32.totalorder %s2325_s20, %s2325_s20 }
  0x6b   : > { %p2328_p9 = pnand %p2326_p8, %p2721_p7  ;;  %p2335_p13 = por %p2334_p12, %p2333_p11 }
  0x6d   : > { %p2329_p10 = pneg %p2328_p9 }
  0x6f   : > { %p2336_p0 = pnand %p2335_p13, %p2329_p10 }
  0x71   : > { %2339 = shalt.err (!%p2336_p0)
}
  0x72   : > { %s2560_s19 = smov 64   ;;  %s2561_s2 = smov 4  }
  0x73   : > { %2112 = dma.hbm_to_vmem [thread:$0]  (!%p2705_p5), %s3145_s13, 256, %s2711_s23, [#allocation15], %s2560_s19, %s2560_s19, %s2561_s2  }
  0x74   : > { %s45_s27 = sadd.s32 1, %s2550_s25  ;;  %s2562_s29 = smov [#allocation3]  }
  0x75   : > { %s465_s18 = sshll.u32 %s2562_s29, 4  ;;  %p2815_p1 = scmp.ge.s32.totalorder %s45_s27, 2  ;;  %s466_s18 = int_to_ptr.vmem [resolvable:$true] %s465_s18 }
  0x76   : > { %s2340_s28 = scalar_lea.hbm %s3135_s3, 16 }
  0x77   : > { %s3169_s22 = scalar_select %p2815_p1, 1, 0 }
  0x78   : > { %p2341_p4 = scmp.ne.s32.totalorder %s3135_s3, %s2340_s28  ;;  %p2347_p9 = scmp.lt.u32.totalorder %s2340_s28, %s3135_s3 }
  0x7a   : > { %p2343_p6 = pnand %p2341_p4, %p2721_p7 }
  0x7c   : > { %p2344_p8 = pneg %p2343_p6 }
  0x7e   : > { %p2349_p10 = pnand %p2347_p9, %p2344_p8 }
  0x80   : > { %2352 = shalt.err (!%p2349_p10)
}
  0x81   : > { %s2353_s2 = scalar_lea.vmem %s466_s18, 16  ;;  %s2360_s9 = scalar_lea.vmem %s466_s18, 32 }
  0x82   : > { %p2354_p11 = scmp.ne.s32.totalorder %s466_s18, %s2353_s2  ;;  %p2361_p0 = scmp.lt.s32.totalorder %s466_s18, %s466_s18 }
  0x83   : > { %p2362_p2 = scmp.lt.s32.totalorder %s2360_s9, %s2353_s2 }
  0x84   : > { %p2356_p12 = pnand %p2354_p11, %p2721_p7 }
  0x85   : > { %p2363_p3 = por %p2362_p2, %p2361_p0 }
  0x86   : > { %p2357_p13 = pneg %p2356_p12 }
  0x88   : > { %p2364_p1 = pnand %p2363_p3, %p2357_p13 }
  0x8a   : > { %2367 = shalt.err (!%p2364_p1)
}
  0x8b   : > { %2091 = dma.hbm_to_vmem [thread:$0]  (!%p2705_p5), %s3135_s3, 16, %s466_s18, [#allocation4]  }
  0x8c   : > { %p3170_p4 = scmp.ne.s32.totalorder %s3169_s22, 0  ;;  %s2563_s29 = smov [#allocation7]  }
  0x8d   : > { %s490_s17 = sshll.u32 %s2563_s29, 4  ;;  %s2564_s26 = smov [#allocation10]   ;;  %s491_s17 = int_to_ptr.vmem [resolvable:$true] %s490_s17 }
  0x8e   : > { %s3183_s27 = smov (%p3170_p4, %s45_s27), 0  ;;  %s518_s28 = sshll.u32 %s2564_s26, 4  ;;  %s2841_s28 = int_to_ptr.vmem [resolvable:$true] %s518_s28 }
  0x8f   : > { %s2368_s19 = scalar_lea.hbm %s3138_s6, 16 }
  0x90   : > { %p2369_p2 = scmp.ne.s32.totalorder %s3138_s6, %s2368_s19  ;;  %p2375_p6 = scmp.lt.u32.totalorder %s2368_s19, %s3138_s6 }
  0x92   : > { %p2371_p3 = pnand %p2369_p2, %p2721_p7 }
  0x94   : > { %p2372_p1 = pneg %p2371_p3 }
  0x96   : > { %p2377_p8 = pnand %p2375_p6, %p2372_p1 }
  0x98   : > { %2380 = shalt.err (!%p2377_p8)
}
  0x99   : > { %s2381_s4 = scalar_lea.vmem %s491_s17, 16  ;;  %s2388_s15 = scalar_lea.vmem %s491_s17, 32 }
  0x9a   : > { %p2382_p9 = scmp.ne.s32.totalorder %s491_s17, %s2381_s4  ;;  %p2389_p12 = scmp.lt.s32.totalorder %s491_s17, %s491_s17 }
  0x9b   : > { %p2390_p13 = scmp.lt.s32.totalorder %s2388_s15, %s2381_s4 }
  0x9c   : > { %p2384_p10 = pnand %p2382_p9, %p2721_p7 }
  0x9d   : > { %p2391_p0 = por %p2390_p13, %p2389_p12 }
  0x9e   : > { %p2385_p11 = pneg %p2384_p10 }
  0xa0   : > { %p2392_p4 = pnand %p2391_p0, %p2385_p11 }
  0xa2   : > { %2395 = shalt.err (!%p2392_p4)
}
  0xa3   : > { %2097 = dma.hbm_to_vmem [thread:$0]  (!%p2705_p5), %s3138_s6, 16, %s491_s17, [#allocation6]  }
  0xa4   : > { %s2396_s19 = scalar_lea.hbm %s3142_s10, 16 }
  0xa5   : > { %p2397_p2 = scmp.ne.s32.totalorder %s3142_s10, %s2396_s19  ;;  %p2403_p6 = scmp.lt.u32.totalorder %s2396_s19, %s3142_s10 }
  0xa7   : > { %p2399_p3 = pnand %p2397_p2, %p2721_p7 }
  0xa9   : > { %p2400_p1 = pneg %p2399_p3 }
  0xab   : > { %p2405_p8 = pnand %p2403_p6, %p2400_p1 }
  0xad   : > { %2408 = shalt.err (!%p2405_p8)
}
  0xae   : > { %s2409_s17 = scalar_lea.vmem %s2841_s28, 16  ;;  %s2416_s4 = scalar_lea.vmem %s2841_s28, 32 }
  0xaf   : > { %p2410_p9 = scmp.ne.s32.totalorder %s2841_s28, %s2409_s17  ;;  %p2417_p12 = scmp.lt.s32.totalorder %s2841_s28, %s2841_s28 }
  0xb0   : > { %p2418_p13 = scmp.lt.s32.totalorder %s2416_s4, %s2409_s17 }
  0xb1   : > { %p2412_p10 = pnand %p2410_p9, %p2721_p7 }
  0xb2   : > { %p2419_p0 = por %p2418_p13, %p2417_p12 }
  0xb3   : > { %p2413_p11 = pneg %p2412_p10 }
  0xb5   : > { %p2420_p4 = pnand %p2419_p0, %p2413_p11 }
  0xb7   : > { %2423 = shalt.err (!%p2420_p4)
}
  0xb8   : > { %2103 = dma.hbm_to_vmem [thread:$0]  (!%p2705_p5), %s3142_s10, 16, %s2841_s28, [#allocation9]  }
  0xb9   : > { %s2565_s26 = smov [#allocation13]   ;;  %s2566_s23 = smov [#allocation16]  }
  0xba   : > { %s540_s20 = sshll.u32 %s2565_s26, 4  ;;  %s564_s19 = sshll.u32 %s2566_s23, 4  ;;  %s541_s20 = int_to_ptr.vmem [resolvable:$true] %s540_s20  ;;  %s2885_s19 = int_to_ptr.vmem [resolvable:$true] %s564_s19 }
  0xbb   : > { %s2424_s18 = scalar_lea.hbm %s3144_s12, 16 }
  0xbc   : > { %p2425_p2 = scmp.ne.s32.totalorder %s3144_s12, %s2424_s18  ;;  %p2431_p6 = scmp.lt.u32.totalorder %s2424_s18, %s3144_s12 }
  0xbe   : > { %p2427_p3 = pnand %p2425_p2, %p2721_p7 }
  0xc0   : > { %p2428_p1 = pneg %p2427_p3 }
  0xc2   : > { %p2433_p8 = pnand %p2431_p6, %p2428_p1 }
  0xc4   : > { %2436 = shalt.err (!%p2433_p8)
}
  0xc5   : > { %s2437_s15 = scalar_lea.vmem %s541_s20, 16  ;;  %s2444_s29 = scalar_lea.vmem %s541_s20, 32 }
  0xc6   : > { %p2438_p9 = scmp.ne.s32.totalorder %s541_s20, %s2437_s15  ;;  %p2445_p12 = scmp.lt.s32.totalorder %s541_s20, %s541_s20 }
  0xc7   : > { %p2446_p13 = scmp.lt.s32.totalorder %s2444_s29, %s2437_s15 }
  0xc8   : > { %p2440_p10 = pnand %p2438_p9, %p2721_p7 }
  0xc9   : > { %p2447_p0 = por %p2446_p13, %p2445_p12 }
  0xca   : > { %p2441_p11 = pneg %p2440_p10 }
  0xcc   : > { %p2448_p4 = pnand %p2447_p0, %p2441_p11 }
  0xce   : > { %2451 = shalt.err (!%p2448_p4)
}
  0xcf   : > { %2109 = dma.hbm_to_vmem [thread:$0]  (!%p2705_p5), %s3144_s12, 16, %s541_s20, [#allocation12]  }
  0xd0   : > { %s2452_s18 = scalar_lea.hbm %s3146_s14, 16 }
  0xd1   : > { %p2453_p2 = scmp.ne.s32.totalorder %s3146_s14, %s2452_s18  ;;  %p2459_p6 = scmp.lt.u32.totalorder %s2452_s18, %s3146_s14 }
  0xd3   : > { %p2455_p3 = pnand %p2453_p2, %p2721_p7 }
  0xd5   : > { %p2456_p1 = pneg %p2455_p3 }
  0xd7   : > { %p2461_p8 = pnand %p2459_p6, %p2456_p1 }
  0xd9   : > { %2464 = shalt.err (!%p2461_p8)
}
  0xda   : > { %s2465_s20 = scalar_lea.vmem %s2885_s19, 16  ;;  %s2472_s15 = scalar_lea.vmem %s2885_s19, 32 }
  0xdb   : > { %p2466_p9 = scmp.ne.s32.totalorder %s2885_s19, %s2465_s20  ;;  %p2473_p12 = scmp.lt.s32.totalorder %s2885_s19, %s2885_s19 }
  0xdc   : > { %p2474_p13 = scmp.lt.s32.totalorder %s2472_s15, %s2465_s20 }
  0xdd   : > { %p2468_p10 = pnand %p2466_p9, %p2721_p7 }
  0xde   : > { %p2475_p0 = por %p2474_p13, %p2473_p12 }
  0xdf   : > { %p2469_p11 = pneg %p2468_p10 }
  0xe1   : > { %p2476_p4 = pnand %p2475_p0, %p2469_p11 }
  0xe3   : > { %2479 = shalt.err (!%p2476_p4)
}
  0xe4   : > { %2115 = dma.hbm_to_vmem [thread:$0]  (!%p2705_p5), %s3146_s14, 16, %s2885_s19, [#allocation15]  }
  0xe5   : > { %s2567_s23 = smov [#allocation17]   ;;  %s2480_s22 = scalar_lea.hbm %s3148_s16, 16 }
  0xe6   : > { %s578_s2 = sshll.u32 %s2567_s23, 4  ;;  %p2481_p2 = scmp.ne.s32.totalorder %s3148_s16, %s2480_s22  ;;  %s579_s2 = int_to_ptr.vmem [resolvable:$true] %s578_s2 }
  0xe7   : > { %p2487_p6 = scmp.lt.u32.totalorder %s2480_s22, %s3148_s16 }
  0xe8   : > { %p2483_p3 = pnand %p2481_p2, %p2721_p7 }
  0xea   : > { %p2484_p1 = pneg %p2483_p3 }
  0xec   : > { %p2489_p8 = pnand %p2487_p6, %p2484_p1 }
  0xee   : > { %2492 = shalt.err (!%p2489_p8)
}
  0xef   : > { %s2493_s19 = scalar_lea.vmem %s579_s2, 16  ;;  %s2500_s15 = scalar_lea.vmem %s579_s2, 32 }
  0xf0   : > { %p2494_p9 = scmp.ne.s32.totalorder %s579_s2, %s2493_s19  ;;  %p2501_p12 = scmp.lt.s32.totalorder %s579_s2, %s579_s2 }
  0xf1   : > { %p2502_p13 = scmp.lt.s32.totalorder %s2500_s15, %s2493_s19 }
  0xf2   : > { %p2496_p10 = pnand %p2494_p9, %p2721_p7 }
  0xf3   : > { %p2503_p0 = por %p2502_p13, %p2501_p12 }
  0xf4   : > { %p2497_p11 = pneg %p2496_p10 }
  0xf6   : > { %p2504_p4 = pnand %p2503_p0, %p2497_p11 }
  0xf8   : > { %2507 = shalt.err (!%p2504_p4)
}
  0xf9   : > { %2118 = dma.hbm_to_vmem [thread:$0]  (!%p2705_p5), %s3148_s16, 16, %s579_s2, [#allocation18]  }
  0xfa   : > { %p3171_p2 = scmp.ne.s32.totalorder %s3165_s30, 0 }
  0xfb   : > { %p3172_p3 = scmp.ne.s32.totalorder (!%p3171_p2), %s3164_s0, 0 }
  0xfc   : > { %614 = sbr.rel (%p3171_p2) target bundleno = 2852 (0xb24), region = 88 }
 0x103   : > { %2521 = dma.done.wait (%p3172_p3), [#allocation4], 16  }
 0x104   : > { %2523 = vsyncadd (%p3172_p3), [#allocation4], 4294967280 }
 0x105   : > { %2525 = dma.done.wait (%p3172_p3), [#allocation6], 32  }
 0x106   : > { %2527 = vsyncadd (%p3172_p3), [#allocation6], 4294967264 }
 0x107   : > { %2529 = dma.done.wait (%p3172_p3), [#allocation9], 32  }
 0x108   : > { %2531 = vsyncadd (%p3172_p3), [#allocation9], 4294967264 }
 0x109   : > { %2533 = dma.done.wait (%p3172_p3), [#allocation12], 32  }
 0x10a   : > { %2535 = vsyncadd (%p3172_p3), [#allocation12], 4294967264 }
 0x10b   : > { %2537 = dma.done.wait (%p3172_p3), [#allocation15], 272  }
 0x10c   : > { %2539 = vsyncadd (%p3172_p3), [#allocation15], 4294967024 }
 0x10d   : > { %2541 = dma.done.wait (%p3172_p3), [#allocation18], 16  }
 0x10e   : > { %2543 = vsyncadd (%p3172_p3), [#allocation18], 4294967280  ;;  %p713_p5 = scmp.lt.s32.totalorder %s2546_s24, 1  ;;  %s3173_s23 = sld [smem:[#allocation26_spill]]  ;;  %vm740_vm0 = vcmask 261120   ;;  %v2188_v14 = vld [vmem:[%s3139_s7] sm:$0xff]  }
 0x10f   : > { %s3174_s22 = sld [smem:[#allocation27_spill]]  ;;  %v2568_v15 = vmov 0.0   ;;  %vm2569_vm1 = vmmov 0   ;;  %v2189_v16 = vld [vmem:[%s3139_s7 + $0x8] sm:$0xff]   ;;  %v2190_v41 = vld [vmem:[%s3137_s5] sm:$0xff]   ;;  %vm944_vm6 = vcmask 64512  }
 0x110   : > { %s3185_s24 = smov (!%p713_p5, %s2546_s24), 1  ;;  %1956 = vmatprep.subr.bf16.mxu1 %v2568_v15  ;;  %1960 = vmatprep.mubr.msk.bf16.mxu1 %vm2569_vm1, %v2568_v15  ;;  %v1887_v34 = vld [vmem:[#allocation3] ss:$0 sm:$0xff]  ;;  %v1888_v36 = vld [vmem:[#allocation5] ss:$0 sm:$0xff]  ;;  %s2570_s21 = smov 120  }
 0x111   : > { %s2978_s30 = sshll.u32 %s3185_s24, 3  ;;  %1957 = vmatpush3.bf16.msra.mxu1 %v2188_v14  ;;  %1972 = vmatprep.subr.bf16.mxu0 %v2568_v15  ;;  %v2191_v44 = vld [vmem:[%s3137_s5 + $0x8] sm:$0xff]   ;;  %s2571_s1 = smov 104   ;;  %vm1009_vm8 = vcmask 1043456   ;;  %vm1169_vm9 = vcmask 130112   ;;  %vm1285_vm10 = vcmask 195712  }
 0x112   : > { %1958 = vmatprep.subr.bf16.mxu1 %v2568_v15  ;;  %1974 = vmatprep.mubr.msk.bf16.mxu0 %vm2569_vm1, %v2568_v15  ;;  %v1889_v47 = vld [vmem:[#allocation8] ss:$0 sm:$0xff]  ;;  %v1893_v55 = vld [vmem:[#allocation7] ss:$0 sm:$0xff]  ;;  %s3175_s18 = sld [smem:[#allocation28_spill]]  ;;  %s2576_s17 = smov 96  }
 0x113   : > { %s2577_s4 = smov 72   ;;  %s2578_s28 = smov 8   ;;  %vm1401_vm11 = vcmask 261312   ;;  %vm1611_vm14 = vcmask 523264  }
 0x114   : > { %s716_s2 = scalar_lea.vmem %s3173_s23, %s2978_s30  ;;  %s2572_s23 = smov 112  }
 0x115   : > { %s723_s0 = scalar_lea.vmem %s3174_s22, %s2978_s30  ;;  %v735_v0 = vld [vmem:[%s716_s2] sm:$0xff]  ;;  %1959 = vmatpush3.bf16.msra.mxu1 %v2189_v16  ;;  %s2579_s20 = smov 16  }
 0x116   : > { %v2988_v1 = vld [vmem:[%s723_s0] sm:$0xff]  ;;  %v741_v2 = vsel %vm740_vm0, %v735_v0, 0.0  ;;  %1964 = vmatprep.subr.bf16.mxu1 %v2568_v15  ;;  %s2575_s0 = smov 80   ;;  %s3176_s29 = sld [smem:[#allocation30_spill]] }
 0x117   : > { %v780_v3 = vsel %vm740_vm0, %v2988_v1, 0.0  ;;  %742 = vadd.xlane.f32.xlu0 %v741_v2  ;;  %s3177_s9 = sld [smem:[#allocation31_spill]]  ;;  %s3178_s19 = sld [smem:[#allocation32_spill]] }
 0x118   : > { %s726_s22 = scalar_lea.vmem %s3175_s18, %s3185_s24  ;;  %s2574_s24 = smov 88  }
 0x11b   : > { %781 = vadd.xlane.f32.xlu0 %v780_v3 }
 0x11d   : > { %s733_s15 = scalar_lea.vmem %s3178_s19, %s2978_s30 }
 0x1a4   : > { %v743_v4 = vpop.xlane.xlu0 %742 }
 0x1a5   : > { %v745_v5 = vmul.f32 0.03125, %v743_v4 }
 0x1a7   : > { %v746_v6 = vsub.f32 %v735_v0, %v745_v5 }
 0x1a8   : > { %v782_v7 = vpop.xlane.xlu0 %781 }
 0x1a9   : > { %v783_v8 = vmul.f32 0.03125, %v782_v7  ;;  %v747_v9 = vmul.f32 %v746_v6, %v746_v6 }
 0x1ab   : > { %v784_v10 = vsub.f32 %v2988_v1, %v783_v8  ;;  %v748_v11 = vsel %vm740_vm0, %v747_v9, 0.0  ;;  %v939_v8 = vlaneseq  ;;  %v737_v9 = vld [vmem:[%s726_s22] sm:$0x1] }
 0x1ac   : > { %749 = vadd.xlane.f32.xlu1 %v748_v11  ;;  %vm738_vm7 = vcmp.ne.f32.partialorder %v737_v9, 0.0 }
 0x1ad   : > { %v785_v12 = vmul.f32 %v784_v10, %v784_v10 }
 0x1af   : > { %v786_v13 = vsel %vm740_vm0, %v785_v12, 0.0  ;;  %v2573_v12 = vmov -1e+09  }
 0x1b0   : > { %787 = vadd.xlane.f32.xlu1 %v786_v13  ;;  %v739_v13 = vsel %vm738_vm7, 0.0, %v2573_v12 }
 0x239   : > { %v750_v17 = vpop.xlane.xlu1 %749 }
 0x23a   : > { %v751_v18 = vmul.f32 0.032258064, %v750_v17 }
 0x23c   : > { %2200 = vrsqrt.f32 %v751_v18  ;;  %vm754_vm2 = vcmp.eq.f32.partialorder %v751_v18, inf  ;;  %v757_v23 = vand.u32 2147483648, %v751_v18  ;;  %vm756_vm3 = vcmp.eq.f32.partialorder %v751_v18, 0.0 }
 0x23d   : > { %v788_v19 = vpop.xlane.xlu1 %787 }
 0x23e   : > { %v789_v20 = vmul.f32 0.032258064, %v788_v19 }
 0x240   : > { %2202 = vrsqrt.f32 %v789_v20  ;;  %vm792_vm4 = vcmp.eq.f32.partialorder %v789_v20, inf  ;;  %v795_v29 = vand.u32 2147483648, %v789_v20  ;;  %vm794_vm5 = vcmp.eq.f32.partialorder %v789_v20, 0.0 }
 0x246   : > { %v2201_v21 = vpop.eup %2200 }
 0x247   : > { %v753_v22 = vmul.f32 %v2201_v21, %v751_v18 }
 0x249   : > { %v755_v24 = vsel %vm754_vm2, %v751_v18, %v753_v22 }
 0x24a   : > { %v2203_v25 = vpop.eup %2202  ;;  %v758_v26 = vsel %vm756_vm3, %v757_v23, %v755_v24 }
 0x24b   : > { %v759_v27 = vadd.f32 1e-06, %v758_v26  ;;  %v791_v28 = vmul.f32 %v2203_v25, %v789_v20 }
 0x24d   : > { %2204 = vrcp.f32 %v759_v27  ;;  %v793_v30 = vsel %vm792_vm4, %v789_v20, %v791_v28 }
 0x24e   : > { %v796_v31 = vsel %vm794_vm5, %v795_v29, %v793_v30 }
 0x24f   : > { %v797_v32 = vadd.f32 1e-06, %v796_v31 }
 0x251   : > { %2206 = vrcp.f32 %v797_v32 }
 0x257   : > { %v2205_v33 = vpop.eup %2204 }
 0x258   : > { %v762_v35 = vmul.f32 %v2205_v33, %v746_v6 }
 0x25a   : > { %v770_v37 = vmul.f32 %v1887_v34, %v762_v35 }
 0x25b   : > { %v2207_v38 = vpop.eup %2206 }
 0x25c   : > { %v778_v39 = vadd.f32 %v1888_v36, %v770_v37  ;;  %v800_v40 = vmul.f32 %v2207_v38, %v784_v10  ;;  %v940_v10 = vshrl.u32 %v939_v8, 7 }
 0x25e   : > { %v779_v42 = vpack.c.bf16 %v778_v39, %v778_v39  ;;  %v801_v43 = vmul.f32 %v1887_v34, %v800_v40  ;;  %v941_v11 = vsub.s32 0, %v940_v10 }
 0x260   : > { %1961 = vmatmul.mubr.msk.bf16.vlgmr.msra.gmra.mrb[0].mxu1 %vm740_vm0, %v779_v42  ;;  %v802_v45 = vadd.f32 %v1888_v36, %v801_v43  ;;  %v942_v14 = vrot.slane %v739_v13, %v941_v11 }
 0x261   : > { %1965 = vmatpush3.bf16.msra.mxu1 %v2190_v41  ;;  %1968 = vmatprep.mubr.msk.bf16.mxu1 %vm2569_vm1, %v2568_v15 }
 0x262   : > { %1966 = vmatprep.subr.bf16.mxu1 %v2568_v15  ;;  %v803_v46 = vpack.c.bf16 %v802_v45, %v802_v45 }
 0x265   : > { %1967 = vmatpush3.bf16.msra.mxu1 %v2191_v44 }
 0x266   : > { %1978 = vmatprep.subr.bf16.mxu1 %v2568_v15 }
 0x268   : > { %1969 = vmatmul.mubr.msk.bf16.vlgmr.msra.gmra.mrb[4].mxu1 %vm740_vm0, %v803_v46 }
 0x269   : > { %1980 = vmatprep.mubr.msk.bf16.mxu1 %vm2569_vm1, %v2568_v15 }
 0x333   : > { %v864_v48 = vpop.f32.mrb[0].mxu1 }
 0x334   : > { %v865_v49 = vadd.f32 %v1889_v47, %v864_v48  ;;  %v1962_v50 = vpop.f32.mrb[1].mxu1 }
 0x335   : > { %v867_v51 = vpop.f32.mrb[2].mxu1 }
 0x336   : > { %v3024_v52 = vpack.c.bf16 %v865_v49, %v865_v49  ;;  %v1963_v53 = vpop.f32.mrb[3].mxu1 }
 0x338   : > { %1057 = vrot.lane.b32.xlu0 %v3024_v52, %s2570_s21  ;;  %v949_v54 = vsel %vm944_vm6, %v3024_v52, 0 }
 0x339   : > { %1973 = vmatpush3.bf16.xpose.msra.mxu0 %v949_v54 }
 0x33a   : > { %1984 = vmatprep.subr.bf16.mxu0 %v2568_v15 }
 0x33b   : > { %v931_v56 = vpop.f32.mrb[4].mxu1 }
 0x33c   : > { %v932_v57 = vadd.f32 %v1893_v55, %v931_v56  ;;  %1289 = vrot.lane.b32.xlu0 %v3024_v52, %s2571_s1  ;;  %v1970_v58 = vpop.f32.mrb[5].mxu1 }
 0x33d   : > { %v934_v59 = vpop.f32.mrb[6].mxu1 }
 0x33e   : > { %v937_v60 = vpack.c.bf16 %v932_v57, %v932_v57  ;;  %v1971_v61 = vpop.f32.mrb[7].mxu1 }
 0x340   : > { %1055 = vrot.lane.b32.xlu1 %v937_v60, %s2570_s21  ;;  %1975 = vmatmul.mubr.msk.bf16.vlgmr.msra.gmra.mrb[0].mxu0 %vm944_vm6, %v937_v60 }
 0x341   : > { %1986 = vmatprep.mubr.msk.bf16.mxu0 %vm2569_vm1, %v2568_v15 }
 0x344   : > { %1173 = vrot.lane.b32.xlu1 %v3024_v52, %s2572_s23 }
 0x348   : > { %1171 = vrot.lane.b32.xlu1 %v937_v60, %s2572_s23 }
 0x34c   : > { %1287 = vrot.lane.b32.xlu1 %v937_v60, %s2571_s1  ;;  %s2580_s1 = smov 24  }
 0x3aa   : > { %v1058_v62 = vpop.permute.xlu0 %1057 }
 0x3ab   : > { %v1063_v63 = vsel %vm944_vm6, %v1058_v62, 0 }
 0x3ac   : > { %1985 = vmatpush3.bf16.xpose.msra.mxu0 %v1063_v63 }
 0x3ad   : > { %1996 = vmatprep.subr.bf16.mxu0 %v2568_v15 }
 0x3ae   : > { %v1290_v4 = vpop.permute.xlu0 %1289 }
 0x3af   : > { %v1295_v6 = vsel %vm944_vm6, %v1290_v4, 0 }
 0x3b2   : > { %v1056_v0 = vpop.permute.xlu1 %1055 }
 0x3b3   : > { %1987 = vmatmul.mubr.msk.bf16.vlgmr.msra.gmra.mrb[4].mxu0 %vm944_vm6, %v1056_v0 }
 0x3b4   : > { %1998 = vmatprep.mubr.msk.bf16.mxu0 %vm2569_vm1, %v2568_v15 }
 0x3b6   : > { %v1174_v2 = vpop.permute.xlu1 %1173 }
 0x3b7   : > { %v1179_v3 = vsel %vm944_vm6, %v1174_v2, 0 }
 0x3b8   : > { %1997 = vmatpush3.bf16.xpose.msra.mxu0 %v1179_v3 }
 0x3b9   : > { %2008 = vmatprep.subr.bf16.mxu0 %v2568_v15 }
 0x3ba   : > { %v1172_v5 = vpop.permute.xlu1 %1171 }
 0x3be   : > { %v1288_v7 = vpop.permute.xlu1 %1287 }
 0x3bf   : > { %1999 = vmatmul.mubr.msk.bf16.vlgmr.msra.gmra.mrb[8].mxu0 %vm944_vm6, %v1172_v5 }
 0x3c0   : > { %2009 = vmatpush3.bf16.xpose.msra.mxu0 %v1295_v6  ;;  %2010 = vmatprep.mubr.msk.bf16.mxu0 %vm2569_vm1, %v2568_v15 }
 0x3c1   : > { %2020 = vmatprep.subr.bf16.mxu0 %v2568_v15 }
 0x3c7   : > { %2011 = vmatmul.mubr.msk.bf16.vlgmr.msra.gmra.mrb[12].mxu0 %vm944_vm6, %v1288_v7 }
 0x3c8   : > { %2024 = vmatprep.mubr.msk.bf16.mxu0 %vm2569_vm1, %v2568_v15 }
 0x413   : > { %v985_v16 = vpop.f32.mrb[0].mxu0 }
 0x414   : > { %v986_v17 = vadd.f32 %v985_v16, %v942_v14  ;;  %v1976_v18 = vpop.f32.mrb[1].mxu0 }
 0x415   : > { %v988_v19 = vpop.f32.mrb[2].mxu0 }
 0x416   : > { %v1977_v20 = vpop.f32.mrb[3].mxu0  ;;  %v991_v21 = vsel %vm944_vm6, %v986_v17, -inf }
 0x417   : > { %992 = vmax.xlane.f32.xlu0 %v991_v21 }
 0x486   : > { %v1099_v22 = vpop.f32.mrb[4].mxu0 }
 0x487   : > { %v1100_v23 = vadd.f32 %v1099_v22, %v942_v14  ;;  %v1988_v24 = vpop.f32.mrb[5].mxu0 }
 0x488   : > { %v1102_v25 = vpop.f32.mrb[6].mxu0 }
 0x489   : > { %v1989_v26 = vpop.f32.mrb[7].mxu0  ;;  %v1105_v27 = vsel %vm944_vm6, %v1100_v23, -inf }
 0x48a   : > { %1106 = vmax.xlane.f32.xlu1 %v1105_v27 }
 0x492   : > { %v1215_v28 = vpop.f32.mrb[8].mxu0 }
 0x493   : > { %v1216_v29 = vadd.f32 %v1215_v28, %v942_v14  ;;  %v2000_v30 = vpop.f32.mrb[9].mxu0 }
 0x494   : > { %v1218_v31 = vpop.f32.mrb[10].mxu0 }
 0x495   : > { %v2001_v32 = vpop.f32.mrb[11].mxu0  ;;  %v1221_v33 = vsel %vm944_vm6, %v1216_v29, -inf }
 0x496   : > { %1222 = vmax.xlane.f32.xlu0 %v1221_v33 }
 0x49a   : > { %v1331_v34 = vpop.f32.mrb[12].mxu0 }
 0x49b   : > { %v1332_v35 = vadd.f32 %v1331_v34, %v942_v14  ;;  %v2012_v36 = vpop.f32.mrb[13].mxu0  ;;  %v2192_v34 = vld [vmem:[%s3176_s29] sm:$0xff]  }
 0x49c   : > { %v1334_v37 = vpop.f32.mrb[14].mxu0  ;;  %2021 = vmatpush3.bf16.msra.mxu0 %v2192_v34 }
 0x49d   : > { %v2013_v38 = vpop.f32.mrb[15].mxu0  ;;  %v1337_v39 = vsel %vm944_vm6, %v1332_v35, -inf  ;;  %2022 = vmatprep.subr.bf16.mxu0 %v2568_v15 }
 0x49e   : > { %1338 = vmax.xlane.f32.xlu0 %v1337_v39 }
 0x4a4   : > { %v993_v40 = vpop.xlane.xlu0 %992 }
 0x4a5   : > { %v994_v41 = vsub.f32 %v986_v17, %v993_v40 }
 0x4a7   : > { %v995_v42 = vmul.f32 1.442695, %v994_v41 }
 0x4a9   : > { %2208 = vpow2.f32 %v995_v42 }
 0x4b3   : > { %v2209_v43 = vpop.eup %2208 }
 0x4b4   : > { %v997_v44 = vsel %vm944_vm6, %v2209_v43, 0.0 }
 0x4b5   : > { %998 = vadd.xlane.f32.xlu0 %v997_v44 }
 0x517   : > { %v1107_v45 = vpop.xlane.xlu1 %1106 }
 0x518   : > { %v1108_v46 = vsub.f32 %v1100_v23, %v1107_v45 }
 0x51a   : > { %v1109_v47 = vmul.f32 1.442695, %v1108_v46  ;;  %v1908_v46 = vld [vmem:[#allocation10] ss:$0 sm:$0xff] }
 0x51c   : > { %2210 = vpow2.f32 %v1109_v47 }
 0x523   : > { %v1223_v48 = vpop.xlane.xlu0 %1222 }
 0x524   : > { %v1224_v49 = vsub.f32 %v1216_v29, %v1223_v48 }
 0x526   : > { %v2211_v50 = vpop.eup %2210  ;;  %v1225_v51 = vmul.f32 1.442695, %v1224_v49 }
 0x527   : > { %v1111_v53 = vsel %vm944_vm6, %v2211_v50, 0.0 }
 0x528   : > { %2212 = vpow2.f32 %v1225_v51  ;;  %1112 = vadd.xlane.f32.xlu1 %v1111_v53 }
 0x52b   : > { %v1339_v56 = vpop.xlane.xlu0 %1338 }
 0x52c   : > { %v1340_v57 = vsub.f32 %v1332_v35, %v1339_v56  ;;  %v2193_v35 = vld [vmem:[%s3176_s29 + $0x8] sm:$0xff]  }
 0x52d   : > { %2023 = vmatpush3.bf16.msra.mxu0 %v2193_v35 }
 0x52e   : > { %v1341_v58 = vmul.f32 1.442695, %v1340_v57  ;;  %2036 = vmatprep.subr.bf16.mxu0 %v2568_v15 }
 0x530   : > { %2214 = vpow2.f32 %v1341_v58 }
 0x532   : > { %v2213_v54 = vpop.eup %2212 }
 0x533   : > { %v1227_v55 = vsel %vm944_vm6, %v2213_v54, 0.0 }
 0x534   : > { %1228 = vadd.xlane.f32.xlu0 %v1227_v55 }
 0x539   : > { %1117 = vrot.lane.b32.xlu1 %v3024_v52, %s2574_s24 }
 0x53a   : > { %v2215_v59 = vpop.eup %2214 }
 0x53b   : > { %v1343_v60 = vsel %vm944_vm6, %v2215_v59, 0.0 }
 0x53d   : > { %1233 = vrot.lane.b32.xlu1 %v3024_v52, %s2575_s0 }
 0x542   : > { %v999_v61 = vpop.xlane.xlu0 %998 }
 0x543   : > { %2216 = vrcp.f32 %v999_v61  ;;  %v2197_v61 = vld [vmem:[%s3177_s9 + $0x8] sm:$0xff]  }
 0x54a   : > { %1004 = vrot.lane.b32.xlu0 %v3024_v52, %s2576_s17 }
 0x54d   : > { %v2217_v63 = vpop.eup %2216 }
 0x54e   : > { %v1001_v2 = vmul.f32 %v2217_v63, %v2209_v43 }
 0x550   : > { %v1002_v6 = vpack.c.bf16 %v1001_v2, %v1001_v2 }
 0x561   : > { %1344 = vadd.xlane.f32.xlu1 %v1343_v60  ;;  %v2195_v60 = vld [vmem:[#allocation14 + $0x8] sm:$0xff]  }
 0x572   : > { %1349 = vrot.lane.b32.xlu1 %v3024_v52, %s2577_s4 }
 0x5b5   : > { %v1113_v62 = vpop.xlane.xlu1 %1112 }
 0x5b6   : > { %2218 = vrcp.f32 %v1113_v62 }
 0x5b9   : > { %v1118_v5 = vpop.permute.xlu1 %1117 }
 0x5ba   : > { %v1123_v52 = vsel %vm1009_vm8, %v1118_v5, 0 }
 0x5bd   : > { %v1234_v9 = vpop.permute.xlu1 %1233 }
 0x5be   : > { %v1239_v12 = vsel %vm1009_vm8, %v1234_v9, 0  ;;  %v1910_v9 = vld [vmem:[#allocation13] ss:$0 sm:$0xff] }
 0x5c0   : > { %v2219_v7 = vpop.eup %2218 }
 0x5c1   : > { %v1229_v0 = vpop.xlane.xlu0 %1228  ;;  %v1115_v8 = vmul.f32 %v2219_v7, %v2211_v50 }
 0x5c2   : > { %2220 = vrcp.f32 %v1229_v0 }
 0x5c3   : > { %v1116_v10 = vpack.c.bf16 %v1115_v8, %v1115_v8 }
 0x5c5   : > { %v1005_v3 = vpop.permute.xlu0 %1004 }
 0x5c6   : > { %v1011_v4 = vsel %vm1009_vm8, %v1005_v3, 0 }
 0x5c7   : > { %1979 = vmatpush3.bf16.msra.mxu1 %v1011_v4 }
 0x5c8   : > { %1990 = vmatprep.subr.bf16.mxu1 %v2568_v15 }
 0x5ca   : > { %1981 = vmatmul.mubr.msk.bf16.vlgmr.msra.gmra.mrb[8].mxu1 %vm944_vm6, %v1002_v6 }
 0x5cb   : > { %1991 = vmatpush3.bf16.msra.mxu1 %v1123_v52  ;;  %1992 = vmatprep.mubr.msk.bf16.mxu1 %vm2569_vm1, %v2568_v15  ;;  %v1909_v52 = vld [vmem:[#allocation11] ss:$0 sm:$0xff] }
 0x5cc   : > { %2002 = vmatprep.subr.bf16.mxu1 %v2568_v15  ;;  %v2221_v11 = vpop.eup %2220 }
 0x5cd   : > { %v1231_v13 = vmul.f32 %v2221_v11, %v2213_v54 }
 0x5cf   : > { %v1232_v14 = vpack.c.bf16 %v1231_v13, %v1231_v13  ;;  %v2198_v13 = vld [vmem:[%s3177_s9 + $0x10] sm:$0xff]  }
 0x5d2   : > { %1993 = vmatmul.mubr.msk.bf16.vlgmr.msra.gmra.mrb[12].mxu1 %vm944_vm6, %v1116_v10 }
 0x5d3   : > { %2003 = vmatpush3.bf16.msra.mxu1 %v1239_v12  ;;  %2004 = vmatprep.mubr.msk.bf16.mxu1 %vm2569_vm1, %v2568_v15 }
 0x5d4   : > { %2014 = vmatprep.subr.bf16.mxu1 %v2568_v15 }
 0x5da   : > { %2005 = vmatmul.mubr.msk.bf16.vlgmr.msra.gmra.mrb[16].mxu1 %vm944_vm6, %v1232_v14  ;;  %v2199_v14 = vld [vmem:[%s3177_s9 + $0x18] sm:$0xff]  }
 0x5db   : > { %2016 = vmatprep.mubr.msk.bf16.mxu1 %vm2569_vm1, %v2568_v15 }
 0x5ee   : > { %v1345_v16 = vpop.xlane.xlu1 %1344 }
 0x5ef   : > { %2222 = vrcp.f32 %v1345_v16  ;;  %v1911_v16 = vld [vmem:[#allocation16] ss:$0 sm:$0xff] }
 0x5f2   : > { %v1350_v17 = vpop.permute.xlu1 %1349 }
 0x5f3   : > { %v1355_v18 = vsel %vm1009_vm8, %v1350_v17, 0 }
 0x5f4   : > { %2015 = vmatpush3.bf16.msra.mxu1 %v1355_v18 }
 0x5f5   : > { %2028 = vmatprep.subr.bf16.mxu1 %v2568_v15 }
 0x5f9   : > { %v2223_v19 = vpop.eup %2222 }
 0x5fa   : > { %v1347_v20 = vmul.f32 %v2223_v19, %v2215_v59  ;;  %v2194_v59 = vld [vmem:[#allocation14] sm:$0xff]  }
 0x5fc   : > { %v1348_v21 = vpack.c.bf16 %v1347_v20, %v1347_v20 }
 0x5fe   : > { %2017 = vmatmul.mubr.msk.bf16.vlgmr.msra.gmra.mrb[20].mxu1 %vm944_vm6, %v1348_v21 }
 0x5ff   : > { %2032 = vmatprep.mubr.msk.bf16.mxu1 %vm2569_vm1, %v2568_v15  ;;  %2029 = vmatpush3.bf16.msra.mxu1 %v2194_v59 }
 0x600   : > { %2030 = vmatprep.subr.bf16.mxu1 %v2568_v15 }
 0x603   : > { %2031 = vmatpush3.bf16.msra.mxu1 %v2195_v60 }
 0x69d   : > { %v1047_v22 = vpop.f32.mrb[8].mxu1 }
 0x69e   : > { %1053 = vst.msk [vmem:[#allocation2] sm:$0xff] %vm944_vm6, %v1047_v22  ;;  %v1982_v23 = vpop.f32.mrb[9].mxu1 }
 0x69f   : > { %v1050_v24 = vpop.f32.mrb[10].mxu1 }
 0x6a0   : > { %v1983_v25 = vpop.f32.mrb[11].mxu1 }
 0x6a1   : > { %v1920_v25 = vld [vmem:[#allocation17] ss:$0 sm:$0xff] }
 0x6a5   : > { %v1159_v26 = vpop.f32.mrb[12].mxu1 }
 0x6a6   : > { %1166 = vrot.lane.b32.xlu0 %v1159_v26, %s2578_s28  ;;  %v1994_v27 = vpop.f32.mrb[13].mxu1 }
 0x6a7   : > { %v1162_v28 = vpop.f32.mrb[14].mxu1 }
 0x6a8   : > { %v1995_v29 = vpop.f32.mrb[15].mxu1 }
 0x6ad   : > { %v1275_v30 = vpop.f32.mrb[16].mxu1 }
 0x6ae   : > { %1282 = vrot.lane.b32.xlu1 %v1275_v30, %s2579_s20  ;;  %v2006_v31 = vpop.f32.mrb[17].mxu1 }
 0x6af   : > { %v1278_v32 = vpop.f32.mrb[18].mxu1 }
 0x6b0   : > { %v2007_v33 = vpop.f32.mrb[19].mxu1 }
 0x6d1   : > { %v1391_v36 = vpop.f32.mrb[20].mxu1 }
 0x6d2   : > { %1398 = vrot.lane.b32.xlu0 %v1391_v36, %s2580_s1  ;;  %v2018_v37 = vpop.f32.mrb[21].mxu1 }
 0x6d3   : > { %v1394_v38 = vpop.f32.mrb[22].mxu1 }
 0x6d4   : > { %v2019_v39 = vpop.f32.mrb[23].mxu1 }
 0x718   : > { %v1167_v40 = vpop.permute.xlu0 %1166 }
 0x719   : > { %1170 = vst.msk [vmem:[#allocation2] sm:$0xff] %vm1169_vm9, %v1167_v40 }
 0x720   : > { %v1283_v41 = vpop.permute.xlu1 %1282 }
 0x721   : > { %1286 = vst.msk [vmem:[#allocation2] sm:$0xff] %vm1285_vm10, %v1283_v41 }
 0x744   : > { %v1399_v42 = vpop.permute.xlu0 %1398 }
 0x745   : > { %1402 = vst.msk [vmem:[#allocation2] sm:$0xff] %vm1401_vm11, %v1399_v42 }
 0x74c   : > { %v1403_v43 = vld [vmem:[#allocation2] sm:$0xff] }
 0x74d   : > { %v1404_v44 = vpack.c.bf16 %v1403_v43, %v1403_v43 }
 0x74f   : > { %2025 = vmatmul.mubr.msk.bf16.vlgmr.msra.gmra.mrb[16].mxu0 %vm740_vm0, %v1404_v44 }
 0x750   : > { %2044 = vmatprep.mubr.msk.bf16.mxu0 %vm2569_vm1, %v2568_v15 }
 0x822   : > { %v1458_v45 = vpop.f32.mrb[16].mxu0 }
 0x823   : > { %v1464_v47 = vadd.f32 %v1458_v45, %v2988_v1  ;;  %v2026_v48 = vpop.f32.mrb[17].mxu0  ;;  %v2196_v1 = vld [vmem:[%s3177_s9] sm:$0xff]  }
 0x824   : > { %v1461_v49 = vpop.f32.mrb[18].mxu0  ;;  %2037 = vmatpush3.bf16.msra.mxu0 %v2196_v1 }
 0x825   : > { %v1472_v50 = vadd.f32 %v1908_v46, %v1464_v47  ;;  %v2027_v51 = vpop.f32.mrb[19].mxu0  ;;  %2038 = vmatprep.subr.bf16.mxu0 %v2568_v15 }
 0x827   : > { %v1473_v53 = vsel %vm740_vm0, %v1472_v50, 0.0 }
 0x828   : > { %1474 = vadd.xlane.f32.xlu1 %v1473_v53  ;;  %2039 = vmatpush3.bf16.msra.mxu0 %v2197_v61 }
 0x829   : > { %2040 = vmatprep.subr.bf16.mxu0 %v2568_v15 }
 0x82c   : > { %2041 = vmatpush3.bf16.msra.mxu0 %v2198_v13 }
 0x82d   : > { %2042 = vmatprep.subr.bf16.mxu0 %v2568_v15 }
 0x830   : > { %2043 = vmatpush3.bf16.msra.mxu0 %v2199_v14 }
 0x8b5   : > { %v1475_v54 = vpop.xlane.xlu1 %1474 }
 0x8b6   : > { %v1476_v55 = vmul.f32 0.03125, %v1475_v54 }
 0x8b8   : > { %v1477_v56 = vsub.f32 %v1472_v50, %v1476_v55 }
 0x8ba   : > { %v1478_v57 = vmul.f32 %v1477_v56, %v1477_v56 }
 0x8bc   : > { %v1479_v58 = vsel %vm740_vm0, %v1478_v57, 0.0 }
 0x8bd   : > { %1480 = vadd.xlane.f32.xlu0 %v1479_v58 }
 0x94a   : > { %v1481_v62 = vpop.xlane.xlu0 %1480 }
 0x94b   : > { %v1482_v63 = vmul.f32 0.032258064, %v1481_v62 }
 0x94d   : > { %2224 = vrsqrt.f32 %v1482_v63  ;;  %vm1485_vm12 = vcmp.eq.f32.partialorder %v1482_v63, inf  ;;  %v1488_v3 = vand.u32 2147483648, %v1482_v63  ;;  %vm1487_vm13 = vcmp.eq.f32.partialorder %v1482_v63, 0.0 }
 0x957   : > { %v2225_v0 = vpop.eup %2224 }
 0x958   : > { %v1484_v2 = vmul.f32 %v2225_v0, %v1482_v63 }
 0x95a   : > { %v1486_v4 = vsel %vm1485_vm12, %v1482_v63, %v1484_v2 }
 0x95b   : > { %v1489_v5 = vsel %vm1487_vm13, %v1488_v3, %v1486_v4 }
 0x95c   : > { %v1490_v6 = vadd.f32 1e-06, %v1489_v5 }
 0x95e   : > { %2226 = vrcp.f32 %v1490_v6 }
 0x968   : > { %v2227_v7 = vpop.eup %2226 }
 0x969   : > { %v1493_v8 = vmul.f32 %v2227_v7, %v1477_v56 }
 0x96b   : > { %v1501_v10 = vmul.f32 %v1909_v52, %v1493_v8 }
 0x96d   : > { %v1509_v11 = vadd.f32 %v1910_v9, %v1501_v10 }
 0x96f   : > { %v1510_v12 = vpack.c.bf16 %v1509_v11, %v1509_v11 }
 0x971   : > { %2033 = vmatmul.mubr.msk.bf16.vlgmr.msra.gmra.mrb[24].mxu1 %vm740_vm0, %v1510_v12 }
 0xa44   : > { %v1571_v17 = vpop.f32.mrb[24].mxu1 }
 0xa45   : > { %v1572_v18 = vadd.f32 %v1911_v16, %v1571_v17  ;;  %v2034_v19 = vpop.f32.mrb[25].mxu1 }
 0xa46   : > { %v1574_v20 = vpop.f32.mrb[26].mxu1 }
 0xa47   : > { %v1577_v21 = vmax.f32 %v1572_v18, 0.0  ;;  %v2035_v22 = vpop.f32.mrb[27].mxu1 }
 0xa49   : > { %v1578_v23 = vpack.c.bf16 %v1577_v21, %v1577_v21 }
 0xa4b   : > { %2045 = vmatmul.mubr.msk.bf16.vlgmr.msra.gmra.mrb[20].mxu0 %vm1611_vm14, %v1578_v23 }
 0xb1e   : > { %v1649_v24 = vpop.f32.mrb[20].mxu0 }
 0xb1f   : > { %v1655_v26 = vadd.f32 %v1649_v24, %v1472_v50  ;;  %v2046_v15 = vpop.f32.mrb[21].mxu0 }
 0xb20   : > { %v1652_v27 = vpop.f32.mrb[22].mxu0 }
 0xb21   : > { %v1663_v28 = vadd.f32 %v1920_v25, %v1655_v26  ;;  %v2047_v29 = vpop.f32.mrb[23].mxu0 }
 0xb23   : > { %1664 = vst.msk [vmem:[%s733_s15] sm:$0xff] %vm740_vm0, %v1663_v28 }
 0xb24 PF: > { %s3179_s26 = sld [smem:[#allocation25_spill]]  ;;  %s3180_s24 = smov %s2550_s25 }
 0xb25   : > { %s3181_s25 = smov %s3183_s27 }
 0xb2a   : > { %s33_s26 = sadd.s32 1, %s3179_s26  }
 0xb2b   : > { %p30_p7 = scmp.ge.s32.totalorder %s33_s26, 4  }
 0xb2d   :  { %32 = sbr.rel (!%p30_p7) target bundleno = 15 (0xf), region = 165 }
 0xb34   :  { %1690 = vsyncpa [#allocation4], 1 }
 0xb35   :  { %1692 = vsyncpa [#allocation4 + $0x1], 1 }
 0xb36   :  { %1693 = vsyncpa [#allocation6], 1 }
 0xb37   :  { %1694 = vsyncpa [#allocation9], 1 }
 0xb38   :  { %1695 = vsyncpa [#allocation12], 1 }
 0xb39   :  { %1696 = vsyncpa [#allocation15], 1 }
 0xb3a   :  { %1697 = vsyncpa [#allocation18], 1 }

</bundles_post_ra>
